<compile_context>
chip_gen: v6e
topology: v6e:2x2x1
jax: 0.10.0
libtpu: 0.0.40
codegen_flags: <defaults>
</compile_context>

<pallas_src>
from functools import partial

import numpy as np
import jax
import jax.numpy as jnp
from jax.experimental import pallas as pl
from jax.experimental.pallas import tpu as pltpu


# ----------------------------------------------------------------------------
# Model dimensions (stand-in encoder/decoder around the class-conditioned VAE).
# ----------------------------------------------------------------------------
IMG = 16              # input spatial size (H = W), power of two (mask uses &)
LAT_HW = IMG // 2     # latent spatial size (stride-2 encoder)
IN_CH = 3
HIDDEN = 8
LATENT = 4
NUM_CLASSES = 10

N_IMG = IMG * IN_CH        # 48  lanes of the image slab
N_HID = IMG * HIDDEN       # 128 lanes of the hidden slab
N_LAT = LAT_HW * LATENT    # 32  lanes of the latent slab
N_UP = IMG * LATENT        # 64  lanes of the upsampled latent slab


# ----------------------------------------------------------------------------
# Fused Pallas kernel: enc1 -> enc2(s2) -> reparam(+class emb) -> 2x up ->
# dec1 -> dec2.  Every intermediate stays in VMEM/vregs.
# ----------------------------------------------------------------------------
def _fused_vae_kernel(c_ref,                               # scalar prefetch (SMEM)
                      x_ref, eps_ref,                      # per-step inputs
                      w1_ref, b1_ref,
                      s2_ref, w2_ref, b2_ref,
                      wc_ref, bc_ref,
                      upr_ref, upc_ref,
                      w3_ref, b3_ref, w4_ref, b4_ref,      # resident weights
                      mom_ref, xrec_ref):                  # per-step outputs
    f32, bf16 = jnp.float32, jnp.bfloat16
    M = x_ref.shape[0]           # TB * IMG rows in this step
    TB = M // IMG                # images stacked along the sublane axis

    # Per-image boundary masks for the +/-1 row shifts (images are stacked on
    # the sublane axis, so a global shift must be masked at image borders).
    row_in_img = jax.lax.broadcasted_iota(jnp.int32, (M, 1), 0) & (IMG - 1)
    ok_prev = row_in_img > 0             # rows that have an in-image row above
    ok_next = row_in_img < IMG - 1       # rows that have an in-image row below

    def conv3x3_s1(slab, w_ref_, b_ref_, relu):
        """3x3 / stride-1 / pad-1 conv on a (M, W*Cin) bf16 slab.

        kw taps are folded host-side into (3, W*Cin, W*Cout) block-diagonal
        matrices, so the conv is 3 MXU matmuls; the +/-1 row shifts run on
        the VPU (concat + mask), not the MXU.  Only one shifted slab is live
        at a time."""
        zero_row = jnp.zeros((1, slab.shape[1]), slab.dtype)
        acc = jnp.dot(slab, w_ref_[1], preferred_element_type=f32)      # kh=1
        prev = jnp.concatenate([zero_row, slab[:-1]], axis=0)           # r <- r-1
        prev = jnp.where(ok_prev, prev, jnp.zeros_like(prev))
        acc = acc + jnp.dot(prev, w_ref_[0], preferred_element_type=f32)
        nxt = jnp.concatenate([slab[1:], zero_row], axis=0)             # r <- r+1
        nxt = jnp.where(ok_next, nxt, jnp.zeros_like(nxt))
        acc = acc + jnp.dot(nxt, w_ref_[2], preferred_element_type=f32)
        acc = acc + b_ref_[...]
        return jnp.maximum(acc, 0.0) if relu else acc

    # ------------------------------- encoder ---------------------------------
    x = x_ref[...]                                              # (M, 48) bf16
    h = conv3x3_s1(x, w1_ref, b1_ref, relu=True).astype(bf16)   # (M, 128)

    # enc2: 3x3 / stride-2 conv with a [mu | logvar] lane split.  The stride-2
    # row subsampling + per-image zero padding is a tiny block-diagonal 0/1
    # select matmul per tap.
    mom = jnp.zeros((M // 2, 2 * N_LAT), f32)
    for kh in range(3):
        rows = jnp.dot(s2_ref[kh], h, preferred_element_type=f32).astype(bf16)
        mom = mom + jnp.dot(rows, w2_ref[kh], preferred_element_type=f32)
    mom = mom + b2_ref[...]
    mom_ref[...] = mom                                          # (M/2, 64) f32

    mu = mom[:, :N_LAT]
    logvar = mom[:, N_LAT:]

    # ---------------- reparameterize: z = mu + eps*std + class_embedding -----
    std = jnp.exp(0.5 * logvar)
    z = mu + eps_ref[...] * std                                 # (M/2, 32) f32

    base = pl.program_id(0) * TB
    pieces = []
    for t in range(TB):                                         # static loop
        cls = c_ref[base + t]                                   # SMEM scalar
        row = wc_ref[pl.ds(cls, 1), :]                          # (1, 32) gather
        pieces.append(jnp.broadcast_to(row, (LAT_HW, N_LAT)))
    z = z + jnp.concatenate(pieces, axis=0) + bc_ref[...]

    # ------------------------------- decoder ---------------------------------
    # 2x nearest-neighbour upsample as two tiny 0/1 matmuls (lanes then rows).
    zb = z.astype(bf16)
    zc = jnp.dot(zb, upc_ref[...], preferred_element_type=f32).astype(bf16)
    z_up = jnp.dot(upr_ref[...], zc, preferred_element_type=f32).astype(bf16)
    d = conv3x3_s1(z_up, w3_ref, b3_ref, relu=True).astype(bf16)   # (M, 128)
    xrec_ref[...] = conv3x3_s1(d, w4_ref, b4_ref, relu=False)      # (M, 48)


# ----------------------------------------------------------------------------
# Host-side weight packing (plain numpy, done once).
# ----------------------------------------------------------------------------
def _conv_taps_s1_folded(w, width):
    """3x3/s1/p1 conv -> (3, width*Cin, width*Cout) bf16 kw-folded taps
    (column shifts + zero padding folded into block-diagonal placement)."""
    w = np.asarray(w, np.float32)
    cout, cin, KH, KW = w.shape
    taps = np.zeros((KH, width * cin, width * cout), np.float32)
    for kh in range(KH):
        for kw in range(KW):
            wt = w[:, :, kh, kw].T                               # (cin, cout)
            for ow in range(width):
                wi = ow + kw - 1
                if 0 <= wi < width:
                    taps[kh, wi * cin:(wi + 1) * cin,
                         ow * cout:(ow + 1) * cout] += wt
    return jnp.asarray(taps, jnp.bfloat16)


def _conv_taps_s2_folded(w, width, out_w, latent):
    """3x3/s2/p1 encoder conv producing a [mu | logvar] lane layout.
    w: (2*latent, Cin, 3, 3) -> (3, width*Cin, 2*out_w*latent) bf16."""
    w = np.asarray(w, np.float32)
    cout, cin, KH, KW = w.shape
    taps = np.zeros((KH, width * cin, 2 * out_w * latent), np.float32)
    for kh in range(KH):
        for kw in range(KW):
            wt = w[:, :, kh, kw].T                               # (cin, 2*latent)
            for ow in range(out_w):
                wi = 2 * ow + kw - 1
                if 0 <= wi < width:
                    taps[kh, wi * cin:(wi + 1) * cin,
                         ow * latent:(ow + 1) * latent] += wt[:, :latent]
                    taps[kh, wi * cin:(wi + 1) * cin,
                         out_w * latent + ow * latent:
                         out_w * latent + (ow + 1) * latent] += wt[:, latent:]
    return jnp.asarray(taps, jnp.bfloat16)


def _stride2_row_select(tb):
    """Block-diagonal 0/1 matrices: out_row[t,oh] <- in_row[t, 2*oh+kh-1]."""
    s = np.zeros((3, tb * LAT_HW, tb * IMG), np.float32)
    for kh in range(3):
        for t in range(tb):
            for oh in range(LAT_HW):
                ih = 2 * oh + kh - 1
                if 0 <= ih < IMG:
                    s[kh, t * LAT_HW + oh, t * IMG + ih] = 1.0
    return jnp.asarray(s, jnp.bfloat16)


def _upsample_rows(tb):
    u = np.zeros((tb * IMG, tb * LAT_HW), np.float32)
    for r in range(tb * IMG):
        u[r, r // 2] = 1.0                    # valid because IMG == 2*LAT_HW
    return jnp.asarray(u, jnp.bfloat16)


def _upsample_lanes():
    d = np.zeros((N_LAT, N_UP), np.float32)
    for w in range(LAT_HW):
        for p in range(2):
            for c in range(LATENT):
                d[w * LATENT + c, (2 * w + p) * LATENT + c] = 1.0
    return jnp.asarray(d, jnp.bfloat16)


def _lane_bias(b, reps):
    return jnp.asarray(np.tile(np.asarray(b, np.float32), reps)[None, :])


def pack_params(params, tb):
    b2 = np.asarray(params["enc2_b"], np.float32)
    b2_row = np.concatenate([np.tile(b2[:LATENT], LAT_HW),
                             np.tile(b2[LATENT:], LAT_HW)])[None, :]
    return {
        "w1": _conv_taps_s1_folded(params["enc1_w"], IMG),
        "b1": _lane_bias(params["enc1_b"], IMG),
        "s2": _stride2_row_select(tb),
        "w2": _conv_taps_s2_folded(params["enc2_w"], IMG, LAT_HW, LATENT),
        "b2": jnp.asarray(b2_row),
        "wc": jnp.asarray(np.tile(np.asarray(params["cls_w"], np.float32),
                                  (1, LAT_HW))),
        "bc": _lane_bias(params["cls_b"], LAT_HW),
        "upr": _upsample_rows(tb),
        "upc": _upsample_lanes(),
        "w3": _conv_taps_s1_folded(params["dec1_w"], IMG),
        "b3": _lane_bias(params["dec1_b"], IMG),
        "w4": _conv_taps_s1_folded(params["dec2_w"], IMG),
        "b4": _lane_bias(params["dec2_b"], IMG),
    }


# ----------------------------------------------------------------------------
# pallas_call wrapper
# ----------------------------------------------------------------------------
def _build_vae_call(batch, tb):
    m, m2 = tb * IMG, tb * LAT_HW

    def step(shape):          # per-grid-step block (index_map gets c_ids ref too)
        return pl.BlockSpec(shape, lambda b, c_ids: (b, 0))

    def res(shape):           # grid-resident full-array block
        return pl.BlockSpec(shape, lambda b, c_ids: (0,) * len(shape))

    in_specs = [
        step((m, N_IMG)),                       # x slab  (rows = TB*H, lanes = W*C)
        step((m2, N_LAT)),                      # eps slab
        res((3, N_IMG, N_HID)), res((1, N_HID)),            # enc1 taps / bias
        res((3, m2, m)),                                     # enc2 stride-2 select
        res((3, N_HID, 2 * N_LAT)), res((1, 2 * N_LAT)),     # enc2 taps / bias
        res((NUM_CLASSES, N_LAT)), res((1, N_LAT)),          # class emb W / b
        res((m, m2)), res((N_LAT, N_UP)),                    # upsample rows / lanes
        res((3, N_UP, N_HID)), res((1, N_HID)),              # dec1 taps / bias
        res((3, N_HID, N_IMG)), res((1, N_IMG)),             # dec2 taps / bias
    ]
    out_specs = [step((m2, 2 * N_LAT)), step((m, N_IMG))]
    out_shape = [
        jax.ShapeDtypeStruct((batch * LAT_HW, 2 * N_LAT), jnp.float32),  # [mu|logvar]
        jax.ShapeDtypeStruct((batch * IMG, N_IMG), jnp.float32),         # x_recon
    ]
    return pl.pallas_call(
        _fused_vae_kernel,
        out_shape=out_shape,
        grid_spec=pltpu.PrefetchScalarGridSpec(
            num_scalar_prefetch=1,               # int32 class ids -> SMEM
            grid=(batch // tb,),
            in_specs=in_specs,
            out_specs=out_specs),
        compiler_params=pltpu.CompilerParams(
            dimension_semantics=("parallel",)),  # v7x: grid steps over 2 TCs
    )


@partial(jax.jit, static_argnames=("tb",))
def forward(packed, x, c, key, *, tb):
    """Mirrors ClassConditionedVAE.forward: returns (x_recon, mu, logvar)."""
    B = x.shape[0]
    assert B % tb == 0, "batch must be a multiple of the per-step stack size"

    xn = jnp.transpose(x, (0, 2, 3, 1)).reshape(B * IMG, N_IMG).astype(jnp.bfloat16)
    eps = jax.random.normal(key, (B * LAT_HW, N_LAT), jnp.float32)
    c = c.astype(jnp.int32)

    moments, xrec = _build_vae_call(B, tb)(
        c, xn, eps,
        packed["w1"], packed["b1"],
        packed["s2"], packed["w2"], packed["b2"],
        packed["wc"], packed["bc"],
        packed["upr"], packed["upc"],
        packed["w3"], packed["b3"], packed["w4"], packed["b4"])

    mom = moments.reshape(B, LAT_HW, 2 * N_LAT)
    mu = mom[:, :, :N_LAT].reshape(B, LAT_HW, LAT_HW, LATENT).transpose(0, 3, 1, 2)
    logvar = mom[:, :, N_LAT:].reshape(B, LAT_HW, LAT_HW, LATENT).transpose(0, 3, 1, 2)
    x_recon = xrec.reshape(B, IMG, IMG, IN_CH).transpose(0, 3, 1, 2)
    return x_recon, mu, logvar


# ----------------------------------------------------------------------------
# Parameters (synthetic stand-in for the pretrained AutoencoderKL + class emb.)
# ----------------------------------------------------------------------------
def init_params(key):
    ks = jax.random.split(key, 10)
    s = 0.1

    def nrm(k, shape):
        return s * jax.random.normal(k, shape, jnp.float32)

    return {
        # encoder: conv3x3/s1 (in_ch -> hidden), conv3x3/s2 (hidden -> 2*latent)
        "enc1_w": nrm(ks[0], (HIDDEN, IN_CH, 3, 3)),
        "enc1_b": nrm(ks[1], (HIDDEN,)),
        "enc2_w": nrm(ks[2], (2 * LATENT, HIDDEN, 3, 3)),
        "enc2_b": nrm(ks[3], (2 * LATENT,)),
        # class embedding: Linear(num_classes, latent_dim)
        "cls_w": nrm(ks[4], (NUM_CLASSES, LATENT)),
        "cls_b": nrm(ks[5], (LATENT,)),
        # decoder: conv3x3/s1 (latent -> hidden), conv3x3/s1 (hidden -> in_ch)
        "dec1_w": nrm(ks[6], (HIDDEN, LATENT, 3, 3)),
        "dec1_b": nrm(ks[7], (HIDDEN,)),
        "dec2_w": nrm(ks[8], (IN_CH, HIDDEN, 3, 3)),
        "dec2_b": nrm(ks[9], (IN_CH,)),
    }


# ----------------------------------------------------------------------------
# Pure-JAX reference (f32) for a tolerance check (kernel uses bf16 MXU operands).
# ----------------------------------------------------------------------------
def reference_forward(params, x, c, key):
    def conv(h, w, b, stride):
        y = jax.lax.conv_general_dilated(
            h, w, (stride, stride), ((1, 1), (1, 1)),
            dimension_numbers=("NCHW", "OIHW", "NCHW"))
        return y + b[None, :, None, None]

    B = x.shape[0]
    h = jax.nn.relu(conv(x, params["enc1_w"], params["enc1_b"], 1))
    mom = conv(h, params["enc2_w"], params["enc2_b"], 2)
    mu, logvar = mom[:, :LATENT], mom[:, LATENT:]
    eps = jax.random.normal(key, (B * LAT_HW, N_LAT), jnp.float32)
    eps = eps.reshape(B, LAT_HW, LAT_HW, LATENT).transpose(0, 3, 1, 2)
    std = jnp.exp(0.5 * logvar)
    onehot = jax.nn.one_hot(c, NUM_CLASSES, dtype=jnp.float32)
    cemb = onehot @ params["cls_w"] + params["cls_b"]
    z = mu + eps * std + cemb[:, :, None, None]
    z_up = jnp.repeat(jnp.repeat(z, 2, axis=2), 2, axis=3)
    d = jax.nn.relu(conv(z_up, params["dec1_w"], params["dec1_b"], 1))
    x_recon = conv(d, params["dec2_w"], params["dec2_b"], 1)
    return x_recon, mu, logvar


# ----------------------------------------------------------------------------
if __name__ == "__main__":
    B, TB = 16, 8            # grid = (2,) -> both v7x TensorCores get work
    root = jax.random.PRNGKey(0)
    k_param, k_x, k_c, k_eps = jax.random.split(root, 4)

    params = init_params(k_param)
    packed = pack_params(params, TB)

    x = jax.random.normal(k_x, (B, IN_CH, IMG, IMG), jnp.float32)
    c = jax.random.randint(k_c, (B,), 0, NUM_CLASSES, dtype=jnp.int32)

    x_recon, mu, logvar = forward(packed, x, c, k_eps, tb=TB)
    jax.block_until_ready((x_recon, mu, logvar))

    assert x_recon.shape == (B, IN_CH, IMG, IMG)
    assert mu.shape == (B, LATENT, LAT_HW, LAT_HW)
    assert logvar.shape == (B, LATENT, LAT_HW, LAT_HW)
    assert bool(jnp.all(jnp.isfinite(x_recon)))
    assert bool(jnp.all(jnp.isfinite(mu)))
    assert bool(jnp.all(jnp.isfinite(logvar)))

    # bf16-MXU kernel vs f32 reference (documented tolerance per review).
    xr_ref, mu_ref, lv_ref = reference_forward(params, x, c, k_eps)
    np.testing.assert_allclose(np.asarray(mu), np.asarray(mu_ref),
                               rtol=0.1, atol=0.1)
    np.testing.assert_allclose(np.asarray(logvar), np.asarray(lv_ref),
                               rtol=0.1, atol=0.1)
    np.testing.assert_allclose(np.asarray(x_recon), np.asarray(xr_ref),
                               rtol=0.1, atol=0.1)
    print("KERNEL_OK")
</pallas_src>

<mosaic_0001>
module attributes {stable_mosaic.version = 11 : i64} {
  func.func @_fused_vae_kernel(%arg0: i32, %arg1: memref<16xi32, #tpu.memory_space<smem>>, %arg2: memref<128x48xbf16, #tpu.memory_space<vmem>>, %arg3: memref<64x32xf32, #tpu.memory_space<vmem>>, %arg4: memref<3x48x128xbf16, #tpu.memory_space<vmem>>, %arg5: memref<1x128xf32, #tpu.memory_space<vmem>>, %arg6: memref<3x64x128xbf16, #tpu.memory_space<vmem>>, %arg7: memref<3x128x64xbf16, #tpu.memory_space<vmem>>, %arg8: memref<1x64xf32, #tpu.memory_space<vmem>>, %arg9: memref<10x32xf32, #tpu.memory_space<vmem>>, %arg10: memref<1x32xf32, #tpu.memory_space<vmem>>, %arg11: memref<128x64xbf16, #tpu.memory_space<vmem>>, %arg12: memref<32x64xbf16, #tpu.memory_space<vmem>>, %arg13: memref<3x64x128xbf16, #tpu.memory_space<vmem>>, %arg14: memref<1x128xf32, #tpu.memory_space<vmem>>, %arg15: memref<3x128x48xbf16, #tpu.memory_space<vmem>>, %arg16: memref<1x48xf32, #tpu.memory_space<vmem>>, %arg17: memref<64x64xf32, #tpu.memory_space<vmem>>, %arg18: memref<128x48xf32, #tpu.memory_space<vmem>>) attributes {dimension_semantics = [#tpu.dimension_semantics<parallel>], iteration_bounds = array<i64: 2>, scalar_prefetch = 1 : i64, scratch_operands = 0 : i64, tpu.core_type = #tpu.core_type<tc>, window_params = [{transform_indices = @transform_0, window_bounds = array<i64: 128, 48>}, {transform_indices = @transform_1, window_bounds = array<i64: 64, 32>}, {pipeline_mode = #tpu.pipeline_mode<synchronous>, transform_indices = @transform_2, window_bounds = array<i64: 3, 48, 128>}, {pipeline_mode = #tpu.pipeline_mode<synchronous>, transform_indices = @transform_3, window_bounds = array<i64: 1, 128>}, {pipeline_mode = #tpu.pipeline_mode<synchronous>, transform_indices = @transform_4, window_bounds = array<i64: 3, 64, 128>}, {pipeline_mode = #tpu.pipeline_mode<synchronous>, transform_indices = @transform_5, window_bounds = array<i64: 3, 128, 64>}, {pipeline_mode = #tpu.pipeline_mode<synchronous>, transform_indices = @transform_6, window_bounds = array<i64: 1, 64>}, {pipeline_mode = #tpu.pipeline_mode<synchronous>, transform_indices = @transform_7, window_bounds = array<i64: 10, 32>}, {pipeline_mode = #tpu.pipeline_mode<synchronous>, transform_indices = @transform_8, window_bounds = array<i64: 1, 32>}, {pipeline_mode = #tpu.pipeline_mode<synchronous>, transform_indices = @transform_9, window_bounds = array<i64: 128, 64>}, {pipeline_mode = #tpu.pipeline_mode<synchronous>, transform_indices = @transform_10, window_bounds = array<i64: 32, 64>}, {pipeline_mode = #tpu.pipeline_mode<synchronous>, transform_indices = @transform_11, window_bounds = array<i64: 3, 64, 128>}, {pipeline_mode = #tpu.pipeline_mode<synchronous>, transform_indices = @transform_12, window_bounds = array<i64: 1, 128>}, {pipeline_mode = #tpu.pipeline_mode<synchronous>, transform_indices = @transform_13, window_bounds = array<i64: 3, 128, 48>}, {pipeline_mode = #tpu.pipeline_mode<synchronous>, transform_indices = @transform_14, window_bounds = array<i64: 1, 48>}, {transform_indices = @transform_15, window_bounds = array<i64: 64, 64>}, {transform_indices = @transform_16, window_bounds = array<i64: 128, 48>}]} {
    %0 = tpu.iota {dimensions = array<i32: 0>} : vector<128x1xi32>
    %c15_i32 = arith.constant 15 : i32
    %1 = vector.broadcast %c15_i32 : i32 to vector<128x1xi32>
    %2 = arith.andi %0, %1 : vector<128x1xi32>
    %c0_i32 = arith.constant 0 : i32
    %3 = vector.broadcast %c0_i32 : i32 to vector<128x1xi32>
    %4 = arith.cmpi sgt, %2, %3 : vector<128x1xi32>
    %c15_i32_0 = arith.constant 15 : i32
    %5 = vector.broadcast %c15_i32_0 : i32 to vector<128x1xi32>
    %6 = arith.cmpi slt, %2, %5 : vector<128x1xi32>
    %c0 = arith.constant 0 : index
    %c0_1 = arith.constant 0 : index
    %7 = vector.load %arg2[%c0, %c0_1] : memref<128x48xbf16, #tpu.memory_space<vmem>>, vector<128x48xbf16>
    %cst = arith.constant 0.000000e+00 : bf16
    %8 = vector.broadcast %cst : bf16 to vector<1x48xbf16>
    %c1 = arith.constant 1 : index
    %c0_2 = arith.constant 0 : index
    %c0_3 = arith.constant 0 : index
    %9 = vector.load %arg4[%c1, %c0_2, %c0_3] : memref<3x48x128xbf16, #tpu.memory_space<vmem>>, vector<1x48x128xbf16>
    %10 = vector.shape_cast %9 : vector<1x48x128xbf16> to vector<48x128xbf16>
    %cst_4 = arith.constant dense<0.000000e+00> : vector<128x128xf32>
    %11 = tpu.matmul %7, %10, %cst_4 {dimension_numbers = #tpu.dot_dimension_numbers<[1], [0], [0], [1], [0, 0, 1, 1], [], []>} : vector<128x48xbf16>, vector<48x128xbf16>, vector<128x128xf32> -> vector<128x128xf32>
    %12 = vector.extract_strided_slice %7 {offsets = [0, 0], sizes = [127, 48], strides = [1, 1]} : vector<128x48xbf16> to vector<127x48xbf16>
    %13 = tpu.concatenate %8, %12 in 0 : vector<1x48xbf16>, vector<127x48xbf16> -> vector<128x48xbf16>
    %cst_5 = arith.constant 0.000000e+00 : bf16
    %14 = vector.broadcast %cst_5 : bf16 to vector<128x48xbf16>
    %15 = vector.shape_cast %4 : vector<128x1xi1> to vector<128x1xi1>
    %16 = vector.broadcast %15 : vector<128x1xi1> to vector<128x48xi1>
    %17 = arith.select %16, %13, %14 : vector<128x48xi1>, vector<128x48xbf16>
    %c0_6 = arith.constant 0 : index
    %c0_7 = arith.constant 0 : index
    %c0_8 = arith.constant 0 : index
    %18 = vector.load %arg4[%c0_6, %c0_7, %c0_8] : memref<3x48x128xbf16, #tpu.memory_space<vmem>>, vector<1x48x128xbf16>
    %19 = vector.shape_cast %18 : vector<1x48x128xbf16> to vector<48x128xbf16>
    %cst_9 = arith.constant dense<0.000000e+00> : vector<128x128xf32>
    %20 = tpu.matmul %17, %19, %cst_9 {dimension_numbers = #tpu.dot_dimension_numbers<[1], [0], [0], [1], [0, 0, 1, 1], [], []>} : vector<128x48xbf16>, vector<48x128xbf16>, vector<128x128xf32> -> vector<128x128xf32>
    %21 = arith.addf %11, %20 : vector<128x128xf32>
    %22 = vector.extract_strided_slice %7 {offsets = [1, 0], sizes = [127, 48], strides = [1, 1]} : vector<128x48xbf16> to vector<127x48xbf16>
    %23 = tpu.concatenate %22, %8 in 0 : vector<127x48xbf16>, vector<1x48xbf16> -> vector<128x48xbf16>
    %cst_10 = arith.constant 0.000000e+00 : bf16
    %24 = vector.broadcast %cst_10 : bf16 to vector<128x48xbf16>
    %25 = vector.shape_cast %6 : vector<128x1xi1> to vector<128x1xi1>
    %26 = vector.broadcast %25 : vector<128x1xi1> to vector<128x48xi1>
    %27 = arith.select %26, %23, %24 : vector<128x48xi1>, vector<128x48xbf16>
    %c2 = arith.constant 2 : index
    %c0_11 = arith.constant 0 : index
    %c0_12 = arith.constant 0 : index
    %28 = vector.load %arg4[%c2, %c0_11, %c0_12] : memref<3x48x128xbf16, #tpu.memory_space<vmem>>, vector<1x48x128xbf16>
    %29 = vector.shape_cast %28 : vector<1x48x128xbf16> to vector<48x128xbf16>
    %cst_13 = arith.constant dense<0.000000e+00> : vector<128x128xf32>
    %30 = tpu.matmul %27, %29, %cst_13 {dimension_numbers = #tpu.dot_dimension_numbers<[1], [0], [0], [1], [0, 0, 1, 1], [], []>} : vector<128x48xbf16>, vector<48x128xbf16>, vector<128x128xf32> -> vector<128x128xf32>
    %31 = arith.addf %21, %30 : vector<128x128xf32>
    %c0_14 = arith.constant 0 : index
    %c0_15 = arith.constant 0 : index
    %32 = vector.load %arg5[%c0_14, %c0_15] : memref<1x128xf32, #tpu.memory_space<vmem>>, vector<1x128xf32>
    %33 = vector.broadcast %32 : vector<1x128xf32> to vector<128x128xf32>
    %34 = arith.addf %31, %33 : vector<128x128xf32>
    %cst_16 = arith.constant 0.000000e+00 : f32
    %35 = vector.broadcast %cst_16 : f32 to vector<128x128xf32>
    %36 = arith.maximumf %34, %35 : vector<128x128xf32>
    %37 = arith.truncf %36 : vector<128x128xf32> to vector<128x128xbf16>
    %cst_17 = arith.constant 0.000000e+00 : f32
    %38 = vector.broadcast %cst_17 : f32 to vector<64x64xf32>
    %c0_18 = arith.constant 0 : index
    %c0_19 = arith.constant 0 : index
    %c0_20 = arith.constant 0 : index
    %39 = vector.load %arg6[%c0_18, %c0_19, %c0_20] : memref<3x64x128xbf16, #tpu.memory_space<vmem>>, vector<1x64x128xbf16>
    %40 = vector.shape_cast %39 : vector<1x64x128xbf16> to vector<64x128xbf16>
    %cst_21 = arith.constant dense<0.000000e+00> : vector<64x128xf32>
    %41 = tpu.matmul %40, %37, %cst_21 {dimension_numbers = #tpu.dot_dimension_numbers<[1], [0], [0], [1], [0, 0, 1, 1], [], []>} : vector<64x128xbf16>, vector<128x128xbf16>, vector<64x128xf32> -> vector<64x128xf32>
    %42 = arith.truncf %41 : vector<64x128xf32> to vector<64x128xbf16>
    %c0_22 = arith.constant 0 : index
    %c0_23 = arith.constant 0 : index
    %c0_24 = arith.constant 0 : index
    %43 = vector.load %arg7[%c0_22, %c0_23, %c0_24] : memref<3x128x64xbf16, #tpu.memory_space<vmem>>, vector<1x128x64xbf16>
    %44 = vector.shape_cast %43 : vector<1x128x64xbf16> to vector<128x64xbf16>
    %cst_25 = arith.constant dense<0.000000e+00> : vector<64x64xf32>
    %45 = tpu.matmul %42, %44, %cst_25 {dimension_numbers = #tpu.dot_dimension_numbers<[1], [0], [0], [1], [0, 0, 1, 1], [], []>} : vector<64x128xbf16>, vector<128x64xbf16>, vector<64x64xf32> -> vector<64x64xf32>
    %46 = arith.addf %38, %45 : vector<64x64xf32>
    %c1_26 = arith.constant 1 : index
    %c0_27 = arith.constant 0 : index
    %c0_28 = arith.constant 0 : index
    %47 = vector.load %arg6[%c1_26, %c0_27, %c0_28] : memref<3x64x128xbf16, #tpu.memory_space<vmem>>, vector<1x64x128xbf16>
    %48 = vector.shape_cast %47 : vector<1x64x128xbf16> to vector<64x128xbf16>
    %cst_29 = arith.constant dense<0.000000e+00> : vector<64x128xf32>
    %49 = tpu.matmul %48, %37, %cst_29 {dimension_numbers = #tpu.dot_dimension_numbers<[1], [0], [0], [1], [0, 0, 1, 1], [], []>} : vector<64x128xbf16>, vector<128x128xbf16>, vector<64x128xf32> -> vector<64x128xf32>
    %50 = arith.truncf %49 : vector<64x128xf32> to vector<64x128xbf16>
    %c1_30 = arith.constant 1 : index
    %c0_31 = arith.constant 0 : index
    %c0_32 = arith.constant 0 : index
    %51 = vector.load %arg7[%c1_30, %c0_31, %c0_32] : memref<3x128x64xbf16, #tpu.memory_space<vmem>>, vector<1x128x64xbf16>
    %52 = vector.shape_cast %51 : vector<1x128x64xbf16> to vector<128x64xbf16>
    %cst_33 = arith.constant dense<0.000000e+00> : vector<64x64xf32>
    %53 = tpu.matmul %50, %52, %cst_33 {dimension_numbers = #tpu.dot_dimension_numbers<[1], [0], [0], [1], [0, 0, 1, 1], [], []>} : vector<64x128xbf16>, vector<128x64xbf16>, vector<64x64xf32> -> vector<64x64xf32>
    %54 = arith.addf %46, %53 : vector<64x64xf32>
    %c2_34 = arith.constant 2 : index
    %c0_35 = arith.constant 0 : index
    %c0_36 = arith.constant 0 : index
    %55 = vector.load %arg6[%c2_34, %c0_35, %c0_36] : memref<3x64x128xbf16, #tpu.memory_space<vmem>>, vector<1x64x128xbf16>
    %56 = vector.shape_cast %55 : vector<1x64x128xbf16> to vector<64x128xbf16>
    %cst_37 = arith.constant dense<0.000000e+00> : vector<64x128xf32>
    %57 = tpu.matmul %56, %37, %cst_37 {dimension_numbers = #tpu.dot_dimension_numbers<[1], [0], [0], [1], [0, 0, 1, 1], [], []>} : vector<64x128xbf16>, vector<128x128xbf16>, vector<64x128xf32> -> vector<64x128xf32>
    %58 = arith.truncf %57 : vector<64x128xf32> to vector<64x128xbf16>
    %c2_38 = arith.constant 2 : index
    %c0_39 = arith.constant 0 : index
    %c0_40 = arith.constant 0 : index
    %59 = vector.load %arg7[%c2_38, %c0_39, %c0_40] : memref<3x128x64xbf16, #tpu.memory_space<vmem>>, vector<1x128x64xbf16>
    %60 = vector.shape_cast %59 : vector<1x128x64xbf16> to vector<128x64xbf16>
    %cst_41 = arith.constant dense<0.000000e+00> : vector<64x64xf32>
    %61 = tpu.matmul %58, %60, %cst_41 {dimension_numbers = #tpu.dot_dimension_numbers<[1], [0], [0], [1], [0, 0, 1, 1], [], []>} : vector<64x128xbf16>, vector<128x64xbf16>, vector<64x64xf32> -> vector<64x64xf32>
    %62 = arith.addf %54, %61 : vector<64x64xf32>
    %c0_42 = arith.constant 0 : index
    %c0_43 = arith.constant 0 : index
    %63 = vector.load %arg8[%c0_42, %c0_43] : memref<1x64xf32, #tpu.memory_space<vmem>>, vector<1x64xf32>
    %64 = vector.broadcast %63 : vector<1x64xf32> to vector<64x64xf32>
    %65 = arith.addf %62, %64 : vector<64x64xf32>
    %c0_44 = arith.constant 0 : index
    %c0_45 = arith.constant 0 : index
    %66 = vector.load %arg17[%c0_44, %c0_45] : memref<64x64xf32, #tpu.memory_space<vmem>>, vector<64x64xf32>
    tpu.vector_store %arg17[%c0_44, %c0_45], %65 {strides = array<i32>} : memref<64x64xf32, #tpu.memory_space<vmem>>, vector<64x64xf32>,
    %67 = vector.extract_strided_slice %65 {offsets = [0, 0], sizes = [64, 32], strides = [1, 1]} : vector<64x64xf32> to vector<64x32xf32>
    %68 = vector.extract_strided_slice %65 {offsets = [0, 32], sizes = [64, 32], strides = [1, 1]} : vector<64x64xf32> to vector<64x32xf32>
    %cst_46 = arith.constant 5.000000e-01 : f32
    %69 = vector.broadcast %cst_46 : f32 to vector<64x32xf32>
    %70 = arith.mulf %69, %68 : vector<64x32xf32>
    %71 = math.exp %70 : vector<64x32xf32>
    %c0_47 = arith.constant 0 : index
    %c0_48 = arith.constant 0 : index
    %72 = vector.load %arg3[%c0_47, %c0_48] : memref<64x32xf32, #tpu.memory_space<vmem>>, vector<64x32xf32>
    %73 = arith.mulf %72, %71 : vector<64x32xf32>
    %74 = arith.addf %67, %73 : vector<64x32xf32>
    %c8_i32 = arith.constant 8 : i32
    %75 = arith.muli %arg0, %c8_i32 : i32
    %c0_i32_49 = arith.constant 0 : i32
    %76 = arith.addi %75, %c0_i32_49 : i32
    %77 = arith.index_cast %76 : i32 to index
    %78 = memref.load %arg1[%77] : memref<16xi32, #tpu.memory_space<smem>>
    %79 = arith.index_cast %78 : i32 to index
    %c0_50 = arith.constant 0 : index
    %80 = vector.load %arg9[%79, %c0_50] : memref<10x32xf32, #tpu.memory_space<vmem>>, vector<1x32xf32>
    %81 = vector.shape_cast %80 : vector<1x32xf32> to vector<1x32xf32>
    %82 = vector.broadcast %81 : vector<1x32xf32> to vector<8x32xf32>
    %c1_i32 = arith.constant 1 : i32
    %83 = arith.addi %75, %c1_i32 : i32
    %84 = arith.index_cast %83 : i32 to index
    %85 = memref.load %arg1[%84] : memref<16xi32, #tpu.memory_space<smem>>
    %86 = arith.index_cast %85 : i32 to index
    %c0_51 = arith.constant 0 : index
    %87 = vector.load %arg9[%86, %c0_51] : memref<10x32xf32, #tpu.memory_space<vmem>>, vector<1x32xf32>
    %88 = vector.shape_cast %87 : vector<1x32xf32> to vector<1x32xf32>
    %89 = vector.broadcast %88 : vector<1x32xf32> to vector<8x32xf32>
    %c2_i32 = arith.constant 2 : i32
    %90 = arith.addi %75, %c2_i32 : i32
    %91 = arith.index_cast %90 : i32 to index
    %92 = memref.load %arg1[%91] : memref<16xi32, #tpu.memory_space<smem>>
    %93 = arith.index_cast %92 : i32 to index
    %c0_52 = arith.constant 0 : index
    %94 = vector.load %arg9[%93, %c0_52] : memref<10x32xf32, #tpu.memory_space<vmem>>, vector<1x32xf32>
    %95 = vector.shape_cast %94 : vector<1x32xf32> to vector<1x32xf32>
    %96 = vector.broadcast %95 : vector<1x32xf32> to vector<8x32xf32>
    %c3_i32 = arith.constant 3 : i32
    %97 = arith.addi %75, %c3_i32 : i32
    %98 = arith.index_cast %97 : i32 to index
    %99 = memref.load %arg1[%98] : memref<16xi32, #tpu.memory_space<smem>>
    %100 = arith.index_cast %99 : i32 to index
    %c0_53 = arith.constant 0 : index
    %101 = vector.load %arg9[%100, %c0_53] : memref<10x32xf32, #tpu.memory_space<vmem>>, vector<1x32xf32>
    %102 = vector.shape_cast %101 : vector<1x32xf32> to vector<1x32xf32>
    %103 = vector.broadcast %102 : vector<1x32xf32> to vector<8x32xf32>
    %c4_i32 = arith.constant 4 : i32
    %104 = arith.addi %75, %c4_i32 : i32
    %105 = arith.index_cast %104 : i32 to index
    %106 = memref.load %arg1[%105] : memref<16xi32, #tpu.memory_space<smem>>
    %107 = arith.index_cast %106 : i32 to index
    %c0_54 = arith.constant 0 : index
    %108 = vector.load %arg9[%107, %c0_54] : memref<10x32xf32, #tpu.memory_space<vmem>>, vector<1x32xf32>
    %109 = vector.shape_cast %108 : vector<1x32xf32> to vector<1x32xf32>
    %110 = vector.broadcast %109 : vector<1x32xf32> to vector<8x32xf32>
    %c5_i32 = arith.constant 5 : i32
    %111 = arith.addi %75, %c5_i32 : i32
    %112 = arith.index_cast %111 : i32 to index
    %113 = memref.load %arg1[%112] : memref<16xi32, #tpu.memory_space<smem>>
    %114 = arith.index_cast %113 : i32 to index
    %c0_55 = arith.constant 0 : index
    %115 = vector.load %arg9[%114, %c0_55] : memref<10x32xf32, #tpu.memory_space<vmem>>, vector<1x32xf32>
    %116 = vector.shape_cast %115 : vector<1x32xf32> to vector<1x32xf32>
    %117 = vector.broadcast %116 : vector<1x32xf32> to vector<8x32xf32>
    %c6_i32 = arith.constant 6 : i32
    %118 = arith.addi %75, %c6_i32 : i32
    %119 = arith.index_cast %118 : i32 to index
    %120 = memref.load %arg1[%119] : memref<16xi32, #tpu.memory_space<smem>>
    %121 = arith.index_cast %120 : i32 to index
    %c0_56 = arith.constant 0 : index
    %122 = vector.load %arg9[%121, %c0_56] : memref<10x32xf32, #tpu.memory_space<vmem>>, vector<1x32xf32>
    %123 = vector.shape_cast %122 : vector<1x32xf32> to vector<1x32xf32>
    %124 = vector.broadcast %123 : vector<1x32xf32> to vector<8x32xf32>
    %c7_i32 = arith.constant 7 : i32
    %125 = arith.addi %75, %c7_i32 : i32
    %126 = arith.index_cast %125 : i32 to index
    %127 = memref.load %arg1[%126] : memref<16xi32, #tpu.memory_space<smem>>
    %128 = arith.index_cast %127 : i32 to index
    %c0_57 = arith.constant 0 : index
    %129 = vector.load %arg9[%128, %c0_57] : memref<10x32xf32, #tpu.memory_space<vmem>>, vector<1x32xf32>
    %130 = vector.shape_cast %129 : vector<1x32xf32> to vector<1x32xf32>
    %131 = vector.broadcast %130 : vector<1x32xf32> to vector<8x32xf32>
    %132 = tpu.concatenate %82, %89, %96, %103, %110, %117, %124, %131 in 0 : vector<8x32xf32>, vector<8x32xf32>, vector<8x32xf32>, vector<8x32xf32>, vector<8x32xf32>, vector<8x32xf32>, vector<8x32xf32>, vector<8x32xf32> -> vector<64x32xf32>
    %133 = arith.addf %74, %132 : vector<64x32xf32>
    %c0_58 = arith.constant 0 : index
    %c0_59 = arith.constant 0 : index
    %134 = vector.load %arg10[%c0_58, %c0_59] : memref<1x32xf32, #tpu.memory_space<vmem>>, vector<1x32xf32>
    %135 = vector.broadcast %134 : vector<1x32xf32> to vector<64x32xf32>
    %136 = arith.addf %133, %135 : vector<64x32xf32>
    %137 = arith.truncf %136 : vector<64x32xf32> to vector<64x32xbf16>
    %c0_60 = arith.constant 0 : index
    %c0_61 = arith.constant 0 : index
    %138 = vector.load %arg12[%c0_60, %c0_61] : memref<32x64xbf16, #tpu.memory_space<vmem>>, vector<32x64xbf16>
    %cst_62 = arith.constant dense<0.000000e+00> : vector<64x64xf32>
    %139 = tpu.matmul %137, %138, %cst_62 {dimension_numbers = #tpu.dot_dimension_numbers<[1], [0], [0], [1], [0, 0, 1, 1], [], []>} : vector<64x32xbf16>, vector<32x64xbf16>, vector<64x64xf32> -> vector<64x64xf32>
    %140 = arith.truncf %139 : vector<64x64xf32> to vector<64x64xbf16>
    %c0_63 = arith.constant 0 : index
    %c0_64 = arith.constant 0 : index
    %141 = vector.load %arg11[%c0_63, %c0_64] : memref<128x64xbf16, #tpu.memory_space<vmem>>, vector<128x64xbf16>
    %cst_65 = arith.constant dense<0.000000e+00> : vector<128x64xf32>
    %142 = tpu.matmul %141, %140, %cst_65 {dimension_numbers = #tpu.dot_dimension_numbers<[1], [0], [0], [1], [0, 0, 1, 1], [], []>} : vector<128x64xbf16>, vector<64x64xbf16>, vector<128x64xf32> -> vector<128x64xf32>
    %143 = arith.truncf %142 : vector<128x64xf32> to vector<128x64xbf16>
    %cst_66 = arith.constant 0.000000e+00 : bf16
    %144 = vector.broadcast %cst_66 : bf16 to vector<1x64xbf16>
    %c1_67 = arith.constant 1 : index
    %c0_68 = arith.constant 0 : index
    %c0_69 = arith.constant 0 : index
    %145 = vector.load %arg13[%c1_67, %c0_68, %c0_69] : memref<3x64x128xbf16, #tpu.memory_space<vmem>>, vector<1x64x128xbf16>
    %146 = vector.shape_cast %145 : vector<1x64x128xbf16> to vector<64x128xbf16>
    %cst_70 = arith.constant dense<0.000000e+00> : vector<128x128xf32>
    %147 = tpu.matmul %143, %146, %cst_70 {dimension_numbers = #tpu.dot_dimension_numbers<[1], [0], [0], [1], [0, 0, 1, 1], [], []>} : vector<128x64xbf16>, vector<64x128xbf16>, vector<128x128xf32> -> vector<128x128xf32>
    %148 = vector.extract_strided_slice %143 {offsets = [0, 0], sizes = [127, 64], strides = [1, 1]} : vector<128x64xbf16> to vector<127x64xbf16>
    %149 = tpu.concatenate %144, %148 in 0 : vector<1x64xbf16>, vector<127x64xbf16> -> vector<128x64xbf16>
    %cst_71 = arith.constant 0.000000e+00 : bf16
    %150 = vector.broadcast %cst_71 : bf16 to vector<128x64xbf16>
    %151 = vector.shape_cast %4 : vector<128x1xi1> to vector<128x1xi1>
    %152 = vector.broadcast %151 : vector<128x1xi1> to vector<128x64xi1>
    %153 = arith.select %152, %149, %150 : vector<128x64xi1>, vector<128x64xbf16>
    %c0_72 = arith.constant 0 : index
    %c0_73 = arith.constant 0 : index
    %c0_74 = arith.constant 0 : index
    %154 = vector.load %arg13[%c0_72, %c0_73, %c0_74] : memref<3x64x128xbf16, #tpu.memory_space<vmem>>, vector<1x64x128xbf16>
    %155 = vector.shape_cast %154 : vector<1x64x128xbf16> to vector<64x128xbf16>
    %cst_75 = arith.constant dense<0.000000e+00> : vector<128x128xf32>
    %156 = tpu.matmul %153, %155, %cst_75 {dimension_numbers = #tpu.dot_dimension_numbers<[1], [0], [0], [1], [0, 0, 1, 1], [], []>} : vector<128x64xbf16>, vector<64x128xbf16>, vector<128x128xf32> -> vector<128x128xf32>
    %157 = arith.addf %147, %156 : vector<128x128xf32>
    %158 = vector.extract_strided_slice %143 {offsets = [1, 0], sizes = [127, 64], strides = [1, 1]} : vector<128x64xbf16> to vector<127x64xbf16>
    %159 = tpu.concatenate %158, %144 in 0 : vector<127x64xbf16>, vector<1x64xbf16> -> vector<128x64xbf16>
    %cst_76 = arith.constant 0.000000e+00 : bf16
    %160 = vector.broadcast %cst_76 : bf16 to vector<128x64xbf16>
    %161 = vector.shape_cast %6 : vector<128x1xi1> to vector<128x1xi1>
    %162 = vector.broadcast %161 : vector<128x1xi1> to vector<128x64xi1>
    %163 = arith.select %162, %159, %160 : vector<128x64xi1>, vector<128x64xbf16>
    %c2_77 = arith.constant 2 : index
    %c0_78 = arith.constant 0 : index
    %c0_79 = arith.constant 0 : index
    %164 = vector.load %arg13[%c2_77, %c0_78, %c0_79] : memref<3x64x128xbf16, #tpu.memory_space<vmem>>, vector<1x64x128xbf16>
    %165 = vector.shape_cast %164 : vector<1x64x128xbf16> to vector<64x128xbf16>
    %cst_80 = arith.constant dense<0.000000e+00> : vector<128x128xf32>
    %166 = tpu.matmul %163, %165, %cst_80 {dimension_numbers = #tpu.dot_dimension_numbers<[1], [0], [0], [1], [0, 0, 1, 1], [], []>} : vector<128x64xbf16>, vector<64x128xbf16>, vector<128x128xf32> -> vector<128x128xf32>
    %167 = arith.addf %157, %166 : vector<128x128xf32>
    %c0_81 = arith.constant 0 : index
    %c0_82 = arith.constant 0 : index
    %168 = vector.load %arg14[%c0_81, %c0_82] : memref<1x128xf32, #tpu.memory_space<vmem>>, vector<1x128xf32>
    %169 = vector.broadcast %168 : vector<1x128xf32> to vector<128x128xf32>
    %170 = arith.addf %167, %169 : vector<128x128xf32>
    %cst_83 = arith.constant 0.000000e+00 : f32
    %171 = vector.broadcast %cst_83 : f32 to vector<128x128xf32>
    %172 = arith.maximumf %170, %171 : vector<128x128xf32>
    %173 = arith.truncf %172 : vector<128x128xf32> to vector<128x128xbf16>
    %cst_84 = arith.constant 0.000000e+00 : bf16
    %174 = vector.broadcast %cst_84 : bf16 to vector<1x128xbf16>
    %c1_85 = arith.constant 1 : index
    %c0_86 = arith.constant 0 : index
    %c0_87 = arith.constant 0 : index
    %175 = vector.load %arg15[%c1_85, %c0_86, %c0_87] : memref<3x128x48xbf16, #tpu.memory_space<vmem>>, vector<1x128x48xbf16>
    %176 = vector.shape_cast %175 : vector<1x128x48xbf16> to vector<128x48xbf16>
    %cst_88 = arith.constant dense<0.000000e+00> : vector<128x48xf32>
    %177 = tpu.matmul %173, %176, %cst_88 {dimension_numbers = #tpu.dot_dimension_numbers<[1], [0], [0], [1], [0, 0, 1, 1], [], []>} : vector<128x128xbf16>, vector<128x48xbf16>, vector<128x48xf32> -> vector<128x48xf32>
    %178 = vector.extract_strided_slice %173 {offsets = [0, 0], sizes = [127, 128], strides = [1, 1]} : vector<128x128xbf16> to vector<127x128xbf16>
    %179 = tpu.concatenate %174, %178 in 0 : vector<1x128xbf16>, vector<127x128xbf16> -> vector<128x128xbf16>
    %cst_89 = arith.constant 0.000000e+00 : bf16
    %180 = vector.broadcast %cst_89 : bf16 to vector<128x128xbf16>
    %181 = vector.shape_cast %4 : vector<128x1xi1> to vector<128x1xi1>
    %182 = vector.broadcast %181 : vector<128x1xi1> to vector<128x128xi1>
    %183 = arith.select %182, %179, %180 : vector<128x128xi1>, vector<128x128xbf16>
    %c0_90 = arith.constant 0 : index
    %c0_91 = arith.constant 0 : index
    %c0_92 = arith.constant 0 : index
    %184 = vector.load %arg15[%c0_90, %c0_91, %c0_92] : memref<3x128x48xbf16, #tpu.memory_space<vmem>>, vector<1x128x48xbf16>
    %185 = vector.shape_cast %184 : vector<1x128x48xbf16> to vector<128x48xbf16>
    %cst_93 = arith.constant dense<0.000000e+00> : vector<128x48xf32>
    %186 = tpu.matmul %183, %185, %cst_93 {dimension_numbers = #tpu.dot_dimension_numbers<[1], [0], [0], [1], [0, 0, 1, 1], [], []>} : vector<128x128xbf16>, vector<128x48xbf16>, vector<128x48xf32> -> vector<128x48xf32>
    %187 = arith.addf %177, %186 : vector<128x48xf32>
    %188 = vector.extract_strided_slice %173 {offsets = [1, 0], sizes = [127, 128], strides = [1, 1]} : vector<128x128xbf16> to vector<127x128xbf16>
    %189 = tpu.concatenate %188, %174 in 0 : vector<127x128xbf16>, vector<1x128xbf16> -> vector<128x128xbf16>
    %cst_94 = arith.constant 0.000000e+00 : bf16
    %190 = vector.broadcast %cst_94 : bf16 to vector<128x128xbf16>
    %191 = vector.shape_cast %6 : vector<128x1xi1> to vector<128x1xi1>
    %192 = vector.broadcast %191 : vector<128x1xi1> to vector<128x128xi1>
    %193 = arith.select %192, %189, %190 : vector<128x128xi1>, vector<128x128xbf16>
    %c2_95 = arith.constant 2 : index
    %c0_96 = arith.constant 0 : index
    %c0_97 = arith.constant 0 : index
    %194 = vector.load %arg15[%c2_95, %c0_96, %c0_97] : memref<3x128x48xbf16, #tpu.memory_space<vmem>>, vector<1x128x48xbf16>
    %195 = vector.shape_cast %194 : vector<1x128x48xbf16> to vector<128x48xbf16>
    %cst_98 = arith.constant dense<0.000000e+00> : vector<128x48xf32>
    %196 = tpu.matmul %193, %195, %cst_98 {dimension_numbers = #tpu.dot_dimension_numbers<[1], [0], [0], [1], [0, 0, 1, 1], [], []>} : vector<128x128xbf16>, vector<128x48xbf16>, vector<128x48xf32> -> vector<128x48xf32>
    %197 = arith.addf %187, %196 : vector<128x48xf32>
    %c0_99 = arith.constant 0 : index
    %c0_100 = arith.constant 0 : index
    %198 = vector.load %arg16[%c0_99, %c0_100] : memref<1x48xf32, #tpu.memory_space<vmem>>, vector<1x48xf32>
    %199 = vector.broadcast %198 : vector<1x48xf32> to vector<128x48xf32>
    %200 = arith.addf %197, %199 : vector<128x48xf32>
    %c0_101 = arith.constant 0 : index
    %c0_102 = arith.constant 0 : index
    %201 = vector.load %arg18[%c0_101, %c0_102] : memref<128x48xf32, #tpu.memory_space<vmem>>, vector<128x48xf32>
    tpu.vector_store %arg18[%c0_101, %c0_102], %200 {strides = array<i32>} : memref<128x48xf32, #tpu.memory_space<vmem>>, vector<128x48xf32>,
    return
  }
  func.func @transform_0(%arg0: i32, %arg1: memref<16xi32, #tpu.memory_space<smem>>) -> (i32, i32) {
    %c0_i32 = arith.constant 0 : i32
    %c0_i32_0 = arith.constant 0 : i32
    return %arg0, %c0_i32 : i32, i32
  }
  func.func @transform_1(%arg0: i32, %arg1: memref<16xi32, #tpu.memory_space<smem>>) -> (i32, i32) {
    %c0_i32 = arith.constant 0 : i32
    %c0_i32_0 = arith.constant 0 : i32
    return %arg0, %c0_i32 : i32, i32
  }
  func.func @transform_2(%arg0: i32, %arg1: memref<16xi32, #tpu.memory_space<smem>>) -> (i32, i32, i32) {
    %c0_i32 = arith.constant 0 : i32
    %c0_i32_0 = arith.constant 0 : i32
    %c0_i32_1 = arith.constant 0 : i32
    %c0_i32_2 = arith.constant 0 : i32
    return %c0_i32, %c0_i32_0, %c0_i32_1 : i32, i32, i32
  }
  func.func @transform_3(%arg0: i32, %arg1: memref<16xi32, #tpu.memory_space<smem>>) -> (i32, i32) {
    %c0_i32 = arith.constant 0 : i32
    %c0_i32_0 = arith.constant 0 : i32
    %c0_i32_1 = arith.constant 0 : i32
    return %c0_i32, %c0_i32_0 : i32, i32
  }
  func.func @transform_4(%arg0: i32, %arg1: memref<16xi32, #tpu.memory_space<smem>>) -> (i32, i32, i32) {
    %c0_i32 = arith.constant 0 : i32
    %c0_i32_0 = arith.constant 0 : i32
    %c0_i32_1 = arith.constant 0 : i32
    %c0_i32_2 = arith.constant 0 : i32
    return %c0_i32, %c0_i32_0, %c0_i32_1 : i32, i32, i32
  }
  func.func @transform_5(%arg0: i32, %arg1: memref<16xi32, #tpu.memory_space<smem>>) -> (i32, i32, i32) {
    %c0_i32 = arith.constant 0 : i32
    %c0_i32_0 = arith.constant 0 : i32
    %c0_i32_1 = arith.constant 0 : i32
    %c0_i32_2 = arith.constant 0 : i32
    return %c0_i32, %c0_i32_0, %c0_i32_1 : i32, i32, i32
  }
  func.func @transform_6(%arg0: i32, %arg1: memref<16xi32, #tpu.memory_space<smem>>) -> (i32, i32) {
    %c0_i32 = arith.constant 0 : i32
    %c0_i32_0 = arith.constant 0 : i32
    %c0_i32_1 = arith.constant 0 : i32
    return %c0_i32, %c0_i32_0 : i32, i32
  }
  func.func @transform_7(%arg0: i32, %arg1: memref<16xi32, #tpu.memory_space<smem>>) -> (i32, i32) {
    %c0_i32 = arith.constant 0 : i32
    %c0_i32_0 = arith.constant 0 : i32
    %c0_i32_1 = arith.constant 0 : i32
    return %c0_i32, %c0_i32_0 : i32, i32
  }
  func.func @transform_8(%arg0: i32, %arg1: memref<16xi32, #tpu.memory_space<smem>>) -> (i32, i32) {
    %c0_i32 = arith.constant 0 : i32
    %c0_i32_0 = arith.constant 0 : i32
    %c0_i32_1 = arith.constant 0 : i32
    return %c0_i32, %c0_i32_0 : i32, i32
  }
  func.func @transform_9(%arg0: i32, %arg1: memref<16xi32, #tpu.memory_space<smem>>) -> (i32, i32) {
    %c0_i32 = arith.constant 0 : i32
    %c0_i32_0 = arith.constant 0 : i32
    %c0_i32_1 = arith.constant 0 : i32
    return %c0_i32, %c0_i32_0 : i32, i32
  }
  func.func @transform_10(%arg0: i32, %arg1: memref<16xi32, #tpu.memory_space<smem>>) -> (i32, i32) {
    %c0_i32 = arith.constant 0 : i32
    %c0_i32_0 = arith.constant 0 : i32
    %c0_i32_1 = arith.constant 0 : i32
    return %c0_i32, %c0_i32_0 : i32, i32
  }
  func.func @transform_11(%arg0: i32, %arg1: memref<16xi32, #tpu.memory_space<smem>>) -> (i32, i32, i32) {
    %c0_i32 = arith.constant 0 : i32
    %c0_i32_0 = arith.constant 0 : i32
    %c0_i32_1 = arith.constant 0 : i32
    %c0_i32_2 = arith.constant 0 : i32
    return %c0_i32, %c0_i32_0, %c0_i32_1 : i32, i32, i32
  }
  func.func @transform_12(%arg0: i32, %arg1: memref<16xi32, #tpu.memory_space<smem>>) -> (i32, i32) {
    %c0_i32 = arith.constant 0 : i32
    %c0_i32_0 = arith.constant 0 : i32
    %c0_i32_1 = arith.constant 0 : i32
    return %c0_i32, %c0_i32_0 : i32, i32
  }
  func.func @transform_13(%arg0: i32, %arg1: memref<16xi32, #tpu.memory_space<smem>>) -> (i32, i32, i32) {
    %c0_i32 = arith.constant 0 : i32
    %c0_i32_0 = arith.constant 0 : i32
    %c0_i32_1 = arith.constant 0 : i32
    %c0_i32_2 = arith.constant 0 : i32
    return %c0_i32, %c0_i32_0, %c0_i32_1 : i32, i32, i32
  }
  func.func @transform_14(%arg0: i32, %arg1: memref<16xi32, #tpu.memory_space<smem>>) -> (i32, i32) {
    %c0_i32 = arith.constant 0 : i32
    %c0_i32_0 = arith.constant 0 : i32
    %c0_i32_1 = arith.constant 0 : i32
    return %c0_i32, %c0_i32_0 : i32, i32
  }
  func.func @transform_15(%arg0: i32, %arg1: memref<16xi32, #tpu.memory_space<smem>>) -> (i32, i32) {
    %c0_i32 = arith.constant 0 : i32
    %c0_i32_0 = arith.constant 0 : i32
    return %arg0, %c0_i32 : i32, i32
  }
  func.func @transform_16(%arg0: i32, %arg1: memref<16xi32, #tpu.memory_space<smem>>) -> (i32, i32) {
    %c0_i32 = arith.constant 0 : i32
    %c0_i32_0 = arith.constant 0 : i32
    return %arg0, %c0_i32 : i32, i32
  }
}

</mosaic_0001>

<bundles_post_ra>
// kernel: forward.1
= control target key start
LH: loop header
LB: loop body
LE: loop exit
PB: predicated region body
PF: predicated region fallthrough
CT: control target
= control target key end

     0   :  { %s6596_s0 = inlined_call_operand.vmem [shape: s32[16], index: 0, kind: input, shape index: {}]   ;;  %s6597_s1 = inlined_call_operand.vmem [shape: bf16[256,48], index: 1, kind: input, shape index: {}]   ;;  %s6598_s2 = inlined_call_operand.vmem [shape: f32[128,32], index: 2, kind: input, shape index: {}]   ;;  %s6599_s3 = inlined_call_operand.vmem [shape: bf16[3,48,128], index: 3, kind: input, shape index: {}]   ;;  %s6600_s4 = inlined_call_operand.vmem [shape: f32[1,128], index: 4, kind: input, shape index: {}]   ;;  %s6601_s5 = inlined_call_operand.vmem [shape: bf16[3,64,128], index: 5, kind: input, shape index: {}]   ;;  %s6602_s6 = inlined_call_operand.vmem [shape: bf16[3,128,64], index: 6, kind: input, shape index: {}]   ;;  %s6603_s7 = inlined_call_operand.vmem [shape: f32[1,64], index: 7, kind: input, shape index: {}]   ;;  %s6604_s8 = inlined_call_operand.vmem [shape: f32[10,32], index: 8, kind: input, shape index: {}]   ;;  %s6605_s9 = inlined_call_operand.vmem [shape: f32[1,32], index: 9, kind: input, shape index: {}]   ;;  %s6606_s10 = inlined_call_operand.vmem [shape: bf16[128,64], index: 10, kind: input, shape index: {}]   ;;  %s6607_s11 = inlined_call_operand.vmem [shape: bf16[32,64], index: 11, kind: input, shape index: {}]   ;;  %s6608_s12 = inlined_call_operand.vmem [shape: bf16[3,64,128], index: 12, kind: input, shape index: {}]   ;;  %s6609_s13 = inlined_call_operand.vmem [shape: f32[1,128], index: 13, kind: input, shape index: {}]   ;;  %s6610_s14 = inlined_call_operand.vmem [shape: bf16[3,128,48], index: 14, kind: input, shape index: {}]   ;;  %s6611_s15 = inlined_call_operand.vmem [shape: f32[1,48], index: 15, kind: input, shape index: {}]   ;;  %s6612_s16 = inlined_call_operand.vmem [shape: f32[128,64], index: 16, kind: output, shape index: {0}]   ;;  %s6613_s17 = inlined_call_operand.vmem [shape: f32[256,48], index: 17, kind: output, shape index: {1}]  }
   0x1   :  { %6646 = sst [smem:[#allocation11_spill]] %s6596_s0 }
   0x2   :  { %6647 = sst [smem:[#allocation12_spill]] %s6597_s1 }
   0x3   :  { %6648 = sst [smem:[#allocation13_spill]] %s6598_s2 }
   0x4   :  { %6649 = sst [smem:[#allocation14_spill]] %s6599_s3 }
   0x5   :  { %6650 = sst [smem:[#allocation15_spill]] %s6600_s4 }
   0x6   :  { %6651 = sst [smem:[#allocation16_spill]] %s6601_s5 }
   0x7   :  { %6652 = sst [smem:[#allocation17_spill]] %s6602_s6 }
   0x8   :  { %6653 = sst [smem:[#allocation18_spill]] %s6603_s7 }
   0x9   :  { %6654 = sst [smem:[#allocation19_spill]] %s6606_s10 }
   0xa   :  { %s6655_s26 = sld [smem:[#allocation11_spill]] }
  0x10   :  { %s23_s10 = sshll.u32 %s6655_s26, 4  ;;  %s24_s10 = int_to_ptr.vmem [resolvable:$true] %s23_s10 }
  0x11   :  { %s5181_s27 = scalar_lea.vmem %s24_s10, 16  ;;  %p5186_p1 = scmp.lt.s32.totalorder %s24_s10, %s24_s10 }
  0x12   :  { %p5182_p0 = scmp.ne.s32.totalorder %s24_s10, %s5181_s27  ;;  %p5187_p2 = scmp.lt.s32.totalorder %s5181_s27, %s5181_s27 }
  0x14   :  { %p5188_p3 = por %p5187_p2, %p5186_p1 }
  0x16   :  { %p5189_p4 = pnand %p5188_p3, %p5182_p0 }
  0x18   :  { %5192 = shalt.err (!%p5189_p4)  }
  0x19   :  { %s5203_s28 = smov [#allocation3]  }
  0x1a   :  { %26 = dma.vmem_to_smem %s24_s10, 16, %s5203_s28, [#allocation2] }
  0x1b   :  { %5197 = dma.done.wait [#allocation2], 16 }
  0x1c   :  { %5198 = vsyncadd [#allocation2], 4294967280 }
  0x1d   :  { %28 = sfence }
  0x1e   :  { %s5300_s29 = smov 0  }
  0x1f LB: > { %s4089_s0 = sadd.s32 4294967295, %s5201_s29   ;;  %p4093_p5 = scmp.ge.s32.totalorder %s5201_s29, 1  ;;  %s5201_s29 = sphi %s5300_s29, %s34_s29  }
  0x20   : > { %p484_p6 = scmp.lt.s32.totalorder %s5201_s29, 3 }
  0x22   : > { %p485_p7 = pnand %p4093_p5, %p484_p6 }
  0x24   : > { %488 = sbr.rel (%p485_p7) target bundleno = 2071 (0x817), region = 80 }
  0x29   : > { %s6656_s3 = sld [smem:[#allocation14_spill]]  ;;  %s4094_s18 = sshll.u32 %s4089_s0, 4  ;;  %v571_v1 = vlaneseq  ;;  %vm6615_vm1 = vsmask.f32 256  ;;  %vm771_vm2 = vcmask 1040384   ;;  %vm6629_vm3 = vcmask 392192  }
  0x2a   : > { %p545_p8 = scmp.lt.s32.totalorder %s4094_s18, 31  ;;  %s6657_s19 = sld [smem:[#allocation12_spill]]  ;;  %vm5204_vm5 = vmmov 1   ;;  %v5205_v17 = vmov 0   ;;  %vm5372_vm7 = vmand %vm771_vm2, %vm6615_vm1  ;;  %v5162_v54 = vld [vmem:[%s6610_s14 + $0x90] sm:$0xff]  }
  0x2b   : > { %v5319_v4 = vshrl.u32 %v571_v1, 7  ;;  %vm807_vm6 = vmpackc.low %vm5204_vm5, %vm5204_vm5  ;;  %s6712_s5 = sld [smem:[#allocation16_spill]]  ;;  %s5896_s22 = sshll.u32 %s4089_s0, 3 }
  0x2c   : > { %s6779_s18 = smov (!%p545_p8, %s4094_s18), 31  ;;  %v5367_v21 = vsel %vm807_vm6, 65537, %v5205_v17  ;;  %s6713_s4 = sld [smem:[#allocation15_spill]] }
  0x2d   : > { %v588_v7 = vand.u32 15, %v5319_v4  ;;  %s4095_s28 = sshll.u32 %s6779_s18, 2  ;;  %v574_v12 = vadd.s32 16, %v5319_v4  ;;  %v576_v16 = vadd.s32 32, %v5319_v4  ;;  %v578_v30 = vadd.s32 48, %v5319_v4  ;;  %s6714_s6 = sld [smem:[#allocation17_spill]] }
  0x2e   : > { %v580_v32 = vadd.s32 64, %v5319_v4  ;;  %p551_p9 = scmp.lt.s32.totalorder %s5896_s22, 15  ;;  %s6715_s7 = sld [smem:[#allocation18_spill]] }
  0x2f   : > { %v5066_v0 = vld [vmem:[%s6656_s3 + $0x10] sm:$0xff]   ;;  %v5067_v2 = vld [vmem:[%s6656_s3 + $0x28] sm:$0xff]   ;;  %v5069_v5 = vld [vmem:[%s6656_s3 + $0x20] sm:$0xff]   ;;  %vm5339_vm0 = vcmp.gt.s32.totalorder %v588_v7, 0  ;;  %v590_v19 = vand.u32 15, %v574_v12  ;;  %v592_v26 = vand.u32 15, %v576_v16 }
  0x30   : > { %4624 = vmatprep.subr.bf16.mxu0 %v5066_v0  ;;  %v5068_v3 = vld [vmem:[%s6656_s3 + $0x8] sm:$0xff]   ;;  %4646 = vmatprep.subr.bf16.mxu1 %v5067_v2  ;;  %v5070_v6 = vld [vmem:[%s6656_s3] sm:$0xff]   ;;  %v5071_v8 = vld [vmem:[%s6656_s3 + $0x18] sm:$0xff]   ;;  %s5337_s1 = scalar_lea.vmem %s6657_s19, %s4095_s28  ;;  %v594_v43 = vand.u32 15, %v578_v30  ;;  %v596_v56 = vand.u32 15, %v580_v32  ;;  %v584_v12 = vadd.s32 96, %v5319_v4 }
  0x31   : > { %4625 = vmatpush3.bf16.msra.mxu0 %v5066_v0  ;;  %4647 = vmatpush3.bf16.msra.mxu1 %v5067_v2  ;;  %v5346_v10 = vld [vmem:[%s6656_s3 + $0x40] sm:$0xff]   ;;  %vm806_vm4 = vmpackc.low %vm5339_vm0, %vm5339_vm0  ;;  %v5360_v15 = vld [vmem:[%s5337_s1 + $0x8] sm:$0xff]   ;;  %vm606_vm8 = vcmp.gt.s32.totalorder %v590_v19, 0  ;;  %vm608_vm11 = vcmp.gt.s32.totalorder %v592_v26, 0  ;;  %v6670_v30 = vmov 0  ;;  %s5900_s23 = scalar_select %p551_p9, %s5896_s22, 15 }
  0x32   : > { %4626 = vmatprep.subr.bf16.mxu0 %v5068_v3  ;;  %4648 = vmatprep.subr.bf16.mxu1 %v5069_v5  ;;  %v5349_v11 = vld [vmem:[%s5337_s1] sm:$0xff]   ;;  %v822_v18 = vsel %vm806_vm4, 65537, %v5205_v17  ;;  %v708_v22 = vshrl.u32 %v5360_v15, 16  ;;  %v711_v25 = vshll.u32 %v5360_v15, 16  ;;  %v5380_v27 = vld [vmem:[%s5337_s1 + $0x10] sm:$0xff]   ;;  %vm808_vm9 = vmpackc.low %vm606_vm8, %vm606_vm8  ;;  %vm610_vm14 = vcmp.gt.s32.totalorder %v594_v43, 0 }
  0x33   : > { %v701_v13 = vshrl.u32 %v5349_v11, 16  ;;  %v704_v14 = vshll.u32 %v5349_v11, 16  ;;  %4652 = vmatprep.mubr.msk.bf16.mxu1 %vm6629_vm3, %v5349_v11  ;;  %v4116_v24 = vcombine.low %v822_v18, %v5367_v21  ;;  %v5386_v31 = vld [vmem:[%s5337_s1 + $0x18] sm:$0xff]   ;;  %v824_v34 = vsel %vm808_vm9, 65537, %v5205_v17  ;;  %vm810_vm12 = vmpackc.low %vm608_vm11, %vm608_vm11  ;;  %v5423_v49 = vld [vmem:[%s5337_s1 + $0x20] sm:$0xff]   ;;  %s4097_s24 = sshll.u32 %s5900_s23, 3 }
  0x34   : > { %v710_v29 = vrot.slane %v708_v22, 7  ;;  %v716_v35 = vshrl.u32 %v5380_v27, 16  ;;  %v4117_v38 = vcombine.low %v824_v34, %v5367_v21  ;;  %v719_v39 = vshll.u32 %v5380_v27, 16  ;;  %v5077_v48 = vld [vmem:[%s6656_s3 + $0x38] sm:$0xff]   ;;  %v5431_v53 = vld [vmem:[%s5337_s1 + $0x28] sm:$0xff]   ;;  %vm812_vm0 = vmpackc.low %vm610_vm14, %vm610_vm14  ;;  %s5911_s28 = scalar_lea.vmem %s6612_s16, %s4097_s24  ;;  %s5206_s20 = smov 96  }
  0x35   : > { %4627 = vmatpush3.bf16.msra.mxu0 %v5068_v3  ;;  %4649 = vmatpush3.bf16.msra.mxu1 %v5069_v5  ;;  %v703_v20 = vrot.slane %v701_v13, 7  ;;  %vm5389_vm10 = vcmp.ne.s16.totalorder %v4116_v24, 0  ;;  %v826_v42 = vsel %vm810_vm12, 65537, %v5205_v17  ;;  %v5411_v44 = vrot.slane %v704_v14, 1  ;;  %v5080_v62 = vld [vmem:[%s6656_s3 + $0x30] sm:$0xff]   ;;  %s2333_s21 = sadd.s32 3, %s5896_s22 }
  0x36   : > { %4628 = vmatprep.subr.bf16.mxu0 %v5070_v6  ;;  %4650 = vmatprep.subr.bf16.mxu1 %v5071_v8  ;;  %v713_v37 = vor.u32 %v711_v25, %v710_v29  ;;  %v718_v41 = vrot.slane %v716_v35, 7  ;;  %vm5414_vm13 = vcmp.ne.s16.totalorder %v4117_v38, 0  ;;  %v4118_v47 = vcombine.low %v826_v42, %v5367_v21  ;;  %v5455_v2 = vld [vmem:[%s5337_s1 + $0x30] sm:$0xff]   ;;  %s2325_s25 = sadd.s32 2, %s5896_s22  ;;  %s2310_s26 = sld [smem:[#allocation3 + %s5896_s22]] }
  0x37   : > { %v706_v28 = vor.u32 %v704_v14, %v703_v20  ;;  %v724_v52 = vshrl.u32 %v5386_v31, 16  ;;  %v727_v55 = vshll.u32 %v5386_v31, 16  ;;  %v732_v57 = vshrl.u32 %v5423_v49, 16  ;;  %v5474_v14 = vld [vmem:[%s5337_s1 + $0x38] sm:$0xff]   ;;  %s2317_s0 = sadd.s32 1, %s5896_s22  ;;  %s2334_s27 = sld [smem:[#allocation3 + %s2333_s21]] }
  0x38   : > { %v714_v45 = vsel %vm6615_vm1, %v703_v20, %v713_v37  ;;  %v721_v51 = vor.u32 %v719_v39, %v718_v41  ;;  %vm5434_vm15 = vcmp.ne.s16.totalorder %v4118_v47, 0  ;;  %v828_v60 = vsel %vm812_vm0, 65537, %v5205_v17  ;;  %s6716_s2 = sld [smem:[#allocation13_spill]]  ;;  %s2357_s23 = sadd.s32 6, %s5896_s22 }
  0x39   : > { %4629 = vmatpush3.bf16.msra.mxu0 %v5070_v6  ;;  %4651 = vmatpush3.bf16.msra.mxu1 %v5071_v8  ;;  %v773_v36 = vsel %vm5372_vm7, 0, %v706_v28  ;;  %v871_v50 = vsel %vm5414_vm13, %v714_v45, 0  ;;  %v726_v59 = vrot.slane %v724_v52, 7  ;;  %v735_v61 = vshll.u32 %v5423_v49, 16  ;;  %s2326_s19 = sld [smem:[#allocation3 + %s2325_s25]]  ;;  %s2365_s3 = sadd.s32 7, %s5896_s22 }
  0x3a   : > { %4668 = vmatprep.subr.bf16.mxu0 %v5346_v10  ;;  %v870_v40 = vsel %vm5389_vm10, %v773_v36, 0  ;;  %v722_v58 = vsel %vm6615_vm1, %v710_v29, %v721_v51  ;;  %v4119_v0 = vcombine.low %v828_v60, %v5367_v21  ;;  %vm612_vm2 = vcmp.gt.s32.totalorder %v596_v56, 0  ;;  %s5979_s1 = sld [smem:[#allocation3 + %s2317_s0]]  ;;  %s4101_s25 = sshll.u32 %s6779_s18, 3 }
  0x3b   : > { %4630 = vmatprep.mubr.msk.bf16.mxu0 %vm6629_vm3, %v870_v40  ;;  %v872_v63 = vsel %vm5434_vm15, %v722_v58, 0  ;;  %v734_v1 = vrot.slane %v732_v57, 7  ;;  %v729_v3 = vor.u32 %v727_v55, %v726_v59  ;;  %vm814_vm4 = vmpackc.low %vm612_vm2, %vm612_vm2  ;;  %v582_v5 = vadd.s32 80, %v5319_v4  ;;  %s6717_s21 = sld [smem:[#allocation19_spill]] }
  0x3c   : > { %4653 = vmatmul.mubr.msk.bf16.vlgmr.msra.gmra.mxu1 %vm6629_vm3, %v5360_v15  ;;  %4631 = vmatmul.mubr.msk.bf16.vlgmr.msra.gmra.mxu0 %vm6629_vm3, %v871_v50  ;;  %v740_v6 = vshrl.u32 %v5431_v53, 16  ;;  %v743_v7 = vshll.u32 %v5431_v53, 16  ;;  %vm5463_vm5 = vcmp.ne.s16.totalorder %v4119_v0, 0  ;;  %v6668_v8 = vmov 0 }
  0x3d   : > { %4656 = vmatprep.mubr.msk.bf16.mxu1 %vm6629_vm3, %v5380_v27  ;;  %4669 = vmatpush3.bf16.msra.mxu0 %v5346_v10  ;;  %v6669_v8 = vsel %vm5463_vm5, 4294967295, %v6668_v8  ;;  %v737_v9 = vor.u32 %v735_v61, %v734_v1  ;;  %v830_v10 = vsel %vm814_vm4, 65537, %v5205_v17  ;;  %v730_v16 = vsel %vm6615_vm1, %v718_v41, %v729_v3  ;;  %s2335_s0 = scalar_lea.vmem %s6604_s8, %s2334_s27  ;;  %s6013_s27 = sld [smem:[#allocation3 + %s2365_s3]] }
  0x3e   : > { %4670 = vmatprep.subr.bf16.mxu0 %v5077_v48  ;;  %4634 = vmatprep.mubr.msk.bf16.mxu0 %vm6629_vm3, %v872_v63  ;;  %v4120_v18 = vcombine.low %v830_v10, %v5367_v21  ;;  %v598_v19 = vand.u32 15, %v582_v5  ;;  %v742_v20 = vrot.slane %v740_v6, 7  ;;  %v873_v24 = vsel %vm5463_vm5, %v730_v16, 0  ;;  %s5977_s10 = scalar_lea.vmem %s6716_s2, %s4097_s24  ;;  %s2349_s24 = sadd.s32 5, %s5896_s22 }
  0x3f   : > { %v738_v26 = vsel %vm6615_vm1, %v726_v59, %v737_v9  ;;  %v600_v28 = vand.u32 15, %v584_v12  ;;  %v748_v29 = vshrl.u32 %v5455_v2, 16  ;;  %v751_v34 = vshll.u32 %v5455_v2, 16 }
  0x40   : > { %vm5486_vm6 = vcmp.ne.s16.totalorder %v4120_v18, 0  ;;  %vm614_vm8 = vcmp.gt.s32.totalorder %v598_v19, 0  ;;  %v745_v32 = vor.u32 %v743_v7, %v742_v20  ;;  %v586_v38 = vadd.s32 112, %v5319_v4 }
  0x41   : > { %4671 = vmatpush3.bf16.msra.mxu0 %v5077_v48  ;;  %v6671_v30 = vsel %vm5486_vm6, 4294967295, %v6670_v30  ;;  %v874_v36 = vsel %vm5486_vm6, %v738_v26, 0  ;;  %vm816_vm9 = vmpackc.low %vm614_vm8, %vm614_vm8  ;;  %vm616_vm11 = vcmp.gt.s32.totalorder %v600_v28, 0  ;;  %v750_v37 = vrot.slane %v748_v29, 7 }
  0x42   : > { %4672 = vmatprep.subr.bf16.mxu0 %v5080_v62  ;;  %v746_v40 = vsel %vm6615_vm1, %v734_v1, %v745_v32  ;;  %v832_v41 = vsel %vm816_vm9, 65537, %v5205_v17  ;;  %vm818_vm12 = vmpackc.low %vm616_vm11, %vm616_vm11  ;;  %v756_v42 = vshrl.u32 %v5474_v14, 16  ;;  %v759_v43 = vshll.u32 %v5474_v14, 16 }
  0x43   : > { %v4121_v45 = vcombine.low %v832_v41, %v5367_v21  ;;  %v753_v47 = vor.u32 %v751_v34, %v750_v37  ;;  %v834_v48 = vsel %vm818_vm12, 65537, %v5205_v17  ;;  %v602_v50 = vand.u32 15, %v586_v38 }
  0x44   : > { %4657 = vmatmul.mubr.msk.bf16.gmra.mxu1 %vm6629_vm3, %v5386_v31  ;;  %4635 = vmatmul.mubr.msk.bf16.gmra.mxu0 %vm6629_vm3, %v873_v24  ;;  %v4122_v51 = vcombine.low %v834_v48, %v5367_v21  ;;  %v758_v56 = vrot.slane %v756_v42, 7  ;;  %v573_v58 = vadd.s32 8, %v5319_v4  ;;  %vm6618_vm14 = vsmask.f32 7424 }
  0x45   : > { %4660 = vmatprep.mubr.msk.bf16.mxu1 %vm6629_vm3, %v5423_v49  ;;  %4638 = vmatprep.mubr.msk.bf16.mxu0 %vm6629_vm3, %v874_v36  ;;  %vm5512_vm0 = vcmp.ne.s16.totalorder %v4121_v45, 0  ;;  %v6672_v59 = vmov 0  ;;  %v754_v60 = vsel %vm6615_vm1, %v742_v20, %v753_v47  ;;  %vm618_vm2 = vcmp.gt.s32.totalorder %v602_v50, 0 }
  0x46   : > { %4673 = vmatpush3.bf16.msra.mxu0 %v5080_v62  ;;  %v6673_v59 = vsel %vm5512_vm0, 4294967295, %v6672_v59  ;;  %v875_v62 = vsel %vm5512_vm0, %v746_v40, 0  ;;  %vm5521_vm4 = vcmp.ne.s16.totalorder %v4122_v51, 0  ;;  %v6674_v63 = vmov 0  ;;  %vm820_vm8 = vmpackc.low %vm618_vm2, %vm618_vm2 }
  0x47   : > { %v6675_v63 = vsel %vm5521_vm4, 4294967295, %v6674_v63  ;;  %v761_v0 = vor.u32 %v759_v43, %v758_v56  ;;  %v589_v1 = vand.u32 15, %v573_v58  ;;  %v876_v3 = vsel %vm5521_vm4, %v754_v60, 0 }
  0x48   : > { %v836_v5 = vsel %vm820_vm8, 65537, %v5205_v17  ;;  %v1158_v9 = vrot.slane %v711_v25, 1  ;;  %v575_v10 = vadd.s32 24, %v5319_v4  ;;  %v1157_v16 = vor.u32 %v5411_v44, %v701_v13 }
  0x49   : > { %v4123_v12 = vcombine.low %v836_v5, %v5367_v21  ;;  %vm621_vm9 = vcmp.lt.s32.totalorder %v589_v1, 15  ;;  %v577_v18 = vadd.s32 40, %v5319_v4  ;;  %v1161_v20 = vrot.slane %v719_v39, 1 }
  0x4a   : > { %vm1223_vm11 = vmpackc.low %vm621_vm9, %vm621_vm9  ;;  %v591_v19 = vand.u32 15, %v575_v10  ;;  %v762_v26 = vsel %vm6615_vm1, %v750_v37, %v761_v0  ;;  %v6676_v11 = vmov 0  ;;  %v1159_v44 = vsel %vm6618_vm14, %v1157_v16, %v1158_v9 }
  0x4b   : > { %v1239_v25 = vsel %vm1223_vm11, 65537, %v5205_v17  ;;  %v593_v24 = vand.u32 15, %v577_v18  ;;  %vm5546_vm12 = vcmp.ne.s16.totalorder %v4123_v12, 0  ;;  %v1160_v28 = vor.u32 %v1158_v9, %v708_v22 }
  0x4c   : > { %4661 = vmatmul.mubr.msk.bf16.gmra.mxu1 %vm6629_vm3, %v5431_v53  ;;  %4639 = vmatmul.mubr.msk.bf16.gmra.mxu0 %vm6629_vm3, %v875_v62  ;;  %v6677_v11 = vsel %vm5546_vm12, 4294967295, %v6676_v11  ;;  %v4146_v13 = vcombine.low %v5367_v21, %v1239_v25  ;;  %vm623_vm2 = vcmp.lt.s32.totalorder %v591_v19, 15  ;;  %v579_v39 = vadd.s32 56, %v5319_v4 }
  0x4d   : > { %4664 = vmatprep.mubr.msk.bf16.mxu1 %vm6629_vm3, %v5455_v2  ;;  %4642 = vmatprep.mubr.msk.bf16.mxu0 %vm6629_vm3, %v876_v3  ;;  %vm1225_vm8 = vmpackc.low %vm623_vm2, %vm623_vm2  ;;  %vm625_vm9 = vcmp.lt.s32.totalorder %v593_v24, 15  ;;  %v6678_v32 = vmov 0  ;;  %v1164_v37 = vrot.slane %v727_v55, 1  ;;  %v581_v15 = vadd.s32 72, %v5319_v4 }
  0x4e   : > { %vm5557_vm11 = vcmp.ne.s16.totalorder %v4146_v13, 0  ;;  %v1241_v36 = vsel %vm1225_vm8, 65537, %v5205_v17  ;;  %vm1227_vm1 = vmpackc.low %vm625_vm9, %vm625_vm9  ;;  %v877_v22 = vsel %vm5546_vm12, %v762_v26, 0  ;;  %v595_v41 = vand.u32 15, %v579_v39 }
  0x4f   : > { %v6679_v32 = vsel %vm5557_vm11, 4294967295, %v6678_v32  ;;  %v4147_v38 = vcombine.low %v5367_v21, %v1241_v36  ;;  %v1243_v40 = vsel %vm1227_vm1, 65537, %v5205_v17  ;;  %v1286_v45 = vsel %vm5557_vm11, %v1159_v44, 0 }
  0x50   : > { %v1163_v47 = vor.u32 %v1161_v20, %v716_v35  ;;  %v4148_v48 = vcombine.low %v5367_v21, %v1243_v40  ;;  %v597_v55 = vand.u32 15, %v581_v15  ;;  %vm627_vm2 = vcmp.lt.s32.totalorder %v595_v41, 15  ;;  %v5084_v40 = vld [vmem:[%s6712_s5 + $0x20] sm:$0xff]  }
  0x51   : > { %v583_v50 = vadd.s32 88, %v5319_v4  ;;  %v1162_v51 = vsel %vm6618_vm14, %v1160_v28, %v1161_v20  ;;  %vm5577_vm8 = vcmp.ne.s16.totalorder %v4147_v38, 0  ;;  %v6680_v56 = vmov 0  ;;  %vm1229_vm1 = vmpackc.low %vm627_vm2, %vm627_vm2 }
  0x52   : > { %v6681_v56 = vsel %vm5577_vm8, 4294967295, %v6680_v56  ;;  %v1167_v58 = vrot.slane %v735_v61, 1  ;;  %vm629_vm9 = vcmp.lt.s32.totalorder %v597_v55, 15  ;;  %vm5584_vm11 = vcmp.ne.s16.totalorder %v4148_v48, 0 }
  0x53   : > { %v6682_v27 = vmov 0  ;;  %v1245_v35 = vsel %vm1229_vm1, 65537, %v5205_v17  ;;  %v1170_v60 = vrot.slane %v743_v7, 1  ;;  %vm1231_vm14 = vmpackc.low %vm629_vm9, %vm629_vm9  ;;  %v599_v62 = vand.u32 15, %v583_v50 }
  0x54   : > { %4665 = vmatmul.mubr.msk.bf16.gmra.mxu1 %vm6629_vm3, %v5474_v14  ;;  %4643 = vmatmul.mubr.msk.bf16.gmra.mxu0 %vm6629_vm3, %v877_v22  ;;  %v6683_v27 = vsel %vm5584_vm11, 4294967295, %v6682_v27  ;;  %vm6684_vm12 = vsmask.f32 7424  ;;  %v1247_v1 = vsel %vm1231_vm14, 65537, %v5205_v17  ;;  %v585_v61 = vadd.s32 104, %v5319_v4 }
  0x55   : > { %4674 = vmatprep.mubr.msk.bf16.mxu0 %vm6629_vm3, %v1286_v45  ;;  %v1165_v0 = vsel %vm6684_vm12, %v1163_v47, %v1164_v37  ;;  %v1166_v3 = vor.u32 %v1164_v37, %v724_v52  ;;  %v1169_v5 = vor.u32 %v1167_v58, %v732_v57  ;;  %vm631_vm2 = vcmp.lt.s32.totalorder %v599_v62, 15 }
  0x56   : > { %v1176_v9 = vrot.slane %v759_v43, 1  ;;  %v1287_v7 = vsel %vm5577_vm8, %v1162_v51, 0  ;;  %v1173_v10 = vrot.slane %v751_v34, 1  ;;  %vm1233_vm12 = vmpackc.low %vm631_vm2, %vm631_vm2  ;;  %v601_v12 = vand.u32 15, %v585_v61 }
  0x57   : > { %v587_v16 = vadd.s32 120, %v5319_v4  ;;  %v1288_v31 = vsel %vm5584_vm11, %v1165_v0, 0  ;;  %v4149_v49 = vcombine.low %v5367_v21, %v1245_v35  ;;  %v4150_v52 = vcombine.low %v5367_v21, %v1247_v1 }
  0x58   : > { %v1249_v57 = vsel %vm1233_vm12, 65537, %v5205_v17  ;;  %v1172_v43 = vor.u32 %v1170_v60, %v740_v6  ;;  %vm633_vm14 = vcmp.lt.s32.totalorder %v601_v12, 15  ;;  %v1175_v19 = vor.u32 %v1173_v10, %v748_v29 }
  0x59   : > { %v4151_v18 = vcombine.low %v5367_v21, %v1249_v57  ;;  %v603_v34 = vand.u32 15, %v587_v16  ;;  %vm1235_vm1 = vmpackc.low %vm633_vm14, %vm633_vm14  ;;  %v1178_v4 = vor.u32 %v1176_v9, %v756_v42  ;;  %vm1187_vm9 = vcmask 1047552  }
  0x5a   : > { %vm6685_vm2 = vsmask.f32 7424  ;;  %v1251_v25 = vsel %vm1235_vm1, 65537, %v5205_v17  ;;  %v6687_v53 = vmov 0  ;;  %vm5626_vm4 = vcmp.ne.s16.totalorder %v4149_v49, 0 }
  0x5b   : > { %v1168_v20 = vsel %vm6685_vm2, %v1166_v3, %v1167_v58  ;;  %vm635_vm12 = vcmp.lt.s32.totalorder %v603_v34, 15  ;;  %vm6686_vm11 = vmmov %vm6685_vm2  ;;  %v6690_v2 = vmov 0  ;;  %vm5631_vm0 = vcmp.ne.s16.totalorder %v4150_v52, 0 }
  0x5c   : > { %4675 = vmatmul.mubr.msk.bf16.vlgmr.msra.gmra.mxu0 %vm6629_vm3, %v1287_v7  ;;  %vm5621_vm8 = vmand %vm1187_vm9, %vm6686_vm11  ;;  %v6691_v2 = vsel %vm5626_vm4, 4294967295, %v6690_v2  ;;  %v6694_v14 = vmov 0  ;;  %v4152_v29 = vcombine.low %v5367_v21, %v1251_v25  ;;  %v1174_v42 = vsel %vm6685_vm2, %v1172_v43, %v1173_v10 }
  0x5d   : > { %v6688_v53 = vsel %vm5621_vm8, 4294967295, %v6687_v53  ;;  %4678 = vmatprep.mubr.msk.bf16.mxu0 %vm6629_vm3, %v1288_v31  ;;  %6692 = vst [vmem:[#allocation6_spill] sm:$0xff] %v6691_v2  ;;  %vm6693_vm14 = vmmov %vm6685_vm2  ;;  %v6695_v14 = vsel %vm5631_vm0, 4294967295, %v6694_v14  ;;  %vm5637_vm11 = vcmp.ne.s16.totalorder %v4151_v18, 0  ;;  %v6697_v24 = vmov 0 }
  0x5e   : > { %6689 = vst [vmem:[#allocation5_spill] sm:$0xff] %v6688_v53  ;;  %v1171_v6 = vsel %vm6693_vm14, %v1169_v5, %v1170_v60  ;;  %6696 = vst [vmem:[#allocation7_spill] sm:$0xff] %v6695_v14  ;;  %v6698_v24 = vsel %vm5637_vm11, 4294967295, %v6697_v24  ;;  %vm5643_vm3 = vcmp.ne.s16.totalorder %v4152_v29, 0  ;;  %v6701_v44 = vmov 0 }
  0x5f   : > { %vm1237_vm1 = vmpackc.low %vm635_vm12, %vm635_vm12  ;;  %6699 = vst [vmem:[#allocation8_spill] sm:$0xff] %v6698_v24  ;;  %v6702_v44 = vsel %vm5643_vm3, 4294967295, %v6701_v44  ;;  %v1189_v28 = vsel %vm5621_vm8, %v1178_v4, 0  ;;  %v1289_v36 = vsel %vm5626_vm4, %v1168_v20, 0  ;;  %v1290_v37 = vsel %vm5631_vm0, %v1171_v6, 0 }
  0x60   : > { %v1253_v26 = vsel %vm1237_vm1, 65537, %v5205_v17  ;;  %vm6700_vm9 = vmmov %vm6685_vm2  ;;  %6703 = vst [vmem:[#allocation9_spill] sm:$0xff] %v6702_v44  ;;  %v1291_v17 = vsel %vm5637_vm11, %v1174_v42, 0  ;;  %v6704_v15 = vmov 0  ;;  %vm6707_vm14 = vcmask 392192  }
  0x61   : > { %v1177_v13 = vsel %vm6700_vm9, %v1175_v19, %v1176_v9  ;;  %v4153_v39 = vcombine.low %v5367_v21, %v1253_v26  ;;  %vm6708_vm1 = vmmov %vm6707_vm14  ;;  %v5083_v21 = vld [vmem:[%s6712_s5] sm:$0xff]  }
  0x62   : > { %v1292_v22 = vsel %vm5643_vm3, %v1177_v13, 0  ;;  %vm6709_vm2 = vmmov %vm6708_vm1  ;;  %4706 = vmatprep.mubr.bf16.mxu1 %v5083_v21  ;;  %v5696_v20 = vld [vmem:[%s6713_s4] ss:$0 sm:$0xff]  ;;  %s6009_s4 = sld [smem:[#allocation3 + %s2357_s23]]  ;;  %s2367_s23 = scalar_lea.vmem %s6604_s8, %s6013_s27 }
  0x63   : > { %vm5656_vm12 = vcmp.ne.s16.totalorder %v4153_v39, 0  ;;  %vm6710_vm9 = vmmov %vm6708_vm1 }
  0x64   : > { %v6705_v15 = vsel %vm5656_vm12, 4294967295, %v6704_v15  ;;  %v1293_v38 = vsel %vm5656_vm12, %v1189_v28, 0  ;;  %4679 = vmatmul.mubr.msk.bf16.gmra.mxu0 %vm6707_vm14, %v1289_v36  ;;  %vm6711_vm8 = vmmov %vm6708_vm1  ;;  %vm2416_vm14 = vcmask 261120  }
  0x65   : > { %6706 = vst [vmem:[#allocation10_spill] sm:$0xff] %v6705_v15  ;;  %4682 = vmatprep.mubr.msk.bf16.mxu0 %vm6708_vm1, %v1290_v37  ;;  %vm6718_vm1 = vsmask.f32 256 }
  0x68   : > { %s2359_s30 = scalar_lea.vmem %s6604_s8, %s6009_s4 }
  0x6c   : > { %4683 = vmatmul.mubr.msk.bf16.gmra.mxu0 %vm6709_vm2, %v1291_v17  ;;  %vm6719_vm2 = vmmov %vm6718_vm1 }
  0x6d   : > { %4686 = vmatprep.mubr.msk.bf16.mxu0 %vm6710_vm9, %v1292_v22  ;;  %vm6720_vm9 = vmmov %vm6718_vm1 }
  0x74   : > { %4687 = vmatmul.mubr.msk.bf16.gmra.mxu0 %vm6711_vm8, %v1293_v38  ;;  %vm2220_vm8 = vcmask 523264  }
  0x75   : > { %4730 = vmatprep.mubr.bf16.mxu0 %v5084_v40 }
  0xfc   : > { %v4654_v41 = vpop.f32.mrf.mxu1  ;;  %v4632_v45 = vpop.f32.mrf.mxu0 }
  0xfd   : > { %v1101_v43 = vadd.f32 %v4654_v41, %v4632_v45 }
  0xfe   : > { %v961_v47 = vpop.f32.mrf.mxu0  ;;  %v1092_v48 = vpop.f32.mrf.mxu1 }
  0xff   : > { %v1093_v34 = vadd.f32 %v1092_v48, %v961_v47 }
 0x100   : > { %v4633_v55 = vpop.f32.mrf.mxu0  ;;  %v4655_v50 = vpop.f32.mrf.mxu1 }
 0x101   : > { %v1104_v6 = vadd.f32 %v4655_v50, %v4633_v55 }
 0x102   : > { %v964_v51 = vpop.f32.mrf.mxu0  ;;  %v1095_v35 = vpop.f32.mrf.mxu1 }
 0x103   : > { %v1096_v26 = vadd.f32 %v1095_v35, %v964_v51 }
 0x104   : > { %v5675_v58 = vpop.f32.mrf.mxu0  ;;  %v5681_v0 = vpop.f32.mrf.mxu1 }
 0x106   : > { %v5677_v60 = vpop.f32.mrf.mxu0  ;;  %v5685_v3 = vpop.f32.mrf.mxu1 }
 0x108   : > { %v5679_v62 = vpop.f32.mrf.mxu0  ;;  %v5689_v7 = vpop.f32.mrf.mxu1 }
 0x10a   : > { %v5683_v1 = vpop.f32.mrf.mxu0  ;;  %v5691_v16 = vpop.f32.mrf.mxu1 }
 0x10c   : > { %v4640_v61 = vpop.f32.mrf.mxu0  ;;  %v4662_v52 = vpop.f32.mrf.mxu1 }
 0x10e   : > { %v5687_v5 = vpop.f32.mrf.mxu0  ;;  %v1124_v4 = vpop.f32.mrf.mxu1 }
 0x110   : > { %v4641_v9 = vpop.f32.mrf.mxu0  ;;  %v4663_v39 = vpop.f32.mrf.mxu1 }
 0x112   : > { %v996_v10 = vpop.f32.mrf.mxu0  ;;  %v1127_v45 = vpop.f32.mrf.mxu1 }
 0x113   : > { %v1128_v2 = vadd.f32 %v1127_v45, %v996_v10 }
 0x114   : > { %v4644_v12 = vpop.f32.mrf.mxu0 }
 0x116   : > { %v1009_v31 = vpop.f32.mrf.mxu0 }
 0x118   : > { %v4645_v49 = vpop.f32.mrf.mxu0 }
 0x11a   : > { %v1012_v57 = vpop.f32.mrf.mxu0 }
 0x11c   : > { %v4676_v18 = vpop.f32.mrf.mxu0 }
 0x11d   : > { %v1442_v19 = vadd.f32 %v4676_v18, %v1101_v43  ;;  %v4666_v43 = vpop.f32.mrf.mxu1 }
 0x11e   : > { %v1377_v25 = vpop.f32.mrf.mxu0 }
 0x11f   : > { %v1440_v29 = vadd.f32 %v1377_v25, %v1093_v34  ;;  %v1465_v13 = vadd.f32 %v5696_v20, %v1442_v19  ;;  %v1140_v19 = vpop.f32.mrf.mxu1 }
 0x120   : > { %v4677_v42 = vpop.f32.mrf.mxu0 }
 0x121   : > { %v1443_v28 = vadd.f32 %v4677_v42, %v1104_v6  ;;  %v1463_v37 = vadd.f32 %v5696_v20, %v1440_v29  ;;  %v1481_v21 = vmax.f32 %v1465_v13, 0.0  ;;  %v4667_v29 = vpop.f32.mrf.mxu1 }
 0x122   : > { %v1380_v36 = vpop.f32.mrf.mxu0 }
 0x123   : > { %v1466_v17 = vadd.f32 %v5696_v20, %v1443_v28  ;;  %v1441_v22 = vadd.f32 %v1380_v36, %v1096_v26  ;;  %v1479_v48 = vmax.f32 %v1463_v37, 0.0  ;;  %v1149_v26 = vadd.f32 %v4666_v43, %v4644_v12  ;;  %v1143_v37 = vpop.f32.mrf.mxu1 }
 0x124   : > { %v4680_v38 = vpop.f32.mrf.mxu0  ;;  %v1141_v28 = vadd.f32 %v1140_v19, %v1009_v31  ;;  %v1144_v15 = vadd.f32 %v1143_v37, %v1012_v57  ;;  %v1120_v19 = vadd.f32 %v5689_v7, %v5679_v62  ;;  %v5085_v37 = vld [vmem:[%s6712_s5 + $0x8] sm:$0xff]  }
 0x125   : > { %v1482_v40 = vmax.f32 %v1466_v17, 0.0  ;;  %v1464_v41 = vadd.f32 %v5696_v20, %v1441_v22  ;;  %v1136_v17 = vadd.f32 %v4663_v39, %v4641_v9  ;;  %v1125_v9 = vadd.f32 %v1124_v4, %v5687_v5 }
 0x126   : > { %v5702_v47 = vpop.f32.mrf.mxu0 }
 0x127   : > { %v5704_v55 = vpack.c.bf16 %v1482_v40, %v1481_v21  ;;  %v1480_v50 = vmax.f32 %v1464_v41, 0.0  ;;  %v1152_v21 = vadd.f32 %v4667_v29, %v4645_v49  ;;  %v1133_v41 = vadd.f32 %v4662_v52, %v4640_v61 }
 0x128   : > { %v4681_v51 = vpop.f32.mrf.mxu0 }
 0x129   : > { %v5706_v35 = vpack.c.bf16 %v1480_v50, %v1479_v48 }
 0x12a   : > { %v1396_v18 = vpop.f32.mrf.mxu0 }
 0x12c   : > { %v4684_v34 = vpop.f32.mrf.mxu0 }
 0x12d   : > { %v1450_v24 = vadd.f32 %v4684_v34, %v1133_v41  ;;  %v5091_v41 = vld [vmem:[%s6712_s5 + $0x30] sm:$0xff]  }
 0x12e   : > { %v1409_v25 = vpop.f32.mrf.mxu0 }
 0x12f   : > { %v1473_v34 = vadd.f32 %v5696_v20, %v1450_v24  ;;  %v1448_v10 = vadd.f32 %v1409_v25, %v1125_v9  ;;  %v1112_v24 = vadd.f32 %v5691_v16, %v5683_v1  ;;  %v5094_v9 = vld [vmem:[%s6714_s6 + $0x60] sm:$0xff]  }
 0x130   : > { %v4685_v6 = vpop.f32.mrf.mxu0 }
 0x131   : > { %v1451_v48 = vadd.f32 %v4685_v6, %v1136_v17  ;;  %v1489_v7 = vmax.f32 %v1473_v34, 0.0  ;;  %v5099_v17 = vld [vmem:[%s6714_s6 + $0x38] sm:$0xff]   ;;  %v5098_v34 = vld [vmem:[%s6714_s6 + $0x40] sm:$0xff]  }
 0x132   : > { %v1412_v42 = vpop.f32.mrf.mxu0 }
 0x133   : > { %v1474_v49 = vadd.f32 %v5696_v20, %v1451_v48  ;;  %v1449_v39 = vadd.f32 %v1412_v42, %v1128_v2  ;;  %v5100_v48 = vld [vmem:[%s6714_s6 + $0x30] sm:$0xff]  }
 0x134   : > { %v4688_v13 = vpop.f32.mrf.mxu0 }
 0x135   : > { %v1454_v36 = vadd.f32 %v4688_v13, %v1149_v26  ;;  %v1490_v5 = vmax.f32 %v1474_v49, 0.0  ;;  %v5102_v49 = vld [vmem:[%s6714_s6 + $0x20] sm:$0xff]  }
 0x136   : > { %v1425_v22 = vpop.f32.mrf.mxu0 }
 0x137   : > { %v1452_v40 = vadd.f32 %v1425_v22, %v1141_v28  ;;  %v1477_v53 = vadd.f32 %v5696_v20, %v1454_v36  ;;  %v5736_v25 = vpack.c.bf16 %v1490_v5, %v1489_v7  ;;  %v5086_v22 = vld [vmem:[%s6712_s5 + $0x28] sm:$0xff]  }
 0x138   : > { %v4689_v50 = vpop.f32.mrf.mxu0 }
 0x139   : > { %v1455_v44 = vadd.f32 %v4689_v50, %v1152_v21  ;;  %v1475_v12 = vadd.f32 %v5696_v20, %v1452_v40  ;;  %v1493_v61 = vmax.f32 %v1477_v53, 0.0  ;;  %v1472_v53 = vadd.f32 %v5696_v20, %v1449_v39  ;;  %v5090_v21 = vld [vmem:[%s6712_s5 + $0x10] sm:$0xff]   ;;  %v5089_v50 = vld [vmem:[%s6714_s6 + $0x68] sm:$0xff]   ;;  %v5095_v39 = vld [vmem:[%s6714_s6 + $0x58] sm:$0xff]  }
 0x13a   : > { %v1428_v14 = vpop.f32.mrf.mxu0  ;;  %v5088_v40 = vld [vmem:[%s6714_s6 + $0x70] sm:$0xff]  }
 0x13b   : > { %v1478_v31 = vadd.f32 %v5696_v20, %v1455_v44  ;;  %v1453_v43 = vadd.f32 %v1428_v14, %v1144_v15  ;;  %v1491_v45 = vmax.f32 %v1475_v12, 0.0  ;;  %v1117_v14 = vadd.f32 %v5681_v0, %v5675_v58  ;;  %v5092_v12 = vld [vmem:[%s6712_s5 + $0x18] sm:$0xff]  }
 0x13c   : > { %v1447_v15 = vadd.f32 %v4681_v51, %v1120_v19  ;;  %v1471_v58 = vadd.f32 %v5696_v20, %v1448_v10  ;;  %v1109_v0 = vadd.f32 %v5685_v3, %v5677_v60  ;;  %v1445_v51 = vadd.f32 %v1396_v18, %v1112_v24  ;;  %v5097_v19 = vld [vmem:[%s6714_s6 + $0x48] sm:$0xff]  }
 0x13d   : > { %v1494_v52 = vmax.f32 %v1478_v31, 0.0  ;;  %v1476_v57 = vadd.f32 %v5696_v20, %v1453_v43  ;;  %v1446_v62 = vadd.f32 %v4680_v38, %v1117_v14  ;;  %v1488_v29 = vmax.f32 %v1472_v53, 0.0  ;;  %v5093_v31 = vld [vmem:[%s6712_s5 + $0x38] sm:$0xff]   ;;  %v5101_v43 = vld [vmem:[%s6714_s6 + $0x28] sm:$0xff]  }
 0x13e   : > { %v1470_v4 = vadd.f32 %v5696_v20, %v1447_v15  ;;  %v1444_v16 = vadd.f32 %v5702_v47, %v1109_v0  ;;  %v1487_v38 = vmax.f32 %v1471_v58, 0.0  ;;  %v1468_v3 = vadd.f32 %v5696_v20, %v1445_v51  ;;  %v5105_v10 = vld [vmem:[%s6714_s6 + $0x8] sm:$0xff]  }
 0x13f   : > { %v5717_v6 = vpack.c.bf16 %v1494_v52, %v1493_v61  ;;  %v1492_v44 = vmax.f32 %v1476_v57, 0.0  ;;  %v1469_v1 = vadd.f32 %v5696_v20, %v1446_v62  ;;  %v5103_v61 = vld [vmem:[%s6714_s6 + $0x18] sm:$0xff]   ;;  %v5096_v52 = vld [vmem:[%s6714_s6 + $0x50] sm:$0xff]  }
 0x140   : > { %v1486_v60 = vmax.f32 %v1470_v4, 0.0  ;;  %v5745_v18 = vpack.c.bf16 %v1488_v29, %v1487_v38  ;;  %v1467_v26 = vadd.f32 %v5696_v20, %v1444_v16  ;;  %v1484_v13 = vmax.f32 %v1468_v3, 0.0  ;;  %v5087_v20 = vld [vmem:[%s6714_s6 + $0x78] sm:$0xff]   ;;  %v5104_v57 = vld [vmem:[%s6714_s6 + $0x10] sm:$0xff]  }
 0x141   : > { %v5722_v2 = vpack.c.bf16 %v1492_v44, %v1491_v45  ;;  %4690 = vmatprep.subr.bf16.mxu1 %v5717_v6  ;;  %4714 = vmatprep.subr.bf16.mxu0 %v5717_v6  ;;  %v1485_v42 = vmax.f32 %v1469_v1, 0.0  ;;  %v5106_v45 = vld [vmem:[%s6714_s6] sm:$0xff]  }
 0x142   : > { %4691 = vmatpush3.bf16.msra.mxu1 %v5717_v6  ;;  %4715 = vmatpush3.bf16.msra.mxu0 %v5717_v6  ;;  %v1483_v28 = vmax.f32 %v1467_v26, 0.0 }
 0x143   : > { %4692 = vmatprep.subr.bf16.mxu1 %v5722_v2  ;;  %4716 = vmatprep.subr.bf16.mxu0 %v5722_v2  ;;  %v5752_v47 = vpack.c.bf16 %v1486_v60, %v1485_v42 }
 0x144   : > { %v5758_v36 = vpack.c.bf16 %v1484_v13, %v1483_v28 }
 0x146   : > { %4693 = vmatpush3.bf16.msra.mxu1 %v5722_v2  ;;  %4717 = vmatpush3.bf16.msra.mxu0 %v5722_v2 }
 0x147   : > { %4694 = vmatprep.subr.bf16.mxu1 %v5736_v25  ;;  %4718 = vmatprep.subr.bf16.mxu0 %v5736_v25 }
 0x14a   : > { %4695 = vmatpush3.bf16.msra.mxu1 %v5736_v25  ;;  %4719 = vmatpush3.bf16.msra.mxu0 %v5736_v25 }
 0x14b   : > { %4696 = vmatprep.subr.bf16.mxu1 %v5745_v18  ;;  %4720 = vmatprep.subr.bf16.mxu0 %v5745_v18 }
 0x14e   : > { %4697 = vmatpush3.bf16.msra.mxu1 %v5745_v18  ;;  %4721 = vmatpush3.bf16.msra.mxu0 %v5745_v18 }
 0x14f   : > { %4698 = vmatprep.subr.bf16.mxu1 %v5752_v47  ;;  %4722 = vmatprep.subr.bf16.mxu0 %v5752_v47 }
 0x152   : > { %4699 = vmatpush3.bf16.msra.mxu1 %v5752_v47  ;;  %4723 = vmatpush3.bf16.msra.mxu0 %v5752_v47 }
 0x153   : > { %4700 = vmatprep.subr.bf16.mxu1 %v5758_v36  ;;  %4724 = vmatprep.subr.bf16.mxu0 %v5758_v36 }
 0x156   : > { %4701 = vmatpush3.bf16.msra.mxu1 %v5758_v36  ;;  %4725 = vmatpush3.bf16.msra.mxu0 %v5758_v36 }
 0x157   : > { %4702 = vmatprep.subr.bf16.mxu1 %v5704_v55  ;;  %4726 = vmatprep.subr.bf16.mxu0 %v5704_v55 }
 0x15a   : > { %4703 = vmatpush3.bf16.msra.mxu1 %v5704_v55  ;;  %4727 = vmatpush3.bf16.msra.mxu0 %v5704_v55 }
 0x15b   : > { %4704 = vmatprep.subr.bf16.mxu1 %v5706_v35  ;;  %4728 = vmatprep.subr.bf16.mxu0 %v5706_v35 }
 0x15e   : > { %4705 = vmatpush3.bf16.msra.mxu1 %v5706_v35  ;;  %4729 = vmatpush3.bf16.msra.mxu0 %v5706_v35 }
 0x15f   : > { %4738 = vmatprep.subr.bf16.mxu1 %v5087_v20  ;;  %4762 = vmatprep.subr.bf16.mxu0 %v5099_v17 }
 0x161   : > { %4707 = vmatmul.mubr.bf16.vlgmr.msra.gmra.mxu1 %v5085_v37  ;;  %4731 = vmatmul.mubr.bf16.vlgmr.msra.gmra.mxu0 %v5086_v22  ;;  %v5107_v37 = vld [vmem:[%s6712_s5 + $0x40] sm:$0xff]   ;;  %v5116_v22 = vld [vmem:[%s6714_s6 + $0x90] sm:$0xff]  }
 0x162   : > { %4739 = vmatpush3.bf16.msra.mxu1 %v5087_v20  ;;  %4710 = vmatprep.mubr.bf16.mxu1 %v5090_v21  ;;  %v5117_v21 = vld [vmem:[%s6714_s6 + $0x88] sm:$0xff]  }
 0x163   : > { %4740 = vmatprep.subr.bf16.mxu1 %v5088_v40  ;;  %4734 = vmatprep.mubr.bf16.mxu0 %v5091_v41 }
 0x164   : > { %4763 = vmatpush3.bf16.msra.mxu0 %v5099_v17 }
 0x165   : > { %4764 = vmatprep.subr.bf16.mxu0 %v5100_v48 }
 0x166   : > { %4741 = vmatpush3.bf16.msra.mxu1 %v5088_v40  ;;  %v5118_v40 = vld [vmem:[%s6714_s6 + $0x80] sm:$0xff]  }
 0x167   : > { %4742 = vmatprep.subr.bf16.mxu1 %v5089_v50 }
 0x168   : > { %4765 = vmatpush3.bf16.msra.mxu0 %v5100_v48 }
 0x169   : > { %4711 = vmatmul.mubr.bf16.gmra.mxu1 %v5092_v12  ;;  %4735 = vmatmul.mubr.bf16.gmra.mxu0 %v5093_v31 }
 0x16a   : > { %4743 = vmatpush3.bf16.msra.mxu1 %v5089_v50  ;;  %4766 = vmatprep.subr.bf16.mxu0 %v5101_v43 }
 0x16b   : > { %4744 = vmatprep.subr.bf16.mxu1 %v5094_v9 }
 0x16c   : > { %4767 = vmatpush3.bf16.msra.mxu0 %v5101_v43 }
 0x16d   : > { %4768 = vmatprep.subr.bf16.mxu0 %v5102_v49 }
 0x16e   : > { %4745 = vmatpush3.bf16.msra.mxu1 %v5094_v9 }
 0x16f   : > { %4746 = vmatprep.subr.bf16.mxu1 %v5095_v39 }
 0x170   : > { %4769 = vmatpush3.bf16.msra.mxu0 %v5102_v49 }
 0x171   : > { %4770 = vmatprep.subr.bf16.mxu0 %v5103_v61 }
 0x172   : > { %4747 = vmatpush3.bf16.msra.mxu1 %v5095_v39 }
 0x173   : > { %4748 = vmatprep.subr.bf16.mxu1 %v5096_v52 }
 0x174   : > { %4771 = vmatpush3.bf16.msra.mxu0 %v5103_v61 }
 0x175   : > { %4772 = vmatprep.subr.bf16.mxu0 %v5104_v57 }
 0x176   : > { %4749 = vmatpush3.bf16.msra.mxu1 %v5096_v52 }
 0x177   : > { %4750 = vmatprep.subr.bf16.mxu1 %v5097_v19 }
 0x178   : > { %4773 = vmatpush3.bf16.msra.mxu0 %v5104_v57 }
 0x179   : > { %4774 = vmatprep.subr.bf16.mxu0 %v5105_v10 }
 0x17a   : > { %4751 = vmatpush3.bf16.msra.mxu1 %v5097_v19 }
 0x17b   : > { %4752 = vmatprep.subr.bf16.mxu1 %v5098_v34 }
 0x17c   : > { %4775 = vmatpush3.bf16.msra.mxu0 %v5105_v10 }
 0x17d   : > { %4776 = vmatprep.subr.bf16.mxu0 %v5106_v45 }
 0x17e   : > { %4753 = vmatpush3.bf16.msra.mxu1 %v5098_v34 }
 0x17f   : > { %4786 = vmatprep.subr.bf16.mxu1 %v5717_v6 }
 0x180   : > { %4777 = vmatpush3.bf16.msra.mxu0 %v5106_v45 }
 0x221   : > { %v4708_v44 = vpop.f32.mrf.mxu1  ;;  %v4732_v14 = vpop.f32.mrf.mxu0 }
 0x223   : > { %v1569_v15 = vpop.f32.mrf.mxu1  ;;  %v1687_v5 = vpop.f32.mrf.mxu0 }
 0x225   : > { %v4709_v53 = vpop.f32.mrf.mxu1  ;;  %v4733_v24 = vpop.f32.mrf.mxu0 }
 0x226   : > { %v1601_v62 = vpack.c.bf16 %v4709_v53, %v4708_v44  ;;  %v1719_v51 = vpack.c.bf16 %v4733_v24, %v4732_v14 }
 0x227   : > { %v1572_v7 = vpop.f32.mrf.mxu1  ;;  %v1690_v58 = vpop.f32.mrf.mxu0 }
 0x228   : > { %v1600_v0 = vpack.c.bf16 %v1572_v7, %v1569_v15  ;;  %v1718_v4 = vpack.c.bf16 %v1690_v58, %v1687_v5 }
 0x229   : > { %v4712_v29 = vpop.f32.mrf.mxu1  ;;  %v4736_v1 = vpop.f32.mrf.mxu0 }
 0x22a   : > { %4754 = vmatprep.mubr.bf16.mxu1 %v1718_v4  ;;  %4778 = vmatprep.mubr.bf16.mxu0 %v1600_v0 }
 0x22b   : > { %4755 = vmatmul.mubr.bf16.vlgmr.msra.gmra.mxu1 %v1719_v51  ;;  %4779 = vmatmul.mubr.bf16.vlgmr.msra.gmra.mxu0 %v1601_v62  ;;  %v1585_v16 = vpop.f32.mrf.mxu1  ;;  %v1703_v38 = vpop.f32.mrf.mxu0 }
 0x22c   : > { %4787 = vmatpush3.bf16.msra.mxu1 %v5717_v6  ;;  %v5108_v6 = vld [vmem:[%s6712_s5 + $0x48] sm:$0xff]  }
 0x22d   : > { %4788 = vmatprep.subr.bf16.mxu1 %v5722_v2  ;;  %v4713_v60 = vpop.f32.mrf.mxu1  ;;  %v4737_v3 = vpop.f32.mrf.mxu0 }
 0x22e   : > { %v1603_v42 = vpack.c.bf16 %v4713_v60, %v4712_v29  ;;  %v1721_v26 = vpack.c.bf16 %v4737_v3, %v4736_v1 }
 0x22f   : > { %v1588_v13 = vpop.f32.mrf.mxu1  ;;  %v1706_v28 = vpop.f32.mrf.mxu0 }
 0x230   : > { %4789 = vmatpush3.bf16.msra.mxu1 %v5722_v2  ;;  %v1602_v20 = vpack.c.bf16 %v1588_v13, %v1585_v16  ;;  %v1720_v17 = vpack.c.bf16 %v1706_v28, %v1703_v38  ;;  %v5109_v2 = vld [vmem:[%s6712_s5 + $0x50] sm:$0xff]   ;;  %v4256_v16 = vld [vmem:[%s6715_s7] ss:$0 sm:$0xff]  ;;  %s6004_s7 = sld [smem:[#allocation3 + %s2349_s24]] }
 0x231   : > { %4790 = vmatprep.subr.bf16.mxu1 %v5736_v25 }
 0x232   : > { %4758 = vmatprep.mubr.bf16.mxu1 %v1720_v17  ;;  %4782 = vmatprep.mubr.bf16.mxu0 %v1602_v20 }
 0x233   : > { %4759 = vmatmul.mubr.bf16.gmra.mxu1 %v1721_v26  ;;  %4783 = vmatmul.mubr.bf16.gmra.mxu0 %v1603_v42 }
 0x234   : > { %4791 = vmatpush3.bf16.msra.mxu1 %v5736_v25  ;;  %4802 = vmatprep.mubr.bf16.mxu1 %v5107_v37  ;;  %v5110_v25 = vld [vmem:[%s6712_s5 + $0x58] sm:$0xff]   ;;  %s2327_s5 = scalar_lea.vmem %s6604_s8, %s2326_s19 }
 0x235   : > { %4792 = vmatprep.subr.bf16.mxu1 %v5745_v18 }
 0x236   : > { %s2351_s24 = scalar_lea.vmem %s6604_s8, %s6004_s7 }
 0x238   : > { %4793 = vmatpush3.bf16.msra.mxu1 %v5745_v18  ;;  %v5113_v18 = vld [vmem:[%s6714_s6 + $0xa8] sm:$0xff]  }
 0x239   : > { %4794 = vmatprep.subr.bf16.mxu1 %v5752_v47 }
 0x23c   : > { %4795 = vmatpush3.bf16.msra.mxu1 %v5752_v47  ;;  %v5114_v47 = vld [vmem:[%s6714_s6 + $0xa0] sm:$0xff]  }
 0x23d   : > { %4796 = vmatprep.subr.bf16.mxu1 %v5758_v36 }
 0x240   : > { %4797 = vmatpush3.bf16.msra.mxu1 %v5758_v36  ;;  %v5115_v36 = vld [vmem:[%s6714_s6 + $0x98] sm:$0xff]  }
 0x241   : > { %4798 = vmatprep.subr.bf16.mxu1 %v5704_v55 }
 0x244   : > { %4799 = vmatpush3.bf16.msra.mxu1 %v5704_v55  ;;  %v5111_v55 = vld [vmem:[%s6714_s6 + $0xb8] sm:$0xff]  }
 0x245   : > { %4800 = vmatprep.subr.bf16.mxu1 %v5706_v35  ;;  %4810 = vmatprep.subr.bf16.mxu0 %v5111_v55 }
 0x246   : > { %4811 = vmatpush3.bf16.msra.mxu0 %v5111_v55 }
 0x248   : > { %4801 = vmatpush3.bf16.msra.mxu1 %v5706_v35  ;;  %v5112_v35 = vld [vmem:[%s6714_s6 + $0xb0] sm:$0xff]   ;;  %s2319_s6 = scalar_lea.vmem %s6604_s8, %s5979_s1 }
 0x249   : > { %4812 = vmatprep.subr.bf16.mxu0 %v5112_v35 }
 0x24a   : > { %4813 = vmatpush3.bf16.msra.mxu0 %v5112_v35 }
 0x24b   : > { %4803 = vmatmul.mubr.bf16.vlgmr.msra.gmra.mxu1 %v5108_v6  ;;  %4814 = vmatprep.subr.bf16.mxu0 %v5113_v18 }
 0x24c   : > { %4806 = vmatprep.mubr.bf16.mxu1 %v5109_v2 }
 0x24e   : > { %4815 = vmatpush3.bf16.msra.mxu0 %v5113_v18 }
 0x24f   : > { %4816 = vmatprep.subr.bf16.mxu0 %v5114_v47 }
 0x252   : > { %4817 = vmatpush3.bf16.msra.mxu0 %v5114_v47 }
 0x253   : > { %4807 = vmatmul.mubr.bf16.gmra.mxu1 %v5110_v25  ;;  %4818 = vmatprep.subr.bf16.mxu0 %v5115_v36 }
 0x256   : > { %4819 = vmatpush3.bf16.msra.mxu0 %v5115_v36 }
 0x257   : > { %4820 = vmatprep.subr.bf16.mxu0 %v5116_v22 }
 0x25a   : > { %4821 = vmatpush3.bf16.msra.mxu0 %v5116_v22 }
 0x25b   : > { %4822 = vmatprep.subr.bf16.mxu0 %v5117_v21 }
 0x25e   : > { %4823 = vmatpush3.bf16.msra.mxu0 %v5117_v21 }
 0x25f   : > { %4824 = vmatprep.subr.bf16.mxu0 %v5118_v40 }
 0x262   : > { %4825 = vmatpush3.bf16.msra.mxu0 %v5118_v40 }
 0x2eb   : > { %v4756_v41 = vpop.f32.mrf.mxu1  ;;  %v4780_v53 = vpop.f32.mrf.mxu0 }
 0x2ec   : > { %v1943_v29 = vadd.f32 %v4780_v53, %v4756_v41 }
 0x2ed   : > { %v1821_v48 = vpop.f32.mrf.mxu1  ;;  %v1934_v24 = vpop.f32.mrf.mxu0 }
 0x2ee   : > { %v1935_v38 = vadd.f32 %v1934_v24, %v1821_v48  ;;  %v5119_v24 = vld [vmem:[%s6607_s11 + $0x8] sm:$0xff]  }
 0x2ef   : > { %v4757_v50 = vpop.f32.mrf.mxu1  ;;  %v4781_v62 = vpop.f32.mrf.mxu0  ;;  %4834 = vmatprep.subr.bf16.mxu1 %v5119_v24 }
 0x2f0   : > { %v1946_v42 = vadd.f32 %v4781_v62, %v4757_v50  ;;  %4835 = vmatpush3.bf16.msra.mxu1 %v5119_v24 }
 0x2f1   : > { %v1824_v12 = vpop.f32.mrf.mxu1  ;;  %v1937_v7 = vpop.f32.mrf.mxu0 }
 0x2f2   : > { %v1938_v20 = vadd.f32 %v1937_v7, %v1824_v12 }
 0x2f3   : > { %v4760_v31 = vpop.f32.mrf.mxu1  ;;  %v4784_v58 = vpop.f32.mrf.mxu0 }
 0x2f4   : > { %v1959_v47 = vadd.f32 %v4784_v58, %v4760_v31 }
 0x2f5   : > { %v1837_v43 = vpop.f32.mrf.mxu1  ;;  %v1950_v0 = vpop.f32.mrf.mxu0 }
 0x2f6   : > { %v1951_v36 = vadd.f32 %v1950_v0, %v1837_v43 }
 0x2f7   : > { %v4761_v9 = vpop.f32.mrf.mxu1  ;;  %v4785_v4 = vpop.f32.mrf.mxu0 }
 0x2f8   : > { %v1962_v48 = vadd.f32 %v4785_v4, %v4761_v9  ;;  %v5120_v4 = vld [vmem:[%s6607_s11] sm:$0xff]  }
 0x2f9   : > { %v5892_v49 = vpop.f32.mrf.mxu1  ;;  %v1953_v51 = vpop.f32.mrf.mxu0  ;;  %4836 = vmatprep.subr.bf16.mxu1 %v5120_v4 }
 0x2fa   : > { %4837 = vmatpush3.bf16.msra.mxu1 %v5120_v4 }
 0x30b   : > { %v4804_v39 = vpop.f32.mrf.mxu1 }
 0x30d   : > { %v2032_v61 = vpop.f32.mrf.mxu1 }
 0x30f   : > { %v4805_v52 = vpop.f32.mrf.mxu1 }
 0x310   : > { %v2064_v34 = vpack.c.bf16 %v4805_v52, %v4804_v39 }
 0x311   : > { %v2035_v57 = vpop.f32.mrf.mxu1 }
 0x312   : > { %v2063_v19 = vpack.c.bf16 %v2035_v57, %v2032_v61  ;;  %v1954_v61 = vadd.f32 %v1953_v51, %v5892_v49 }
 0x313   : > { %v4808_v10 = vpop.f32.mrf.mxu1 }
 0x314   : > { %4826 = vmatprep.mubr.bf16.mxu0 %v2063_v19 }
 0x315   : > { %v2048_v45 = vpop.f32.mrf.mxu1  ;;  %4827 = vmatmul.mubr.bf16.vlgmr.msra.gmra.mxu0 %v2064_v34 }
 0x317   : > { %v4809_v44 = vpop.f32.mrf.mxu1 }
 0x318   : > { %v2066_v5 = vpack.c.bf16 %v4809_v44, %v4808_v10 }
 0x319   : > { %v2051_v14 = vpop.f32.mrf.mxu1 }
 0x31a   : > { %v2065_v15 = vpack.c.bf16 %v2051_v14, %v2048_v45 }
 0x31c   : > { %4830 = vmatprep.mubr.bf16.mxu0 %v2065_v15 }
 0x31d   : > { %4831 = vmatmul.mubr.bf16.gmra.mxu0 %v2066_v5 }
 0x3d5   : > { %v4828_v1 = vpop.f32.mrf.mxu0 }
 0x3d6   : > { %v2199_v60 = vadd.f32 %v4828_v1, %v1943_v29 }
 0x3d7   : > { %v2166_v3 = vpop.f32.mrf.mxu0 }
 0x3d8   : > { %v5913_v26 = vadd.f32 %v4256_v16, %v2199_v60  ;;  %v2197_v13 = vadd.f32 %v2166_v3, %v1935_v38 }
 0x3d9   : > { %v4829_v28 = vpop.f32.mrf.mxu0 }
 0x3da   : > { %2223 = vst.msk [vmem:[%s5911_s28 + $0x10] sm:$0xff] %vm2220_vm8, %v5913_v26  ;;  %v2231_v17 = vmul.f32 0.5, %v5913_v26  ;;  %v5919_v37 = vadd.f32 %v4256_v16, %v2197_v13  ;;  %v2200_v6 = vadd.f32 %v4829_v28, %v1946_v42  ;;  %v2255_v13 = vld [vmem:[%s5977_s10 + $0x10] sm:$0xff] }
 0x3db   : > { %v2169_v2 = vpop.f32.mrf.mxu0 }
 0x3dc   : > { %v2241_v25 = vmul.f32 1.442695, %v2231_v17  ;;  %2221 = vst.msk [vmem:[%s5911_s28] sm:$0xff] %vm2220_vm8, %v5919_v37  ;;  %v2229_v55 = vmul.f32 0.5, %v5919_v37  ;;  %v5925_v35 = vadd.f32 %v4256_v16, %v2200_v6  ;;  %v2198_v18 = vadd.f32 %v2169_v2, %v1938_v20  ;;  %v2253_v20 = vld [vmem:[%s5977_s10] sm:$0xff]  ;;  %v2256_v2 = vld [vmem:[%s5977_s10 + $0x18] sm:$0xff] }
 0x3dd   : > { %v4832_v22 = vpop.f32.mrf.mxu0 }
 0x3de   : > { %5165 = vpow2.f32 %v2241_v25  ;;  %v2237_v21 = vmul.f32 1.442695, %v2229_v55  ;;  %2224 = vst.msk [vmem:[%s5911_s28 + $0x18] sm:$0xff] %vm2220_vm8, %v5925_v35  ;;  %v2232_v40 = vmul.f32 0.5, %v5925_v35  ;;  %v5931_v41 = vadd.f32 %v4256_v16, %v2198_v18  ;;  %v2254_v18 = vld [vmem:[%s5977_s10 + $0x8] sm:$0xff] }
 0x3df   : > { %v2203_v50 = vadd.f32 %v4832_v22, %v1959_v47  ;;  %v2182_v12 = vpop.f32.mrf.mxu0 }
 0x3e0   : > { %5167 = vpow2.f32 %v2237_v21  ;;  %v2243_v39 = vmul.f32 1.442695, %v2232_v40  ;;  %2222 = vst.msk [vmem:[%s5911_s28 + $0x8] sm:$0xff] %vm2220_vm8, %v5931_v41  ;;  %v2230_v31 = vmul.f32 0.5, %v5931_v41  ;;  %v2201_v43 = vadd.f32 %v2182_v12, %v1951_v36  ;;  %v4261_v40 = vld [vmem:[%s2335_s0] ss:$0 sm:$0xff] }
 0x3e1   : > { %v5938_v52 = vadd.f32 %v4256_v16, %v2203_v50  ;;  %v4833_v57 = vpop.f32.mrf.mxu0  ;;  %v4260_v50 = vld [vmem:[%s2327_s5] ss:$0 sm:$0xff] }
 0x3e2   : > { %5169 = vpow2.f32 %v2243_v39  ;;  %v2239_v19 = vmul.f32 1.442695, %v2230_v31  ;;  %v5940_v9 = vadd.f32 %v4256_v16, %v2201_v43  ;;  %v2204_v34 = vadd.f32 %v4833_v57, %v1962_v48  ;;  %v2257_v31 = vld [vmem:[%s5977_s10 + $0x20] sm:$0xff] }
 0x3e3   : > { %2227 = vst.msk [vmem:[%s5911_s28 + $0x30] sm:$0xff] %vm2220_vm8, %v5938_v52  ;;  %v2235_v10 = vmul.f32 0.5, %v5938_v52  ;;  %v2185_v45 = vpop.f32.mrf.mxu0 }
 0x3e4   : > { %5171 = vpow2.f32 %v2239_v19  ;;  %2225 = vst.msk [vmem:[%s5911_s28 + $0x20] sm:$0xff] %vm2220_vm8, %v5940_v9  ;;  %v2233_v49 = vmul.f32 0.5, %v5940_v9  ;;  %v5950_v44 = vadd.f32 %v4256_v16, %v2204_v34  ;;  %v2202_v14 = vadd.f32 %v2185_v45, %v1954_v61 }
 0x3e5   : > { %v2249_v53 = vmul.f32 1.442695, %v2235_v10 }
 0x3e6   : > { %v2245_v15 = vmul.f32 1.442695, %v2233_v49  ;;  %2228 = vst.msk [vmem:[%s5911_s28 + $0x38] sm:$0xff] %vm2220_vm8, %v5950_v44  ;;  %v5955_v5 = vadd.f32 %v4256_v16, %v2202_v14  ;;  %v2236_v62 = vmul.f32 0.5, %v5950_v44  ;;  %v2258_v49 = vld [vmem:[%s5977_s10 + $0x28] sm:$0xff]  ;;  %v2259_v14 = vld [vmem:[%s5977_s10 + $0x30] sm:$0xff] }
 0x3e8   : > { %5173 = vpow2.f32 %v2245_v15  ;;  %2226 = vst.msk [vmem:[%s5911_s28 + $0x28] sm:$0xff] %vm2220_vm8, %v5955_v5  ;;  %v2234_v7 = vmul.f32 0.5, %v5955_v5  ;;  %v2251_v51 = vmul.f32 1.442695, %v2236_v62  ;;  %s2311_s28 = scalar_lea.vmem %s6604_s8, %s2310_s26 }
 0x3e9   : > { %5175 = vpow2.f32 %v2249_v53  ;;  %v4258_v21 = vld [vmem:[%s2311_s28] ss:$0 sm:$0xff] }
 0x3ea   : > { %v2247_v58 = vmul.f32 1.442695, %v2234_v7 }
 0x3eb   : > { %v5166_v0 = vpop.eup %5165 }
 0x3ec   : > { %5177 = vpow2.f32 %v2247_v58  ;;  %2273 = vrot.lane.b32.xlu1 %v5166_v0, %s5206_s20 }
 0x3ed   : > { %v5168_v29 = vpop.eup %5167  ;;  %5179 = vpow2.f32 %v2251_v51 }
 0x3ee   : > { %2269 = vrot.lane.b32.xlu0 %v5168_v29, %s5206_s20 }
 0x3ef   : > { %v5170_v1 = vpop.eup %5169 }
 0x3f0   : > { %2275 = vrot.lane.b32.xlu1 %v5170_v1, %s5206_s20  ;;  %v4263_v1 = vld [vmem:[%s2351_s24] ss:$0 sm:$0xff] }
 0x3f1   : > { %v5172_v16 = vpop.eup %5171 }
 0x3f2   : > { %2271 = vrot.lane.b32.xlu0 %v5172_v16, %s5206_s20 }
 0x3f5   : > { %v5174_v38 = vpop.eup %5173 }
 0x3f6   : > { %2277 = vrot.lane.b32.xlu0 %v5174_v38, %s5206_s20  ;;  %v5176_v60 = vpop.eup %5175 }
 0x3f9   : > { %v5178_v3 = vpop.eup %5177 }
 0x3fa   : > { %2279 = vrot.lane.b32.xlu1 %v5178_v3, %s5206_s20  ;;  %2281 = vrot.lane.b32.xlu0 %v5176_v60, %s5206_s20  ;;  %v5180_v42 = vpop.eup %5179  ;;  %v4264_v3 = vld [vmem:[%s2359_s30] ss:$0 sm:$0xff] }
 0x3fe   : > { %2283 = vrot.lane.b32.xlu1 %v5180_v42, %s5206_s20  ;;  %s2341_s20 = sadd.s32 4, %s5896_s22 }
 0x3ff   : > { %s5992_s2 = sld [smem:[#allocation3 + %s2341_s20]] }
 0x45e   : > { %v2274_v28 = vpop.permute.xlu1 %2273 }
 0x45f   : > { %v2295_v17 = vmul.f32 %v2274_v28, %v2255_v13 }
 0x460   : > { %v2270_v6 = vpop.permute.xlu0 %2269 }
 0x461   : > { %v2293_v25 = vmul.f32 %v2270_v6, %v2253_v20  ;;  %v2303_v22 = vadd.f32 %v2295_v17, %v5913_v26  ;;  %v4265_v20 = vld [vmem:[%s2367_s23] ss:$0 sm:$0xff] }
 0x462   : > { %v2276_v55 = vpop.permute.xlu1 %2275 }
 0x463   : > { %v2301_v47 = vadd.f32 %v2293_v25, %v5919_v37  ;;  %v2296_v36 = vmul.f32 %v2276_v55, %v2256_v2  ;;  %v4259_v37 = vld [vmem:[%s2319_s6] ss:$0 sm:$0xff]  ;;  %v2375_v57 = vadd.f32 %v4260_v50, %v2303_v22  ;;  %s2343_s6 = scalar_lea.vmem %s6604_s8, %s5992_s2 }
 0x464   : > { %v2272_v48 = vpop.permute.xlu0 %2271  ;;  %v4262_v62 = vld [vmem:[%s2343_s6] ss:$0 sm:$0xff] }
 0x465   : > { %v2304_v12 = vadd.f32 %v2296_v36, %v5925_v35  ;;  %v2294_v39 = vmul.f32 %v2272_v48, %v2254_v18  ;;  %v2373_v43 = vadd.f32 %v4258_v21, %v2301_v47  ;;  %v4266_v35 = vld [vmem:[%s6605_s9] ss:$0 sm:$0xff] }
 0x466   : > { %v2390_v24 = vadd.f32 %v4266_v35, %v2375_v57  ;;  %v5121_v36 = vld [vmem:[%s6717_s21] sm:$0xff]   ;;  %v5122_v57 = vld [vmem:[%s6717_s21 + $0x8] sm:$0xff]  }
 0x467   : > { %v2376_v61 = vadd.f32 %v4261_v40, %v2304_v12  ;;  %v2302_v26 = vadd.f32 %v2294_v39, %v5931_v41  ;;  %v2388_v41 = vadd.f32 %v4266_v35, %v2373_v43 }
 0x468   : > { %v2278_v19 = vpop.permute.xlu0 %2277 }
 0x469   : > { %v2374_v34 = vadd.f32 %v4259_v37, %v2302_v26  ;;  %v2297_v10 = vmul.f32 %v2278_v19, %v2257_v31  ;;  %v2391_v45 = vadd.f32 %v4266_v35, %v2376_v61  ;;  %v5129_v26 = vld [vmem:[%s6608_s12 + $0x38] sm:$0xff]   ;;  %v5123_v19 = vld [vmem:[%s6717_s21 + $0x10] sm:$0xff]  }
 0x46b   : > { %v2389_v15 = vadd.f32 %v4266_v35, %v2374_v34  ;;  %v2305_v53 = vadd.f32 %v2297_v10, %v5940_v9  ;;  %v2397_v29 = vpack.c.bf16 %v2391_v45, %v2390_v24  ;;  %v2260_v9 = vld [vmem:[%s5977_s10 + $0x38] sm:$0xff]  ;;  %v5125_v10 = vld [vmem:[%s6717_s21 + $0x20] sm:$0xff]   ;;  %v5126_v45 = vld [vmem:[%s6717_s21 + $0x28] sm:$0xff]   ;;  %s6538_s10 = scalar_lea.vmem %s6613_s17, %s4101_s25 }
 0x46c   : > { %v2280_v7 = vpop.permute.xlu1 %2279  ;;  %v2282_v58 = vpop.permute.xlu0 %2281  ;;  %v5124_v34 = vld [vmem:[%s6717_s21 + $0x18] sm:$0xff]   ;;  %v5134_v24 = vld [vmem:[%s6608_s12 + $0x20] sm:$0xff]  }
 0x46d   : > { %v2298_v0 = vmul.f32 %v2280_v7, %v2258_v49  ;;  %v2299_v4 = vmul.f32 %v2282_v58, %v2259_v14  ;;  %v2396_v51 = vpack.c.bf16 %v2389_v15, %v2388_v41  ;;  %v2377_v16 = vadd.f32 %v4262_v62, %v2305_v53  ;;  %v5127_v49 = vld [vmem:[%s6717_s21 + $0x30] sm:$0xff]   ;;  %v5128_v14 = vld [vmem:[%s6717_s21 + $0x38] sm:$0xff]   ;;  %v5132_v15 = vld [vmem:[%s6608_s12 + $0x28] sm:$0xff]  }
 0x46e   : > { %v5131_v41 = vld [vmem:[%s6608_s12 + $0x18] sm:$0xff]   ;;  %v5133_v53 = vld [vmem:[%s6608_s12 + $0x10] sm:$0xff]   ;;  %v5135_v62 = vld [vmem:[%s6608_s12 + $0x8] sm:$0xff]  }
 0x46f   : > { %v2306_v38 = vadd.f32 %v2298_v0, %v5955_v5  ;;  %v2307_v60 = vadd.f32 %v2299_v4, %v5938_v52  ;;  %4838 = vmatprep.mubr.msk.bf16.mxu1 %vm2416_vm14, %v2396_v51  ;;  %v2392_v17 = vadd.f32 %v4266_v35, %v2377_v16  ;;  %4870 = vmatprep.subr.bf16.mxu0 %v5131_v41  ;;  %v5136_v7 = vld [vmem:[%s6608_s12] sm:$0xff]   ;;  %v5137_v58 = vld [vmem:[%s6608_s12 + $0x58] sm:$0xff]  }
 0x470   : > { %4839 = vmatmul.mubr.msk.bf16.vlgmr.msra.gmra.mxu1 %vm2416_vm14, %v2397_v29  ;;  %v2284_v42 = vpop.permute.xlu1 %2283  ;;  %4871 = vmatpush3.bf16.msra.mxu0 %v5131_v41  ;;  %v5140_v41 = vld [vmem:[%s6608_s12 + $0x40] sm:$0xff]  }
 0x471   : > { %v2378_v13 = vadd.f32 %v4263_v1, %v2306_v38  ;;  %v2300_v28 = vmul.f32 %v2284_v42, %v2260_v9  ;;  %v2379_v2 = vadd.f32 %v4264_v3, %v2307_v60  ;;  %4872 = vmatprep.subr.bf16.mxu0 %v5133_v53 }
 0x473   : > { %v2393_v6 = vadd.f32 %v4266_v35, %v2378_v13  ;;  %v2308_v5 = vadd.f32 %v2300_v28, %v5950_v44  ;;  %v2394_v55 = vadd.f32 %v4266_v35, %v2379_v2 }
 0x474   : > { %4873 = vmatpush3.bf16.msra.mxu0 %v5133_v53 }
 0x475   : > { %v2380_v25 = vadd.f32 %v4265_v20, %v2308_v5  ;;  %v2398_v52 = vpack.c.bf16 %v2393_v6, %v2392_v17  ;;  %4874 = vmatprep.subr.bf16.mxu0 %v5135_v62 }
 0x477   : > { %v2395_v18 = vadd.f32 %v4266_v35, %v2380_v25  ;;  %4842 = vmatprep.mubr.msk.bf16.mxu1 %vm2416_vm14, %v2398_v52  ;;  %v5130_v35 = vld [vmem:[%s6608_s12 + $0x30] sm:$0xff]  }
 0x478   : > { %4875 = vmatpush3.bf16.msra.mxu0 %v5135_v62 }
 0x479   : > { %v2399_v47 = vpack.c.bf16 %v2395_v18, %v2394_v55  ;;  %4876 = vmatprep.subr.bf16.mxu0 %v5136_v7 }
 0x47b   : > { %4843 = vmatmul.mubr.msk.bf16.gmra.mxu1 %vm2416_vm14, %v2399_v47  ;;  %vm6721_vm14 = vmmov %vm6718_vm1 }
 0x47c   : > { %4854 = vmatprep.mubr.msk.bf16.mxu1 %vm2220_vm8, %v5121_v36  ;;  %4877 = vmatpush3.bf16.msra.mxu0 %v5136_v7 }
 0x47d   : > { %4918 = vmatprep.subr.bf16.mxu0 %v5137_v58 }
 0x530   : > { %v4840_v22 = vpop.f32.mrf.mxu1 }
 0x532   : > { %v2463_v21 = vpop.f32.mrf.mxu1 }
 0x534   : > { %v4841_v40 = vpop.f32.mrf.mxu1 }
 0x535   : > { %v2495_v43 = vpack.c.bf16 %v4841_v40, %v4840_v22 }
 0x536   : > { %v2466_v48 = vpop.f32.mrf.mxu1 }
 0x537   : > { %v2494_v61 = vpack.c.bf16 %v2466_v48, %v2463_v21  ;;  %v5138_v21 = vld [vmem:[%s6608_s12 + $0x50] sm:$0xff]  }
 0x53b   : > { %v4844_v44 = vpop.f32.mrf.mxu1 }
 0x53d   : > { %v2479_v50 = vpop.f32.mrf.mxu1 }
 0x53f   : > { %v4845_v12 = vpop.f32.mrf.mxu1 }
 0x540   : > { %v2497_v39 = vpack.c.bf16 %v4845_v12, %v4844_v44 }
 0x541   : > { %v2482_v37 = vpop.f32.mrf.mxu1 }
 0x542   : > { %v2496_v31 = vpack.c.bf16 %v2482_v37, %v2479_v50  ;;  %4846 = vmatprep.subr.bf16.mxu1 %v2497_v39 }
 0x543   : > { %4847 = vmatpush3.bf16.msra.mxu1 %v2497_v39 }
 0x544   : > { %4848 = vmatprep.subr.bf16.mxu1 %v2496_v31 }
 0x547   : > { %4849 = vmatpush3.bf16.msra.mxu1 %v2496_v31 }
 0x548   : > { %4850 = vmatprep.subr.bf16.mxu1 %v2495_v43 }
 0x54b   : > { %4851 = vmatpush3.bf16.msra.mxu1 %v2495_v43 }
 0x54c   : > { %4852 = vmatprep.subr.bf16.mxu1 %v2494_v61 }
 0x54f   : > { %4853 = vmatpush3.bf16.msra.mxu1 %v2494_v61  ;;  %v5139_v61 = vld [vmem:[%s6608_s12 + $0x48] sm:$0xff]  }
 0x550   : > { %4894 = vmatprep.subr.bf16.mxu1 %v5129_v26 }
 0x552   : > { %4855 = vmatmul.mubr.msk.bf16.vlgmr.msra.gmra.mxu1 %vm2220_vm8, %v5122_v57 }
 0x553   : > { %4858 = vmatprep.mubr.msk.bf16.mxu1 %vm2220_vm8, %v5123_v19  ;;  %4895 = vmatpush3.bf16.msra.mxu1 %v5129_v26 }
 0x554   : > { %4896 = vmatprep.subr.bf16.mxu1 %v5130_v35 }
 0x557   : > { %4897 = vmatpush3.bf16.msra.mxu1 %v5130_v35 }
 0x558   : > { %4898 = vmatprep.subr.bf16.mxu1 %v5132_v15 }
 0x55a   : > { %4859 = vmatmul.mubr.msk.bf16.gmra.mxu1 %vm2220_vm8, %v5124_v34 }
 0x55b   : > { %4862 = vmatprep.mubr.msk.bf16.mxu1 %vm2220_vm8, %v5125_v10  ;;  %4899 = vmatpush3.bf16.msra.mxu1 %v5132_v15 }
 0x55c   : > { %4900 = vmatprep.subr.bf16.mxu1 %v5134_v24 }
 0x55f   : > { %4901 = vmatpush3.bf16.msra.mxu1 %v5134_v24 }
 0x562   : > { %4863 = vmatmul.mubr.msk.bf16.gmra.mxu1 %vm2220_vm8, %v5126_v45 }
 0x563   : > { %4866 = vmatprep.mubr.msk.bf16.mxu1 %vm2220_vm8, %v5127_v49 }
 0x56a   : > { %4867 = vmatmul.mubr.msk.bf16.gmra.mxu1 %vm2220_vm8, %v5128_v14 }
 0x612   : > { %v4856_v0 = vpop.f32.mrf.mxu1 }
 0x614   : > { %v2612_v4 = vpop.f32.mrf.mxu1 }
 0x616   : > { %v4857_v51 = vpop.f32.mrf.mxu1 }
 0x617   : > { %v6104_v29 = vpack.c.bf16 %v4857_v51, %v4856_v0 }
 0x618   : > { %v2615_v1 = vpop.f32.mrf.mxu1 }
 0x619   : > { %v2700_v9 = vshrl.u32 %v6104_v29, 16  ;;  %v6107_v16 = vpack.c.bf16 %v2615_v1, %v2612_v4  ;;  %v2703_v3 = vshll.u32 %v6104_v29, 16 }
 0x61a   : > { %v4860_v38 = vpop.f32.mrf.mxu1 }
 0x61b   : > { %v2702_v60 = vrot.slane %v2700_v9, 7  ;;  %v2693_v42 = vshrl.u32 %v6107_v16, 16  ;;  %4902 = vmatprep.mubr.msk.bf16.mxu1 %vm2220_vm8, %v6107_v16  ;;  %v2696_v17 = vshll.u32 %v6107_v16, 16 }
 0x61c   : > { %v2628_v13 = vpop.f32.mrf.mxu1  ;;  %4903 = vmatmul.mubr.msk.bf16.vlgmr.msra.gmra.mxu1 %vm2220_vm8, %v6104_v29 }
 0x61d   : > { %v2705_v28 = vor.u32 %v2703_v3, %v2702_v60  ;;  %v2695_v20 = vrot.slane %v2693_v42, 7 }
 0x61e   : > { %v4861_v6 = vpop.f32.mrf.mxu1 }
 0x61f   : > { %v6122_v2 = vpack.c.bf16 %v4861_v6, %v4860_v38  ;;  %v2698_v5 = vor.u32 %v2696_v17, %v2695_v20  ;;  %v2706_v52 = vsel %vm6718_vm1, %v2695_v20, %v2705_v28  ;;  %v3062_v28 = vrot.slane %v2696_v17, 1 }
 0x620   : > { %v2631_v25 = vpop.f32.mrf.mxu1  ;;  %v2765_v50 = vsel %vm5414_vm13, %v2706_v52, 0 }
 0x621   : > { %v2716_v55 = vshrl.u32 %v6122_v2, 16  ;;  %v6126_v18 = vpack.c.bf16 %v2631_v25, %v2628_v13  ;;  %v2763_v47 = vsel %vm5372_vm7, 0, %v2698_v5  ;;  %v2719_v48 = vshll.u32 %v6122_v2, 16 }
 0x622   : > { %v4864_v36 = vpop.f32.mrf.mxu1  ;;  %v2764_v22 = vsel %vm5389_vm10, %v2763_v47, 0  ;;  %v3063_v17 = vor.u32 %v3062_v28, %v2693_v42  ;;  %v6740_v28 = vld [vmem:[#allocation5_spill] sm:$0xff] }
 0x623   : > { %v2718_v40 = vrot.slane %v2716_v55, 7  ;;  %v2708_v44 = vshrl.u32 %v6126_v18, 16  ;;  %4878 = vmatprep.mubr.msk.bf16.mxu0 %vm2220_vm8, %v2764_v22  ;;  %4906 = vmatprep.mubr.msk.bf16.mxu1 %vm2220_vm8, %v6126_v18  ;;  %v2711_v31 = vshll.u32 %v6126_v18, 16 }
 0x624   : > { %v2644_v12 = vpop.f32.mrf.mxu1  ;;  %4879 = vmatmul.mubr.msk.bf16.vlgmr.msra.gmra.mxu0 %vm2220_vm8, %v2765_v50  ;;  %4907 = vmatmul.mubr.msk.bf16.gmra.mxu1 %vm2220_vm8, %v6122_v2 }
 0x625   : > { %v2721_v39 = vor.u32 %v2719_v48, %v2718_v40  ;;  %v2710_v37 = vrot.slane %v2708_v44, 7  ;;  %4919 = vmatpush3.bf16.msra.mxu0 %v5137_v58 }
 0x626   : > { %v4865_v43 = vpop.f32.mrf.mxu1  ;;  %4920 = vmatprep.subr.bf16.mxu0 %v5138_v21 }
 0x627   : > { %v2713_v26 = vor.u32 %v2711_v31, %v2710_v37  ;;  %v6155_v57 = vpack.c.bf16 %v4865_v43, %v4864_v36  ;;  %v2722_v35 = vsel %vm6719_vm2, %v2710_v37, %v2721_v39  ;;  %vm6722_vm2 = vnez %v6673_v59 }
 0x628   : > { %v2647_v19 = vpop.f32.mrf.mxu1  ;;  %v2767_v62 = vsel %vm5463_vm5, %v2722_v35, 0  ;;  %v3067_v43 = vrot.slane %v2711_v31, 1  ;;  %vm6728_vm5 = vnez %v6679_v32  ;;  %v3070_v35 = vrot.slane %v2719_v48, 1 }
 0x629   : > { %v2732_v34 = vshrl.u32 %v6155_v57, 16  ;;  %v6159_v10 = vpack.c.bf16 %v2647_v19, %v2644_v12  ;;  %v2714_v45 = vsel %vm6720_vm9, %v2702_v60, %v2713_v26  ;;  %4921 = vmatpush3.bf16.msra.mxu0 %v5138_v21  ;;  %v2735_v53 = vshll.u32 %v6155_v57, 16  ;;  %vm6723_vm9 = vmmov %vm6718_vm1 }
 0x62a   : > { %v4868_v49 = vpop.f32.mrf.mxu1  ;;  %v2766_v14 = vsel %vm5434_vm15, %v2714_v45, 0  ;;  %4922 = vmatprep.subr.bf16.mxu0 %v5139_v61  ;;  %v3064_v12 = vrot.slane %v2703_v3, 1  ;;  %v3069_v42 = vor.u32 %v3067_v43, %v2708_v44  ;;  %v3072_v29 = vor.u32 %v3070_v35, %v2716_v55 }
 0x62b   : > { %v2734_v15 = vrot.slane %v2732_v34, 7  ;;  %v2724_v24 = vshrl.u32 %v6159_v10, 16  ;;  %4882 = vmatprep.mubr.msk.bf16.mxu0 %vm2220_vm8, %v2766_v14  ;;  %4910 = vmatprep.mubr.msk.bf16.mxu1 %vm2220_vm8, %v6159_v10  ;;  %v2727_v4 = vshll.u32 %v6159_v10, 16 }
 0x62c   : > { %v2660_v7 = vpop.f32.mrf.mxu1  ;;  %4883 = vmatmul.mubr.msk.bf16.gmra.mxu0 %vm2220_vm8, %v2767_v62  ;;  %4911 = vmatmul.mubr.msk.bf16.gmra.mxu1 %vm2220_vm8, %v6155_v57  ;;  %v3066_v31 = vor.u32 %v3064_v12, %v2700_v9  ;;  %v3076_v9 = vrot.slane %v2735_v53, 1 }
 0x62d   : > { %v2737_v58 = vor.u32 %v2735_v53, %v2734_v15  ;;  %v2726_v0 = vrot.slane %v2724_v24, 7  ;;  %4923 = vmatpush3.bf16.msra.mxu0 %v5139_v61  ;;  %v3073_v45 = vrot.slane %v2727_v4, 1 }
 0x62e   : > { %v4869_v51 = vpop.f32.mrf.mxu1  ;;  %4924 = vmatprep.subr.bf16.mxu0 %v5140_v41  ;;  %v3078_v2 = vor.u32 %v3076_v9, %v2732_v34 }
 0x62f   : > { %v2729_v1 = vor.u32 %v2727_v4, %v2726_v0  ;;  %v2682_v38 = vpack.c.bf16 %v4869_v51, %v4868_v49  ;;  %v2738_v13 = vsel %vm6721_vm14, %v2726_v0, %v2737_v58  ;;  %vm6724_vm14 = vmmov %vm6718_vm1  ;;  %v3075_v44 = vor.u32 %v3073_v45, %v2724_v24 }
 0x630   : > { %v2663_v60 = vpop.f32.mrf.mxu1  ;;  %v2769_v22 = vsel %vm6722_vm2, %v2738_v13, 0  ;;  %vm6726_vm2 = vnez %v6675_v63 }
 0x631   : > { %v2748_v20 = vshrl.u32 %v2682_v38, 16  ;;  %v2681_v6 = vpack.c.bf16 %v2663_v60, %v2660_v7  ;;  %v2730_v5 = vsel %vm6718_vm1, %v2718_v40, %v2729_v1  ;;  %4925 = vmatpush3.bf16.msra.mxu0 %v5140_v41  ;;  %v2751_v47 = vshll.u32 %v2682_v38, 16 }
 0x632   : > { %v2768_v25 = vsel %vm5486_vm6, %v2730_v5, 0  ;;  %vm6725_vm1 = vsmask.f32 7424  ;;  %vm6727_vm6 = vnez %v6677_v11  ;;  %v5141_v5 = vld [vmem:[%s6610_s14 + $0x78] sm:$0xff]  }
 0x633   : > { %v2750_v52 = vrot.slane %v2748_v20, 7  ;;  %v2740_v36 = vshrl.u32 %v2681_v6, 16  ;;  %4886 = vmatprep.mubr.msk.bf16.mxu0 %vm2220_vm8, %v2768_v25  ;;  %4914 = vmatprep.mubr.msk.bf16.mxu1 %vm2220_vm8, %v2681_v6  ;;  %v2743_v50 = vshll.u32 %v2681_v6, 16  ;;  %v3065_v26 = vsel %vm6725_vm1, %v3063_v17, %v3064_v12  ;;  %v5143_v25 = vld [vmem:[%s6610_s14 + $0x38] sm:$0xff]   ;;  %v5152_v12 = vld [vmem:[%s6610_s14 + $0x48] sm:$0xff]  }
 0x634   : > { %4887 = vmatmul.mubr.msk.bf16.gmra.mxu0 %vm2220_vm8, %v2769_v22  ;;  %4915 = vmatmul.mubr.msk.bf16.gmra.mxu1 %vm2220_vm8, %v2682_v38  ;;  %v3094_v3 = vsel %vm6728_vm5, %v3065_v26, 0  ;;  %v3082_v55 = vrot.slane %v2751_v47, 1  ;;  %v5147_v22 = vld [vmem:[%s6610_s14 + $0x28] sm:$0xff]   ;;  %v5148_v17 = vld [vmem:[%s6610_s14 + $0x58] sm:$0xff]   ;;  %v5157_v26 = vld [vmem:[%s6610_s14] sm:$0xff]  }
 0x635   : > { %v2753_v21 = vor.u32 %v2751_v47, %v2750_v52  ;;  %v2742_v40 = vrot.slane %v2740_v36, 7  ;;  %v3079_v41 = vrot.slane %v2743_v50, 1  ;;  %4974 = vmatprep.subr.bf16.mxu0 %v5141_v5  ;;  %v5144_v52 = vld [vmem:[%s6610_s14 + $0x68] sm:$0xff]   ;;  %4942 = vmatprep.subr.bf16.mxu1 %v5143_v25  ;;  %v5145_v47 = vld [vmem:[%s6610_s14 + $0x30] sm:$0xff]  }
 0x636   : > { %v3084_v13 = vor.u32 %v3082_v55, %v2748_v20  ;;  %v5142_v20 = vld [vmem:[%s6610_s14 + $0x70] sm:$0xff]   ;;  %4943 = vmatpush3.bf16.msra.mxu1 %v5143_v25 }
 0x637   : > { %v2745_v39 = vor.u32 %v2743_v50, %v2742_v40  ;;  %v2754_v37 = vsel %vm6723_vm9, %v2742_v40, %v2753_v21  ;;  %vm6729_vm9 = vmmov %vm6725_vm1  ;;  %v3081_v24 = vor.u32 %v3079_v41, %v2740_v36  ;;  %v5146_v36 = vld [vmem:[%s6610_s14 + $0x60] sm:$0xff]   ;;  %4944 = vmatprep.subr.bf16.mxu1 %v5145_v47  ;;  %v5150_v40 = vld [vmem:[%s6610_s14 + $0x50] sm:$0xff]  }
 0x638   : > { %v2771_v16 = vsel %vm6727_vm6, %v2754_v37, 0  ;;  %v3068_v10 = vsel %vm6729_vm9, %v3066_v31, %v3067_v43  ;;  %vm6732_vm6 = vnez %v6683_v27  ;;  %v5149_v21 = vld [vmem:[%s6610_s14 + $0x20] sm:$0xff]   ;;  %v5151_v50 = vld [vmem:[%s6610_s14 + $0x18] sm:$0xff]   ;;  %v5155_v43 = vld [vmem:[%s6610_s14 + $0x8] sm:$0xff]  }
 0x639   : > { %v2746_v61 = vsel %vm6724_vm14, %v2734_v15, %v2745_v39  ;;  %vm6730_vm14 = vmmov %vm6725_vm1  ;;  %vm6731_vm1 = vnez %v6681_v56  ;;  %v5153_v39 = vld [vmem:[%s6610_s14 + $0x10] sm:$0xff]   ;;  %v5154_v37 = vld [vmem:[%s6610_s14 + $0x40] sm:$0xff]  }
 0x63a   : > { %v2770_v19 = vsel %vm6726_vm2, %v2746_v61, 0  ;;  %v3071_v49 = vsel %vm6730_vm14, %v3069_v42, %v3070_v35  ;;  %v3095_v14 = vsel %vm6731_vm1, %v3068_v10, 0  ;;  %vm6733_vm2 = vmmov %vm6729_vm9  ;;  %4945 = vmatpush3.bf16.msra.mxu1 %v5145_v47  ;;  %v6293_v61 = vld [vmem:[%s6610_s14 + $0xb8] sm:$0xff]  }
 0x63b   : > { %4890 = vmatprep.mubr.msk.bf16.mxu0 %vm2220_vm8, %v2770_v19  ;;  %v3096_v18 = vsel %vm6732_vm6, %v3071_v49, 0  ;;  %v3074_v48 = vsel %vm6733_vm2, %v3072_v29, %v3073_v45  ;;  %vm6734_vm9 = vmmov %vm6733_vm2  ;;  %v3083_v4 = vsel %vm6733_vm2, %v3081_v24, %v3082_v55  ;;  %4946 = vmatprep.subr.bf16.mxu1 %v5147_v22 }
 0x63c   : > { %4891 = vmatmul.mubr.msk.bf16.gmra.mxu0 %vm2220_vm8, %v2771_v16  ;;  %v3077_v15 = vsel %vm6734_vm9, %v3075_v44, %v3076_v9  ;;  %v3097_v7 = vsel %vm5626_vm4, %v3074_v48, 0  ;;  %vm6737_vm14 = vmmov %vm6733_vm2  ;;  %v3100_v60 = vsel %vm5643_vm3, %v3083_v4, 0  ;;  %vm6741_vm9 = vnez %v6740_v28 }
 0x63d   : > { %4926 = vmatprep.mubr.msk.bf16.mxu0 %vm2220_vm8, %v3094_v3  ;;  %v3098_v0 = vsel %vm5631_vm0, %v3077_v15, 0  ;;  %v3080_v53 = vsel %vm6737_vm14, %v3078_v2, %v3079_v41  ;;  %v3093_v57 = vsel %vm6741_vm9, %v3084_v13, 0  ;;  %vm6748_vm14 = vnez %v6671_v30 }
 0x63e   : > { %v3099_v1 = vsel %vm5637_vm11, %v3080_v53, 0  ;;  %v3101_v6 = vsel %vm5656_vm12, %v3093_v57, 0  ;;  %4947 = vmatpush3.bf16.msra.mxu1 %v5147_v22 }
 0x63f   : > { %4948 = vmatprep.subr.bf16.mxu1 %v5149_v21 }
 0x642   : > { %4949 = vmatpush3.bf16.msra.mxu1 %v5149_v21 }
 0x643   : > { %4950 = vmatprep.subr.bf16.mxu1 %v5151_v50 }
 0x644   : > { %4927 = vmatmul.mubr.msk.bf16.vlgmr.msra.gmra.mxu0 %vm2220_vm8, %v3095_v14 }
 0x645   : > { %4930 = vmatprep.mubr.msk.bf16.mxu0 %vm2220_vm8, %v3096_v18  ;;  %4975 = vmatpush3.bf16.msra.mxu0 %v5141_v5  ;;  %v6315_v5 = vld [vmem:[%s6609_s13] ss:$0 sm:$0xff] }
 0x646   : > { %4976 = vmatprep.subr.bf16.mxu0 %v5142_v20  ;;  %4951 = vmatpush3.bf16.msra.mxu1 %v5151_v50 }
 0x647   : > { %4952 = vmatprep.subr.bf16.mxu1 %v5153_v39 }
 0x649   : > { %4977 = vmatpush3.bf16.msra.mxu0 %v5142_v20 }
 0x64a   : > { %4978 = vmatprep.subr.bf16.mxu0 %v5144_v52  ;;  %4953 = vmatpush3.bf16.msra.mxu1 %v5153_v39 }
 0x64b   : > { %4954 = vmatprep.subr.bf16.mxu1 %v5155_v43 }
 0x64c   : > { %4931 = vmatmul.mubr.msk.bf16.gmra.mxu0 %vm2220_vm8, %v3097_v7 }
 0x64d   : > { %4934 = vmatprep.mubr.msk.bf16.mxu0 %vm2220_vm8, %v3098_v0  ;;  %4979 = vmatpush3.bf16.msra.mxu0 %v5144_v52 }
 0x64e   : > { %4980 = vmatprep.subr.bf16.mxu0 %v5146_v36  ;;  %4955 = vmatpush3.bf16.msra.mxu1 %v5155_v43 }
 0x64f   : > { %4956 = vmatprep.subr.bf16.mxu1 %v5157_v26 }
 0x651   : > { %4981 = vmatpush3.bf16.msra.mxu0 %v5146_v36 }
 0x652   : > { %4982 = vmatprep.subr.bf16.mxu0 %v5148_v17  ;;  %4957 = vmatpush3.bf16.msra.mxu1 %v5157_v26 }
 0x653   : > { %5038 = vmatprep.subr.bf16.mxu1 %v6293_v61 }
 0x654   : > { %4935 = vmatmul.mubr.msk.bf16.gmra.mxu0 %vm2220_vm8, %v3099_v1 }
 0x655   : > { %4938 = vmatprep.mubr.msk.bf16.mxu0 %vm2220_vm8, %v3100_v60  ;;  %4983 = vmatpush3.bf16.msra.mxu0 %v5148_v17 }
 0x656   : > { %4984 = vmatprep.subr.bf16.mxu0 %v5150_v40 }
 0x659   : > { %4985 = vmatpush3.bf16.msra.mxu0 %v5150_v40 }
 0x65a   : > { %4986 = vmatprep.subr.bf16.mxu0 %v5152_v12 }
 0x65c   : > { %4939 = vmatmul.mubr.msk.bf16.gmra.mxu0 %vm2220_vm8, %v3101_v6  ;;  %vm6743_vm8 = vsmask.f32 256 }
 0x65d   : > { %4987 = vmatpush3.bf16.msra.mxu0 %v5152_v12 }
 0x65e   : > { %4988 = vmatprep.subr.bf16.mxu0 %v5154_v37 }
 0x661   : > { %4989 = vmatpush3.bf16.msra.mxu0 %v5154_v37 }
 0x662   : > { %5006 = vmatprep.subr.bf16.mxu0 %v6293_v61 }
 0x6dc   : > { %v4904_v19 = vpop.f32.mrf.mxu1 }
 0x6de   : > { %v2999_v42 = vpop.f32.mrf.mxu1 }
 0x6e0   : > { %v4905_v10 = vpop.f32.mrf.mxu1 }
 0x6e2   : > { %v3002_v14 = vpop.f32.mrf.mxu1 }
 0x6e4   : > { %v4880_v16 = vpop.f32.mrf.mxu0  ;;  %v4908_v29 = vpop.f32.mrf.mxu1 }
 0x6e5   : > { %v3008_v1 = vadd.f32 %v4904_v19, %v4880_v16 }
 0x6e6   : > { %v2862_v3 = vpop.f32.mrf.mxu0  ;;  %v3015_v41 = vpop.f32.mrf.mxu1 }
 0x6e7   : > { %v3000_v6 = vadd.f32 %v2999_v42, %v2862_v3 }
 0x6e8   : > { %v4881_v31 = vpop.f32.mrf.mxu0  ;;  %v4909_v0 = vpop.f32.mrf.mxu1 }
 0x6e9   : > { %v3011_v25 = vadd.f32 %v4905_v10, %v4881_v31 }
 0x6ea   : > { %v2865_v35 = vpop.f32.mrf.mxu0  ;;  %v3018_v55 = vpop.f32.mrf.mxu1 }
 0x6eb   : > { %v3003_v22 = vadd.f32 %v3002_v14, %v2865_v35 }
 0x6ec   : > { %v4884_v45 = vpop.f32.mrf.mxu0  ;;  %v4912_v60 = vpop.f32.mrf.mxu1 }
 0x6ed   : > { %v3024_v50 = vadd.f32 %v4908_v29, %v4884_v45 }
 0x6ee   : > { %v2878_v49 = vpop.f32.mrf.mxu0  ;;  %v3031_v52 = vpop.f32.mrf.mxu1 }
 0x6ef   : > { %v3016_v37 = vadd.f32 %v3015_v41, %v2878_v49 }
 0x6f0   : > { %v4885_v18 = vpop.f32.mrf.mxu0  ;;  %v4913_v43 = vpop.f32.mrf.mxu1 }
 0x6f2   : > { %v2881_v44 = vpop.f32.mrf.mxu0  ;;  %v3034_v45 = vpop.f32.mrf.mxu1 }
 0x6f4   : > { %v4888_v9 = vpop.f32.mrf.mxu0 }
 0x6f6   : > { %v2894_v48 = vpop.f32.mrf.mxu0 }
 0x6f8   : > { %v6300_v15 = vpop.f32.mrf.mxu0 }
 0x6fa   : > { %v6302_v7 = vpop.f32.mrf.mxu0 }
 0x6fc   : > { %v6304_v24 = vpop.f32.mrf.mxu0 }
 0x6fe   : > { %v6306_v2 = vpop.f32.mrf.mxu0 }
 0x700   : > { %v6308_v53 = vpop.f32.mrf.mxu0 }
 0x702   : > { %v6310_v4 = vpop.f32.mrf.mxu0 }
 0x704   : > { %v4928_v13 = vpop.f32.mrf.mxu0 }
 0x705   : > { %v3258_v57 = vadd.f32 %v4928_v13, %v3008_v1  ;;  %v3027_v13 = vadd.f32 %v4909_v0, %v4885_v18  ;;  %v6335_v18 = vld [vmem:[%s6610_s14 + $0xb0] sm:$0xff]   ;;  %v4916_v0 = vpop.f32.mrf.mxu1 }
 0x706   : > { %v3193_v20 = vpop.f32.mrf.mxu0 }
 0x707   : > { %v3256_v47 = vadd.f32 %v3193_v20, %v3000_v6  ;;  %v3281_v17 = vadd.f32 %v6315_v5, %v3258_v57  ;;  %v3019_v6 = vadd.f32 %v3018_v55, %v2881_v44  ;;  %v3040_v44 = vadd.f32 %v4912_v60, %v4888_v9 }
 0x708   : > { %v4929_v36 = vpop.f32.mrf.mxu0 }
 0x709   : > { %v3259_v21 = vadd.f32 %v4929_v36, %v3011_v25  ;;  %v3279_v26 = vadd.f32 %v6315_v5, %v3256_v47  ;;  %v3297_v16 = vmax.f32 %v3281_v17, 0.0 }
 0x70a   : > { %v3196_v40 = vpop.f32.mrf.mxu0 }
 0x70b   : > { %v3282_v12 = vadd.f32 %v6315_v5, %v3259_v21  ;;  %v3257_v39 = vadd.f32 %v3196_v40, %v3003_v22  ;;  %v3295_v29 = vmax.f32 %v3279_v26, 0.0 }
 0x70c   : > { %v4932_v19 = vpop.f32.mrf.mxu0 }
 0x70d   : > { %v3298_v3 = vmax.f32 %v3282_v12, 0.0  ;;  %v3280_v42 = vadd.f32 %v6315_v5, %v3257_v39  ;;  %v3262_v31 = vadd.f32 %v4932_v19, %v3024_v50  ;;  %v3032_v50 = vadd.f32 %v3031_v52, %v2894_v48 }
 0x70e   : > { %v3209_v10 = vpop.f32.mrf.mxu0 }
 0x70f   : > { %v6321_v35 = vpack.c.bf16 %v3298_v3, %v3297_v16  ;;  %v3296_v14 = vmax.f32 %v3280_v42, 0.0  ;;  %v3260_v1 = vadd.f32 %v3209_v10, %v3016_v37  ;;  %v3285_v41 = vadd.f32 %v6315_v5, %v3262_v31  ;;  %v3047_v31 = vpop.f32.mrf.mxu1 }
 0x710   : > { %v4933_v57 = vpop.f32.mrf.mxu0  ;;  %v3043_v3 = vadd.f32 %v4913_v43, %v6300_v15  ;;  %v6359_v15 = vld [vmem:[%s6610_s14 + $0xa8] sm:$0xff]   ;;  %v3035_v43 = vadd.f32 %v3034_v45, %v6302_v7  ;;  %v6380_v45 = vld [vmem:[%s6610_s14 + $0xa0] sm:$0xff]  }
 0x711   : > { %v3344_v49 = vshrl.u32 %v6321_v35, 16  ;;  %v3263_v20 = vadd.f32 %v4933_v57, %v3027_v13  ;;  %v6325_v47 = vpack.c.bf16 %v3296_v14, %v3295_v29  ;;  %v3283_v22 = vadd.f32 %v6315_v5, %v3260_v1  ;;  %v4917_v23 = vpop.f32.mrf.mxu1 }
 0x712   : > { %v3212_v25 = vpop.f32.mrf.mxu0  ;;  %v3347_v12 = vshll.u32 %v6321_v35, 16  ;;  %v3301_v39 = vmax.f32 %v3285_v41, 0.0  ;;  %v3056_v29 = vadd.f32 %v4916_v0, %v6304_v24  ;;  %v3048_v41 = vadd.f32 %v3047_v31, %v6306_v2 }
 0x713   : > { %v6329_v36 = vrot.slane %v3344_v49, 7  ;;  %v3261_v17 = vadd.f32 %v3212_v25, %v3019_v6  ;;  %v3286_v55 = vadd.f32 %v6315_v5, %v3263_v20  ;;  %v3337_v21 = vshrl.u32 %v6325_v47, 16  ;;  %4990 = vmatprep.mubr.bf16.mxu0 %v6325_v47  ;;  %v3050_v31 = vpop.f32.mrf.mxu1 }
 0x714   : > { %v4936_v40 = vpop.f32.mrf.mxu0  ;;  %4991 = vmatmul.mubr.bf16.vlgmr.msra.gmra.mxu0 %v6321_v35  ;;  %v3340_v16 = vshll.u32 %v6325_v47, 16  ;;  %v3299_v52 = vmax.f32 %v3283_v22, 0.0 }
 0x715   : > { %v3284_v37 = vadd.f32 %v6315_v5, %v3261_v17  ;;  %v3302_v26 = vmax.f32 %v3286_v55, 0.0  ;;  %v3266_v19 = vadd.f32 %v4936_v40, %v3040_v44  ;;  %5007 = vmatpush3.bf16.msra.mxu0 %v6293_v61  ;;  %v3339_v60 = vrot.slane %v3337_v21, 7 }
 0x716   : > { %v3225_v9 = vpop.f32.mrf.mxu0  ;;  %v3349_v48 = vor.u32 %v3347_v12, %v6329_v36  ;;  %5008 = vmatprep.subr.bf16.mxu0 %v6335_v18 }
 0x717   : > { %v3300_v42 = vmax.f32 %v3284_v37, 0.0  ;;  %v3264_v10 = vadd.f32 %v3225_v9, %v3032_v50  ;;  %v3342_v1 = vor.u32 %v3340_v16, %v3339_v60  ;;  %v6354_v13 = vpack.c.bf16 %v3302_v26, %v3301_v39 }
 0x718   : > { %v4937_v14 = vpop.f32.mrf.mxu0  ;;  %v3289_v20 = vadd.f32 %v6315_v5, %v3266_v19  ;;  %v3350_v24 = vsel %vm6743_vm8, %v3339_v60, %v3349_v48 }
 0x719   : > { %v3267_v57 = vadd.f32 %v4937_v14, %v3043_v3  ;;  %v6363_v6 = vpack.c.bf16 %v3300_v42, %v3299_v52  ;;  %5009 = vmatpush3.bf16.msra.mxu0 %v6335_v18  ;;  %v3407_v22 = vsel %vm5372_vm7, 0, %v3342_v1  ;;  %v3360_v17 = vshrl.u32 %v6354_v13, 16  ;;  %v6409_v42 = vld [vmem:[%s6610_s14 + $0x98] sm:$0xff]   ;;  %vm6744_vm7 = vmmov %vm6743_vm8 }
 0x71a   : > { %v3228_v25 = vpop.f32.mrf.mxu0  ;;  %4958 = vmatprep.mubr.msk.bf16.mxu1 %vm5389_vm10, %v3407_v22  ;;  %v3287_v0 = vadd.f32 %v6315_v5, %v3264_v10  ;;  %v3363_v40 = vshll.u32 %v6354_v13, 16  ;;  %5010 = vmatprep.subr.bf16.mxu0 %v6359_v15  ;;  %v3305_v19 = vmax.f32 %v3289_v20, 0.0  ;;  %v3059_v3 = vadd.f32 %v4917_v23, %v6308_v53  ;;  %vm6745_vm10 = vmmov %vm6744_vm7 }
 0x71b   : > { %v3290_v44 = vadd.f32 %v6315_v5, %v3267_v57  ;;  %v3265_v7 = vadd.f32 %v3228_v25, %v3035_v43  ;;  %v3352_v2 = vshrl.u32 %v6363_v6, 16  ;;  %4994 = vmatprep.mubr.bf16.mxu0 %v6363_v6  ;;  %4959 = vmatmul.mubr.msk.bf16.vlgmr.msra.gmra.mxu1 %vm5414_vm13, %v3350_v24  ;;  %v3355_v33 = vshll.u32 %v6363_v6, 16  ;;  %vm6749_vm2 = vmmov %vm6744_vm7 }
 0x71c   : > { %v4940_v55 = vpop.f32.mrf.mxu0  ;;  %v6390_v50 = vrot.slane %v3360_v17, 7  ;;  %4995 = vmatmul.mubr.bf16.gmra.mxu0 %v6354_v13  ;;  %5046 = vmatpush3.bf16.msra.mxu1 %v6293_v61  ;;  %v3303_v10 = vmax.f32 %v3287_v0, 0.0  ;;  %v3051_v43 = vadd.f32 %v3050_v31, %v6310_v4  ;;  %vm6746_vm13 = vnez %v6669_v8 }
 0x71d   : > { %v3306_v39 = vmax.f32 %v3290_v44, 0.0  ;;  %v3288_v37 = vadd.f32 %v6315_v5, %v3265_v7  ;;  %v3270_v26 = vadd.f32 %v4940_v55, %v3056_v29  ;;  %v3354_v46 = vrot.slane %v3352_v2, 7  ;;  %5011 = vmatpush3.bf16.msra.mxu0 %v6359_v15  ;;  %5039 = vmatprep.subr.bf16.mxu1 %v6335_v18 }
 0x71e   : > { %v3241_v9 = vpop.f32.mrf.mxu0  ;;  %v3365_v60 = vor.u32 %v3363_v40, %v6390_v50  ;;  %5012 = vmatprep.subr.bf16.mxu0 %v6380_v45  ;;  %vm6750_vm8 = vnez %v6673_v59 }
 0x71f   : > { %v3304_v48 = vmax.f32 %v3288_v37, 0.0  ;;  %v3268_v52 = vadd.f32 %v3241_v9, %v3048_v41  ;;  %v3357_v61 = vor.u32 %v3355_v33, %v3354_v46  ;;  %v6411_v1 = vpack.c.bf16 %v3306_v39, %v3305_v19 }
 0x720   : > { %v4941_v14 = vpop.f32.mrf.mxu0  ;;  %v3293_v53 = vadd.f32 %v6315_v5, %v3270_v26  ;;  %5047 = vmatpush3.bf16.msra.mxu1 %v6335_v18  ;;  %v3366_v20 = vsel %vm6745_vm10, %v3354_v46, %v3365_v60  ;;  %vm6752_vm10 = vmmov %vm6749_vm2 }
 0x721   : > { %v3271_v29 = vadd.f32 %v4941_v14, %v3059_v3  ;;  %v3358_v57 = vsel %vm6744_vm7, %v6329_v36, %v3357_v61  ;;  %5013 = vmatpush3.bf16.msra.mxu0 %v6380_v45  ;;  %v6422_v25 = vpack.c.bf16 %v3304_v48, %v3303_v10  ;;  %v3376_v4 = vshrl.u32 %v6411_v1, 16  ;;  %5040 = vmatprep.subr.bf16.mxu1 %v6359_v15 }
 0x722   : > { %v3244_v41 = vpop.f32.mrf.mxu0  ;;  %4962 = vmatprep.mubr.msk.bf16.mxu1 %vm5434_vm15, %v3358_v57  ;;  %v3291_v22 = vadd.f32 %v6315_v5, %v3268_v52  ;;  %5014 = vmatprep.subr.bf16.mxu0 %v6409_v42  ;;  %v3722_v36 = vrot.slane %v3340_v16, 1  ;;  %v3309_v23 = vmax.f32 %v3293_v53, 0.0  ;;  %v3379_v39 = vshll.u32 %v6411_v1, 16  ;;  %vm6747_vm15 = vmmov %vm6744_vm7 }
 0x723   : > { %v3294_v44 = vadd.f32 %v6315_v5, %v3271_v29  ;;  %v3269_v18 = vadd.f32 %v3244_v41, %v3051_v43  ;;  %4963 = vmatmul.mubr.msk.bf16.gmra.mxu1 %vm6746_vm13, %v3366_v20  ;;  %v3368_v7 = vshrl.u32 %v6422_v25, 16  ;;  %4998 = vmatprep.mubr.bf16.mxu0 %v6422_v25  ;;  %v3378_v24 = vrot.slane %v3376_v4, 7 }
 0x724   : > { %4999 = vmatmul.mubr.bf16.gmra.mxu0 %v6411_v1  ;;  %5048 = vmatpush3.bf16.msra.mxu1 %v6359_v15  ;;  %v3371_v8 = vshll.u32 %v6422_v25, 16  ;;  %v3307_v37 = vmax.f32 %v3291_v22, 0.0  ;;  %v5163_v15 = vld [vmem:[%s6610_s14 + $0x88] sm:$0xff]   ;;  %v3723_v9 = vor.u32 %v3722_v36, %v3337_v21  ;;  %v3724_v52 = vrot.slane %v3347_v12, 1 }
 0x725   : > { %v3310_v0 = vmax.f32 %v3294_v44, 0.0  ;;  %v3292_v55 = vadd.f32 %v6315_v5, %v3269_v18  ;;  %5015 = vmatpush3.bf16.msra.mxu0 %v6409_v42  ;;  %5041 = vmatprep.subr.bf16.mxu1 %v6380_v45  ;;  %v3370_v16 = vrot.slane %v3368_v7, 7  ;;  %v3381_v46 = vor.u32 %v3379_v39, %v3378_v24 }
 0x726   : > { %5016 = vmatprep.subr.bf16.mxu0 %v5162_v54  ;;  %vm6751_vm7 = vsmask.f32 7424  ;;  %v3727_v12 = vrot.slane %v3355_v33, 1  ;;  %v3726_v53 = vor.u32 %v3724_v52, %v3344_v49  ;;  %vm6753_vm13 = vnez %v6675_v63 }
 0x727   : > { %v3308_v26 = vmax.f32 %v3292_v55, 0.0  ;;  %v6449_v5 = vpack.c.bf16 %v3310_v0, %v3309_v23  ;;  %v3373_v19 = vor.u32 %v3371_v8, %v3370_v16  ;;  %v3382_v47 = vsel %vm6749_vm2, %v3370_v16, %v3381_v46 }
 0x728   : > { %5049 = vmatpush3.bf16.msra.mxu1 %v6380_v45  ;;  %v5164_v45 = vld [vmem:[%s6610_s14 + $0x80] sm:$0xff]   ;;  %v3729_v33 = vor.u32 %v3727_v12, %v3352_v2  ;;  %v3733_v29 = vrot.slane %v3371_v8, 1 }
 0x729   : > { %v3317_v60 = vpack.c.bf16 %v3308_v26, %v3307_v37  ;;  %v3392_v3 = vshrl.u32 %v6449_v5, 16  ;;  %5017 = vmatpush3.bf16.msra.mxu0 %v5162_v54  ;;  %v3374_v48 = vsel %vm6747_vm15, %v6390_v50, %v3373_v19  ;;  %5042 = vmatprep.subr.bf16.mxu1 %v6409_v42  ;;  %v3725_v50 = vsel %vm6751_vm7, %v3723_v9, %v3724_v52  ;;  %vm6754_vm15 = vmmov %vm6749_vm2  ;;  %v6533_v52 = vld [vmem:[%s6611_s15] ss:$0 sm:$0xff] }
 0x72a   : > { %4966 = vmatprep.mubr.msk.bf16.mxu1 %vm6748_vm14, %v3374_v48  ;;  %5018 = vmatprep.subr.bf16.mxu0 %v5163_v15  ;;  %v3395_v31 = vshll.u32 %v6449_v5, 16  ;;  %vm6756_vm14 = vmmov %vm6751_vm7  ;;  %v3735_v63 = vor.u32 %v3733_v29, %v3368_v7 }
 0x72b   : > { %v3384_v21 = vshrl.u32 %v3317_v60, 16  ;;  %5002 = vmatprep.mubr.bf16.mxu0 %v3317_v60  ;;  %v3394_v61 = vrot.slane %v3392_v3, 7  ;;  %4967 = vmatmul.mubr.msk.bf16.gmra.mxu1 %vm6750_vm8, %v3382_v47  ;;  %v3387_v30 = vshll.u32 %v3317_v60, 16  ;;  %v3728_v6 = vsel %vm6756_vm14, %v3726_v53, %v3727_v12  ;;  %vm6757_vm2 = vmmov %vm6751_vm7 }
 0x72c   : > { %5003 = vmatmul.mubr.bf16.gmra.mxu0 %v6449_v5  ;;  %5050 = vmatpush3.bf16.msra.mxu1 %v6409_v42  ;;  %v3730_v42 = vrot.slane %v3363_v40, 1  ;;  %vm6758_vm8 = vmmov %vm6757_vm2  ;;  %v3742_v41 = vrot.slane %v3395_v31, 1 }
 0x72d   : > { %v3386_v10 = vrot.slane %v3384_v21, 7  ;;  %5019 = vmatpush3.bf16.msra.mxu0 %v5163_v15  ;;  %5022 = vmatprep.mubr.msk.bf16.mxu0 %vm6728_vm5, %v3725_v50  ;;  %v3397_v14 = vor.u32 %v3395_v31, %v3394_v61  ;;  %vm6755_vm5 = vnez %v6677_v11  ;;  %v3736_v11 = vrot.slane %v3379_v39, 1 }
 0x72e   : > { %5043 = vmatprep.subr.bf16.mxu1 %v5162_v54  ;;  %5020 = vmatprep.subr.bf16.mxu0 %v5164_v45  ;;  %v3731_v35 = vsel %vm6757_vm2, %v3729_v33, %v3730_v42  ;;  %v3732_v49 = vor.u32 %v3730_v42, %v3360_v17  ;;  %v3739_v40 = vrot.slane %v3387_v30, 1  ;;  %v3744_v62 = vor.u32 %v3742_v41, %v3392_v3 }
 0x72f   : > { %v3389_v59 = vor.u32 %v3387_v30, %v3386_v10  ;;  %v3398_v32 = vsel %vm6754_vm15, %v3386_v10, %v3397_v14  ;;  %v3738_v57 = vor.u32 %v3736_v11, %v3376_v4 }
 0x730   : > { %5051 = vmatpush3.bf16.msra.mxu1 %v5162_v54  ;;  %v3734_v2 = vsel %vm6758_vm8, %v3732_v49, %v3733_v29  ;;  %v3741_v27 = vor.u32 %v3739_v40, %v3384_v21  ;;  %v3753_v58 = vsel %vm6741_vm9, %v3744_v62, 0 }
 0x731   : > { %v3390_v43 = vsel %vm6752_vm10, %v3378_v24, %v3389_v59  ;;  %5021 = vmatpush3.bf16.msra.mxu0 %v5164_v45  ;;  %5044 = vmatprep.subr.bf16.mxu1 %v5163_v15 }
 0x732   : > { %4970 = vmatprep.mubr.msk.bf16.mxu1 %vm6753_vm13, %v3390_v43 }
 0x733   : > { %4971 = vmatmul.mubr.msk.bf16.gmra.mxu1 %vm6755_vm5, %v3398_v32 }
 0x734   : > { %5052 = vmatpush3.bf16.msra.mxu1 %v5163_v15  ;;  %5023 = vmatmul.mubr.msk.bf16.vlgmr.msra.gmra.mxu0 %vm6731_vm1, %v3728_v6  ;;  %vm6759_vm1 = vmmov %vm6757_vm2 }
 0x735   : > { %5026 = vmatprep.mubr.msk.bf16.mxu1 %vm6732_vm6, %v3731_v35  ;;  %5045 = vmatprep.subr.bf16.mxu1 %v5164_v45  ;;  %v3737_v56 = vsel %vm6759_vm1, %v3735_v63, %v3736_v11  ;;  %vm6760_vm6 = vmmov %vm6759_vm1 }
 0x736   : > { %v3740_v13 = vsel %vm6760_vm6, %v3738_v57, %v3739_v40  ;;  %vm6761_vm7 = vmmov %vm6759_vm1 }
 0x737   : > { %v3743_v17 = vsel %vm6761_vm7, %v3741_v27, %v3742_v41 }
 0x738   : > { %5053 = vmatpush3.bf16.msra.mxu1 %v5164_v45 }
 0x73b   : > { %5027 = vmatmul.mubr.msk.bf16.vlgmr.msra.gmra.mxu1 %vm5626_vm4, %v3734_v2 }
 0x73c   : > { %5030 = vmatprep.mubr.msk.bf16.mxu1 %vm5631_vm0, %v3737_v56 }
 0x743   : > { %5031 = vmatmul.mubr.msk.bf16.gmra.mxu1 %vm5637_vm11, %v3740_v13 }
 0x744   : > { %5034 = vmatprep.mubr.msk.bf16.mxu1 %vm5643_vm3, %v3743_v17  ;;  %vm6762_vm3 = vcmask 392192  }
 0x745   : > { %vm6763_vm0 = vmmov %vm6762_vm3 }
 0x746   : > { %vm6764_vm4 = vmmov %vm6763_vm0 }
 0x747   : > { %vm6765_vm11 = vmmov %vm6763_vm0 }
 0x748   : > { %vm6767_vm9 = vmmov %vm6763_vm0 }
 0x749   : > { %vm6768_vm10 = vmmov %vm6763_vm0 }
 0x74a   : > { %vm6769_vm13 = vmmov %vm6763_vm0 }
 0x74b   : > { %5035 = vmatmul.mubr.msk.bf16.gmra.mxu1 %vm5656_vm12, %v3753_v58  ;;  %vm6766_vm12 = vmmov %vm6763_vm0 }
 0x74c   : > { %vm6770_vm15 = vmmov %vm6763_vm0 }
 0x74d   : > { %vm6771_vm5 = vmmov %vm6763_vm0 }
 0x74e   : > { %vm6772_vm14 = vmmov %vm6763_vm0 }
 0x74f   : > { %vm6773_vm2 = vmmov %vm6763_vm0 }
 0x750   : > { %vm6774_vm8 = vmmov %vm6763_vm0 }
 0x751   : > { %vm6775_vm1 = vmmov %vm6763_vm0 }
 0x752   : > { %vm6776_vm6 = vmmov %vm6763_vm0 }
 0x753   : > { %vm6777_vm7 = vmmov %vm6763_vm0 }
 0x7d4   : > { %v4992_v1 = vpop.f32.mrf.mxu0 }
 0x7d6   : > { %v3659_v20 = vpop.f32.mrf.mxu0 }
 0x7d8   : > { %v4993_v25 = vpop.f32.mrf.mxu0 }
 0x7da   : > { %v3662_v4 = vpop.f32.mrf.mxu0 }
 0x7db   : > { %v4960_v22 = vpop.f32.mrf.mxu1 }
 0x7dc   : > { %v4996_v44 = vpop.f32.mrf.mxu0  ;;  %v3668_v60 = vadd.f32 %v4992_v1, %v4960_v22 }
 0x7dd   : > { %v3514_v51 = vpop.f32.mrf.mxu1 }
 0x7de   : > { %v3675_v18 = vpop.f32.mrf.mxu0  ;;  %v3660_v47 = vadd.f32 %v3659_v20, %v3514_v51 }
 0x7df   : > { %v4961_v54 = vpop.f32.mrf.mxu1 }
 0x7e0   : > { %v4997_v36 = vpop.f32.mrf.mxu0  ;;  %v3671_v50 = vadd.f32 %v4993_v25, %v4961_v54 }
 0x7e1   : > { %v3517_v7 = vpop.f32.mrf.mxu1 }
 0x7e2   : > { %v3678_v38 = vpop.f32.mrf.mxu0  ;;  %v3663_v59 = vadd.f32 %v3662_v4, %v3517_v7 }
 0x7e3   : > { %v4964_v24 = vpop.f32.mrf.mxu1 }
 0x7e4   : > { %v5000_v23 = vpop.f32.mrf.mxu0  ;;  %v3684_v53 = vadd.f32 %v4996_v44, %v4964_v24 }
 0x7e5   : > { %v3530_v0 = vpop.f32.mrf.mxu1 }
 0x7e6   : > { %v3691_v28 = vpop.f32.mrf.mxu0  ;;  %v3676_v35 = vadd.f32 %v3675_v18, %v3530_v0 }
 0x7e7   : > { %v4965_v55 = vpop.f32.mrf.mxu1 }
 0x7e8   : > { %v5001_v34 = vpop.f32.mrf.mxu0  ;;  %v3687_v2 = vadd.f32 %v4997_v36, %v4965_v55 }
 0x7e9   : > { %v3533_v39 = vpop.f32.mrf.mxu1 }
 0x7ea   : > { %v6519_v8 = vpop.f32.mrf.mxu0  ;;  %v3679_v57 = vadd.f32 %v3678_v38, %v3533_v39 }
 0x7eb   : > { %v4968_v16 = vpop.f32.mrf.mxu1 }
 0x7ec   : > { %v6521_v37 = vpop.f32.mrf.mxu0  ;;  %v3700_v62 = vadd.f32 %v5000_v23, %v4968_v16 }
 0x7ed   : > { %v3546_v26 = vpop.f32.mrf.mxu1 }
 0x7ee   : > { %v6523_v46 = vpop.f32.mrf.mxu0  ;;  %v3692_v25 = vadd.f32 %v3691_v28, %v3546_v26 }
 0x7ef   : > { %v4969_v5 = vpop.f32.mrf.mxu1 }
 0x7f0   : > { %v6525_v19 = vpop.f32.mrf.mxu0  ;;  %v3703_v51 = vadd.f32 %v5001_v34, %v4969_v5 }
 0x7f1   : > { %v3549_v15 = vpop.f32.mrf.mxu1 }
 0x7f2   : > { %v6527_v9 = vpop.f32.mrf.mxu0  ;;  %v3695_v7 = vadd.f32 %v6519_v8, %v3549_v15 }
 0x7f3   : > { %v4972_v3 = vpop.f32.mrf.mxu1 }
 0x7f4   : > { %v5024_v48 = vpop.f32.mrf.mxu0  ;;  %v3716_v0 = vadd.f32 %v6521_v37, %v4972_v3 }
 0x7f5   : > { %v3926_v21 = vadd.f32 %v5024_v48, %v3668_v60  ;;  %v3562_v45 = vpop.f32.mrf.mxu1 }
 0x7f6   : > { %v3861_v61 = vpop.f32.mrf.mxu0  ;;  %v3708_v39 = vadd.f32 %v6523_v46, %v3562_v45 }
 0x7f7   : > { %v3949_v12 = vadd.f32 %v6533_v52, %v3926_v21  ;;  %v3924_v30 = vadd.f32 %v3861_v61, %v3660_v47  ;;  %v4973_v31 = vpop.f32.mrf.mxu1 }
 0x7f8   : > { %v5025_v10 = vpop.f32.mrf.mxu0  ;;  %v3719_v37 = vadd.f32 %v6525_v19, %v4973_v31 }
 0x7f9   : > { %3965 = vst.msk [vmem:[%s6538_s10 + $0x10] sm:$0xff] %vm6762_vm3, %v3949_v12  ;;  %v3947_v14 = vadd.f32 %v6533_v52, %v3924_v30  ;;  %v3927_v43 = vadd.f32 %v5025_v10, %v3671_v50  ;;  %v3565_v33 = vpop.f32.mrf.mxu1 }
 0x7fa   : > { %v3864_v32 = vpop.f32.mrf.mxu0  ;;  %v3711_v3 = vadd.f32 %v6527_v9, %v3565_v33 }
 0x7fb   : > { %3963 = vst.msk [vmem:[%s6538_s10] sm:$0xff] %vm6763_vm0, %v3947_v14  ;;  %v3950_v42 = vadd.f32 %v6533_v52, %v3927_v43  ;;  %v3925_v29 = vadd.f32 %v3864_v32, %v3663_v59  ;;  %v5028_v6 = vpop.f32.mrf.mxu1 }
 0x7fc   : > { %v3930_v63 = vadd.f32 %v5028_v6, %v3684_v53 }
 0x7fd   : > { %3966 = vst.msk [vmem:[%s6538_s10 + $0x18] sm:$0xff] %vm6764_vm4, %v3950_v42  ;;  %v3948_v49 = vadd.f32 %v6533_v52, %v3925_v29  ;;  %v3877_v11 = vpop.f32.mrf.mxu1 }
 0x7fe   : > { %v3953_v56 = vadd.f32 %v6533_v52, %v3930_v63  ;;  %v3928_v40 = vadd.f32 %v3877_v11, %v3676_v35 }
 0x7ff   : > { %3964 = vst.msk [vmem:[%s6538_s10 + $0x8] sm:$0xff] %vm6765_vm11, %v3948_v49  ;;  %v5029_v27 = vpop.f32.mrf.mxu1 }
 0x800   : > { %3969 = vst.msk [vmem:[%s6538_s10 + $0x30] sm:$0xff] %vm6766_vm12, %v3953_v56  ;;  %v3951_v41 = vadd.f32 %v6533_v52, %v3928_v40  ;;  %v3931_v13 = vadd.f32 %v5029_v27, %v3687_v2 }
 0x801   : > { %v3880_v17 = vpop.f32.mrf.mxu1 }
 0x802   : > { %3967 = vst.msk [vmem:[%s6538_s10 + $0x20] sm:$0xff] %vm6767_vm9, %v3951_v41  ;;  %v3954_v58 = vadd.f32 %v6533_v52, %v3931_v13  ;;  %v3929_v1 = vadd.f32 %v3880_v17, %v3679_v57 }
 0x803   : > { %v5032_v20 = vpop.f32.mrf.mxu1 }
 0x804   : > { %3970 = vst.msk [vmem:[%s6538_s10 + $0x38] sm:$0xff] %vm6768_vm10, %v3954_v58  ;;  %v3952_v4 = vadd.f32 %v6533_v52, %v3929_v1  ;;  %v3934_v22 = vadd.f32 %v5032_v20, %v3700_v62 }
 0x805   : > { %v3893_v44 = vpop.f32.mrf.mxu1 }
 0x806   : > { %3968 = vst.msk [vmem:[%s6538_s10 + $0x28] sm:$0xff] %vm6769_vm13, %v3952_v4  ;;  %v3957_v18 = vadd.f32 %v6533_v52, %v3934_v22  ;;  %v3932_v54 = vadd.f32 %v3893_v44, %v3692_v25 }
 0x807   : > { %v5033_v36 = vpop.f32.mrf.mxu1 }
 0x808   : > { %3973 = vst.msk [vmem:[%s6538_s10 + $0x50] sm:$0xff] %vm6770_vm15, %v3957_v18  ;;  %v3955_v38 = vadd.f32 %v6533_v52, %v3932_v54  ;;  %v3935_v24 = vadd.f32 %v5033_v36, %v3703_v51 }
 0x809   : > { %v3896_v23 = vpop.f32.mrf.mxu1 }
 0x80a   : > { %3971 = vst.msk [vmem:[%s6538_s10 + $0x40] sm:$0xff] %vm6771_vm5, %v3955_v38  ;;  %v3958_v28 = vadd.f32 %v6533_v52, %v3935_v24  ;;  %v3933_v55 = vadd.f32 %v3896_v23, %v3695_v7 }
 0x80b   : > { %v5036_v34 = vpop.f32.mrf.mxu1 }
 0x80c   : > { %3974 = vst.msk [vmem:[%s6538_s10 + $0x58] sm:$0xff] %vm6772_vm14, %v3958_v28  ;;  %v3956_v8 = vadd.f32 %v6533_v52, %v3933_v55  ;;  %v3938_v16 = vadd.f32 %v5036_v34, %v3716_v0 }
 0x80d   : > { %v3909_v26 = vpop.f32.mrf.mxu1 }
 0x80e   : > { %3972 = vst.msk [vmem:[%s6538_s10 + $0x48] sm:$0xff] %vm6773_vm2, %v3956_v8  ;;  %v3961_v5 = vadd.f32 %v6533_v52, %v3938_v16  ;;  %v3936_v15 = vadd.f32 %v3909_v26, %v3708_v39 }
 0x80f   : > { %v5037_v60 = vpop.f32.mrf.mxu1 }
 0x810   : > { %3977 = vst.msk [vmem:[%s6538_s10 + $0x70] sm:$0xff] %vm6774_vm8, %v3961_v5  ;;  %v3959_v46 = vadd.f32 %v6533_v52, %v3936_v15  ;;  %v3939_v48 = vadd.f32 %v5037_v60, %v3719_v37 }
 0x811   : > { %v3912_v47 = vpop.f32.mrf.mxu1 }
 0x812   : > { %3975 = vst.msk [vmem:[%s6538_s10 + $0x60] sm:$0xff] %vm6775_vm1, %v3959_v46  ;;  %v3962_v21 = vadd.f32 %v6533_v52, %v3939_v48  ;;  %v3937_v45 = vadd.f32 %v3912_v47, %v3711_v3 }
 0x814   : > { %3978 = vst.msk [vmem:[%s6538_s10 + $0x78] sm:$0xff] %vm6776_vm6, %v3962_v21  ;;  %v3960_v19 = vadd.f32 %v6533_v52, %v3937_v45 }
 0x816   : > { %3976 = vst.msk [vmem:[%s6538_s10 + $0x68] sm:$0xff] %vm6777_vm7, %v3960_v19 }
 0x817 PF: > { %s34_s29 = sadd.s32 1, %s5201_s29  }
 0x818   : > { %p31_p10 = scmp.ge.s32.totalorder %s34_s29, 4  }
 0x81a   :  { %33 = sbr.rel (!%p31_p10) target bundleno = 31 (0x1f), region = 143 }

</bundles_post_ra>
